<compile_context>
chip_gen: v7x
topology: tpu7x:2x2x1
jax: 0.10.0
libtpu: 0.0.40
codegen_flags: <defaults>
</compile_context>

<pallas_src>
import jax
import jax.numpy as jnp
from jax.experimental import pallas as pl
from jax.experimental.pallas import tpu as pltpu


# ----------------------------------------------------------------------------
# helpers
# ----------------------------------------------------------------------------
def _round_up(x, m):
    return ((x + m - 1) // m) * m


def _choose_tile(M, max_tm):
    """Pick an M tile (multiple of 8) and the padded M extent it divides."""
    m8 = _round_up(M, 8)
    if m8 <= max_tm:
        return m8, m8
    return max_tm, _round_up(M, max_tm)


# ----------------------------------------------------------------------------
# Pallas kernels
# ----------------------------------------------------------------------------
def _conv_relu_pool_kernel(x_ref, w_ref, b_ref, o_ref):
    """o[m, :] = max_{p<4} relu(x[p, m, :] @ w + b).

    x_ref: (4, tm, Kpad) bf16 -- im2col patches, one plane per 2x2 pool phase.
    w_ref: (Kpad, Npad) bf16, b_ref: (1, Npad) f32, o_ref: (tm, Npad) bf16.
    Fused conv-GEMM + bias + ReLU + 2x2 max-pool epilogue.
    """
    w = w_ref[...]
    bias = b_ref[...]
    out = None
    for p in range(4):                         # static unroll, 4 MXU matmuls
        acc = jnp.dot(x_ref[p], w, preferred_element_type=jnp.float32)
        acc = jnp.maximum(acc + bias, 0.0)     # bias + ReLU in f32 on the VPU
        out = acc if out is None else jnp.maximum(out, acc)
    o_ref[...] = out.astype(o_ref.dtype)


def _fc_stack_kernel(x_ref, w1_ref, b1_ref, w2_ref, b2_ref, w3_ref, b3_ref,
                     o_ref):
    """Fused fc1+ReLU -> fc2+ReLU -> fc3 (all N/K padded to 128)."""
    h = jnp.dot(x_ref[...], w1_ref[...], preferred_element_type=jnp.float32)
    h = jnp.maximum(h + b1_ref[...], 0.0)
    h = jnp.dot(h.astype(jnp.bfloat16), w2_ref[...],
                preferred_element_type=jnp.float32)
    h = jnp.maximum(h + b2_ref[...], 0.0)
    h = jnp.dot(h.astype(jnp.bfloat16), w3_ref[...],
                preferred_element_type=jnp.float32)
    o_ref[...] = (h + b3_ref[...]).astype(o_ref.dtype)


# ----------------------------------------------------------------------------
# conv (valid, stride 1) + ReLU + 2x2/2 max pool, fused in one pallas_call
# ----------------------------------------------------------------------------
def _pooled_patches(x_nhwc, k):
    """im2col patches grouped by 2x2 pool phase.

    Returns (4, B*Hp*Wp, Cin*k*k) with feature order (ci, kh, kw) -- matching
    torch's weight.reshape(Cout, Cin*k*k) -- plus (Hp, Wp).
    Plane p = dh*2+dw holds the patches of conv position (2*oh+dh, 2*ow+dw).
    """
    B, H, W, C = x_nhwc.shape
    Ho, Wo = H - k + 1, W - k + 1
    Hp, Wp = Ho // 2, Wo // 2
    views = [x_nhwc[:, i:i + Ho, j:j + Wo, :] for i in range(k) for j in range(k)]
    p = jnp.stack(views, axis=-1)                  # (B, Ho, Wo, C, k*k)
    planes = [
        p[:, dh:dh + 2 * Hp:2, dw:dw + 2 * Wp:2].reshape(B * Hp * Wp, C * k * k)
        for dh in range(2) for dw in range(2)
    ]
    return jnp.stack(planes, axis=0), Hp, Wp       # (4, B*Hp*Wp, C*k*k)


def conv_relu_pool(x_nhwc, w, b, *, max_tm=512):
    """x_nhwc: (B,H,W,Cin), w: (Cout,Cin,k,k), b: (Cout,).
    Returns NHWC pooled activation with the channel axis zero-padded to 128
    lanes: (B, Hp, Wp, Npad) in bf16."""
    Cout, Cin, k, _ = w.shape
    B, H, W, C = x_nhwc.shape
    assert C == Cin, (C, Cin)

    K = Cin * k * k
    Kpad = _round_up(K, 128)
    Npad = _round_up(Cout, 128)

    patches, Hp, Wp = _pooled_patches(x_nhwc, k)   # (4, M, K)
    M = B * Hp * Wp
    tm, Mpad = _choose_tile(M, max_tm)

    # TODO(synk): patch extraction stays as thin XLA glue; a fully in-kernel
    # im2col (VMEM-resident input tile + shifted reads) would cut HBM traffic
    # further for large batches.
    patches = jnp.pad(patches, ((0, 0), (0, Mpad - M), (0, Kpad - K)))
    patches = patches.astype(jnp.bfloat16)
    w_mat = jnp.pad(w.reshape(Cout, K).T,
                    ((0, Kpad - K), (0, Npad - Cout))).astype(jnp.bfloat16)
    b_mat = jnp.pad(b, (0, Npad - Cout)).reshape(1, Npad).astype(jnp.float32)

    grid = (Mpad // tm,)
    flops = 2 * 4 * Mpad * Kpad * Npad
    bytes_accessed = (patches.size * 2 + w_mat.size * 2 + b_mat.size * 4
                      + Mpad * Npad * 2)

    out = pl.pallas_call(
        _conv_relu_pool_kernel,
        out_shape=jax.ShapeDtypeStruct((Mpad, Npad), jnp.bfloat16),
        grid_spec=pltpu.PrefetchScalarGridSpec(
            num_scalar_prefetch=0,
            grid=grid,
            in_specs=[
                pl.BlockSpec((4, tm, Kpad), lambda i: (0, i, 0)),
                pl.BlockSpec((Kpad, Npad), lambda i: (0, 0)),
                pl.BlockSpec((1, Npad), lambda i: (0, 0)),
            ],
            out_specs=pl.BlockSpec((tm, Npad), lambda i: (i, 0)),
        ),
        compiler_params=pltpu.CompilerParams(
            dimension_semantics=("parallel",),
            vmem_limit_bytes=32 * 1024 * 1024,
        ),
        cost_estimate=pl.CostEstimate(
            flops=flops, transcendentals=0, bytes_accessed=bytes_accessed),
    )(patches, w_mat, b_mat)

    return out[:M].reshape(B, Hp, Wp, Npad)


# ----------------------------------------------------------------------------
# fused fc1+relu / fc2+relu / fc3
# ----------------------------------------------------------------------------
def fc_stack(x, w1, b1, w2, b2, w3, b3, *, max_tm=256):
    """x: (B, K1) bf16; weights bf16 (K padded), biases f32 (1, 128)."""
    B, K1 = x.shape
    tm, Mpad = _choose_tile(B, max_tm)
    x = jnp.pad(x, ((0, Mpad - B), (0, 0)))
    Nout = w3.shape[1]

    out = pl.pallas_call(
        _fc_stack_kernel,
        out_shape=jax.ShapeDtypeStruct((Mpad, Nout), jnp.float32),
        grid_spec=pltpu.PrefetchScalarGridSpec(
            num_scalar_prefetch=0,
            grid=(Mpad // tm,),
            in_specs=[
                pl.BlockSpec((tm, K1), lambda i: (i, 0)),
                pl.BlockSpec(w1.shape, lambda i: (0, 0)),
                pl.BlockSpec((1, w1.shape[1]), lambda i: (0, 0)),
                pl.BlockSpec(w2.shape, lambda i: (0, 0)),
                pl.BlockSpec((1, w2.shape[1]), lambda i: (0, 0)),
                pl.BlockSpec(w3.shape, lambda i: (0, 0)),
                pl.BlockSpec((1, w3.shape[1]), lambda i: (0, 0)),
            ],
            out_specs=pl.BlockSpec((tm, Nout), lambda i: (i, 0)),
        ),
        compiler_params=pltpu.CompilerParams(
            dimension_semantics=("parallel",),
            vmem_limit_bytes=32 * 1024 * 1024,
        ),
    )(x, w1, b1, w2, b2, w3, b3)
    return out[:B]


# ----------------------------------------------------------------------------
# full forward pass (mirrors Net.forward)
# ----------------------------------------------------------------------------
def net_forward(x_nchw, params):
    # one cheap layout change at the input; everything after stays NHWC.
    x = x_nchw.transpose(0, 2, 3, 1)                                  # (B,32,32,3)

    # conv1 + relu + pool (fused): -> (B,14,14,128) [real channels 0..5]
    x = conv_relu_pool(x, params["conv1_w"], params["conv1_b"])
    # conv2 + relu + pool (fused): -> (B,5,5,128) [real channels 0..15]
    x = conv_relu_pool(x[..., :6], params["conv2_w"], params["conv2_b"])

    B = x.shape[0]
    x = x.reshape(B, 5 * 5 * 128)   # lane-dense flatten, no transpose

    # Fold torch's NCHW view(-1, 400) ordering + channel padding into fc1's
    # weight: dst row h*640 + w*128 + c  <-  src row c*25 + h*5 + w.
    w1 = params["fc1_w"].reshape(16, 5, 5, 120).transpose(1, 2, 0, 3)  # (5,5,16,120)
    w1 = jnp.pad(w1, ((0, 0), (0, 0), (0, 128 - 16), (0, 128 - 120)))
    w1 = w1.reshape(5 * 5 * 128, 128).astype(jnp.bfloat16)
    b1 = jnp.pad(params["fc1_b"], (0, 128 - 120)).reshape(1, 128).astype(jnp.float32)

    w2 = jnp.pad(params["fc2_w"], ((0, 128 - 120), (0, 128 - 84))).astype(jnp.bfloat16)
    b2 = jnp.pad(params["fc2_b"], (0, 128 - 84)).reshape(1, 128).astype(jnp.float32)
    w3 = jnp.pad(params["fc3_w"], ((0, 128 - 84), (0, 128 - 2))).astype(jnp.bfloat16)
    b3 = jnp.pad(params["fc3_b"], (0, 128 - 2)).reshape(1, 128).astype(jnp.float32)

    out = fc_stack(x, w1, b1, w2, b2, w3, b3)   # (B, 128), real cols 0..1
    return out[:, :2]


def init_params(key):
    """Deterministic synthetic init matching the PyTorch module's shapes."""
    ks = jax.random.split(key, 10)

    def u(k, shape, fan_in):
        bound = 1.0 / jnp.sqrt(fan_in)
        return jax.random.uniform(k, shape, jnp.float32, -bound, bound)

    return {
        "conv1_w": u(ks[0], (6, 3, 5, 5), 3 * 5 * 5),
        "conv1_b": u(ks[1], (6,), 3 * 5 * 5),
        "conv2_w": u(ks[2], (16, 6, 5, 5), 6 * 5 * 5),
        "conv2_b": u(ks[3], (16,), 6 * 5 * 5),
        # Linear weights stored pre-transposed as (in, out): y = x @ W + b
        "fc1_w": u(ks[4], (16 * 5 * 5, 120), 16 * 5 * 5),
        "fc1_b": u(ks[5], (120,), 16 * 5 * 5),
        "fc2_w": u(ks[6], (120, 84), 120),
        "fc2_b": u(ks[7], (84,), 120),
        "fc3_w": u(ks[8], (84, 2), 84),
        "fc3_b": u(ks[9], (2,), 84),
    }


if __name__ == "__main__":
    key = jax.random.PRNGKey(0)
    k_in, k_par = jax.random.split(key)
    # The forward's view(-1, 16*5*5) pins spatial size to 32x32, channels to 3.
    x = jax.random.normal(k_in, (2, 3, 32, 32), jnp.float32)
    params = init_params(k_par)

    fwd = jax.jit(net_forward)
    out = jax.block_until_ready(fwd(x, params))
    assert out.shape == (2, 2), out.shape
    print("KERNEL_OK")
</pallas_src>

<mosaic_0001>
module attributes {stable_mosaic.version = 11 : i64} {
  func.func @_conv_relu_pool_kernel(%arg0: i32, %arg1: memref<4x392x128xbf16, #tpu.memory_space<vmem>>, %arg2: memref<128x128xbf16, #tpu.memory_space<vmem>>, %arg3: memref<1x128xf32, #tpu.memory_space<vmem>>, %arg4: memref<392x128xbf16, #tpu.memory_space<vmem>>) attributes {dimension_semantics = [#tpu.dimension_semantics<parallel>], iteration_bounds = array<i64: 1>, scalar_prefetch = 0 : i64, scratch_operands = 0 : i64, tpu.core_type = #tpu.core_type<tc>, window_params = [{transform_indices = @transform_0, window_bounds = array<i64: 4, 392, 128>}, {pipeline_mode = #tpu.pipeline_mode<synchronous>, transform_indices = @transform_1, window_bounds = array<i64: 128, 128>}, {pipeline_mode = #tpu.pipeline_mode<synchronous>, transform_indices = @transform_2, window_bounds = array<i64: 1, 128>}, {transform_indices = @transform_3, window_bounds = array<i64: 392, 128>}]} {
    %c0 = arith.constant 0 : index
    %c0_0 = arith.constant 0 : index
    %0 = vector.load %arg2[%c0, %c0_0] : memref<128x128xbf16, #tpu.memory_space<vmem>>, vector<128x128xbf16>
    %c0_1 = arith.constant 0 : index
    %c0_2 = arith.constant 0 : index
    %1 = vector.load %arg3[%c0_1, %c0_2] : memref<1x128xf32, #tpu.memory_space<vmem>>, vector<1x128xf32>
    %c0_3 = arith.constant 0 : index
    %c0_4 = arith.constant 0 : index
    %c0_5 = arith.constant 0 : index
    %2 = vector.load %arg1[%c0_3, %c0_4, %c0_5] : memref<4x392x128xbf16, #tpu.memory_space<vmem>>, vector<1x392x128xbf16>
    %3 = vector.shape_cast %2 : vector<1x392x128xbf16> to vector<392x128xbf16>
    %cst = arith.constant dense<0.000000e+00> : vector<392x128xf32>
    %4 = tpu.matmul %3, %0, %cst {dimension_numbers = #tpu.dot_dimension_numbers<[1], [0], [0], [1], [0, 0, 1, 1], [], []>} : vector<392x128xbf16>, vector<128x128xbf16>, vector<392x128xf32> -> vector<392x128xf32>
    %5 = vector.broadcast %1 : vector<1x128xf32> to vector<392x128xf32>
    %6 = arith.addf %4, %5 : vector<392x128xf32>
    %cst_6 = arith.constant 0.000000e+00 : f32
    %7 = vector.broadcast %cst_6 : f32 to vector<392x128xf32>
    %8 = arith.maximumf %6, %7 : vector<392x128xf32>
    %c1 = arith.constant 1 : index
    %c0_7 = arith.constant 0 : index
    %c0_8 = arith.constant 0 : index
    %9 = vector.load %arg1[%c1, %c0_7, %c0_8] : memref<4x392x128xbf16, #tpu.memory_space<vmem>>, vector<1x392x128xbf16>
    %10 = vector.shape_cast %9 : vector<1x392x128xbf16> to vector<392x128xbf16>
    %cst_9 = arith.constant dense<0.000000e+00> : vector<392x128xf32>
    %11 = tpu.matmul %10, %0, %cst_9 {dimension_numbers = #tpu.dot_dimension_numbers<[1], [0], [0], [1], [0, 0, 1, 1], [], []>} : vector<392x128xbf16>, vector<128x128xbf16>, vector<392x128xf32> -> vector<392x128xf32>
    %12 = vector.broadcast %1 : vector<1x128xf32> to vector<392x128xf32>
    %13 = arith.addf %11, %12 : vector<392x128xf32>
    %cst_10 = arith.constant 0.000000e+00 : f32
    %14 = vector.broadcast %cst_10 : f32 to vector<392x128xf32>
    %15 = arith.maximumf %13, %14 : vector<392x128xf32>
    %16 = arith.maximumf %8, %15 : vector<392x128xf32>
    %c2 = arith.constant 2 : index
    %c0_11 = arith.constant 0 : index
    %c0_12 = arith.constant 0 : index
    %17 = vector.load %arg1[%c2, %c0_11, %c0_12] : memref<4x392x128xbf16, #tpu.memory_space<vmem>>, vector<1x392x128xbf16>
    %18 = vector.shape_cast %17 : vector<1x392x128xbf16> to vector<392x128xbf16>
    %cst_13 = arith.constant dense<0.000000e+00> : vector<392x128xf32>
    %19 = tpu.matmul %18, %0, %cst_13 {dimension_numbers = #tpu.dot_dimension_numbers<[1], [0], [0], [1], [0, 0, 1, 1], [], []>} : vector<392x128xbf16>, vector<128x128xbf16>, vector<392x128xf32> -> vector<392x128xf32>
    %20 = vector.broadcast %1 : vector<1x128xf32> to vector<392x128xf32>
    %21 = arith.addf %19, %20 : vector<392x128xf32>
    %cst_14 = arith.constant 0.000000e+00 : f32
    %22 = vector.broadcast %cst_14 : f32 to vector<392x128xf32>
    %23 = arith.maximumf %21, %22 : vector<392x128xf32>
    %24 = arith.maximumf %16, %23 : vector<392x128xf32>
    %c3 = arith.constant 3 : index
    %c0_15 = arith.constant 0 : index
    %c0_16 = arith.constant 0 : index
    %25 = vector.load %arg1[%c3, %c0_15, %c0_16] : memref<4x392x128xbf16, #tpu.memory_space<vmem>>, vector<1x392x128xbf16>
    %26 = vector.shape_cast %25 : vector<1x392x128xbf16> to vector<392x128xbf16>
    %cst_17 = arith.constant dense<0.000000e+00> : vector<392x128xf32>
    %27 = tpu.matmul %26, %0, %cst_17 {dimension_numbers = #tpu.dot_dimension_numbers<[1], [0], [0], [1], [0, 0, 1, 1], [], []>} : vector<392x128xbf16>, vector<128x128xbf16>, vector<392x128xf32> -> vector<392x128xf32>
    %28 = vector.broadcast %1 : vector<1x128xf32> to vector<392x128xf32>
    %29 = arith.addf %27, %28 : vector<392x128xf32>
    %cst_18 = arith.constant 0.000000e+00 : f32
    %30 = vector.broadcast %cst_18 : f32 to vector<392x128xf32>
    %31 = arith.maximumf %29, %30 : vector<392x128xf32>
    %32 = arith.maximumf %24, %31 : vector<392x128xf32>
    %33 = arith.truncf %32 : vector<392x128xf32> to vector<392x128xbf16>
    %c0_19 = arith.constant 0 : index
    %c0_20 = arith.constant 0 : index
    %34 = vector.load %arg4[%c0_19, %c0_20] : memref<392x128xbf16, #tpu.memory_space<vmem>>, vector<392x128xbf16>
    tpu.vector_store %arg4[%c0_19, %c0_20], %33 {strides = array<i32>} : memref<392x128xbf16, #tpu.memory_space<vmem>>, vector<392x128xbf16>,
    return
  }
  func.func @transform_0(%arg0: i32) -> (i32, i32, i32) {
    %c0_i32 = arith.constant 0 : i32
    %c0_i32_0 = arith.constant 0 : i32
    %c0_i32_1 = arith.constant 0 : i32
    return %c0_i32, %arg0, %c0_i32_0 : i32, i32, i32
  }
  func.func @transform_1(%arg0: i32) -> (i32, i32) {
    %c0_i32 = arith.constant 0 : i32
    %c0_i32_0 = arith.constant 0 : i32
    %c0_i32_1 = arith.constant 0 : i32
    return %c0_i32, %c0_i32_0 : i32, i32
  }
  func.func @transform_2(%arg0: i32) -> (i32, i32) {
    %c0_i32 = arith.constant 0 : i32
    %c0_i32_0 = arith.constant 0 : i32
    %c0_i32_1 = arith.constant 0 : i32
    return %c0_i32, %c0_i32_0 : i32, i32
  }
  func.func @transform_3(%arg0: i32) -> (i32, i32) {
    %c0_i32 = arith.constant 0 : i32
    %c0_i32_0 = arith.constant 0 : i32
    return %arg0, %c0_i32 : i32, i32
  }
}

module attributes {stable_mosaic.version = 11 : i64} {
  func.func @_conv_relu_pool_kernel(%arg0: i32, %arg1: memref<4x56x256xbf16, #tpu.memory_space<vmem>>, %arg2: memref<256x128xbf16, #tpu.memory_space<vmem>>, %arg3: memref<1x128xf32, #tpu.memory_space<vmem>>, %arg4: memref<56x128xbf16, #tpu.memory_space<vmem>>) attributes {dimension_semantics = [#tpu.dimension_semantics<parallel>], iteration_bounds = array<i64: 1>, scalar_prefetch = 0 : i64, scratch_operands = 0 : i64, tpu.core_type = #tpu.core_type<tc>, window_params = [{transform_indices = @transform_0, window_bounds = array<i64: 4, 56, 256>}, {pipeline_mode = #tpu.pipeline_mode<synchronous>, transform_indices = @transform_1, window_bounds = array<i64: 256, 128>}, {pipeline_mode = #tpu.pipeline_mode<synchronous>, transform_indices = @transform_2, window_bounds = array<i64: 1, 128>}, {transform_indices = @transform_3, window_bounds = array<i64: 56, 128>}]} {
    %c0 = arith.constant 0 : index
    %c0_0 = arith.constant 0 : index
    %0 = vector.load %arg2[%c0, %c0_0] : memref<256x128xbf16, #tpu.memory_space<vmem>>, vector<256x128xbf16>
    %c0_1 = arith.constant 0 : index
    %c0_2 = arith.constant 0 : index
    %1 = vector.load %arg3[%c0_1, %c0_2] : memref<1x128xf32, #tpu.memory_space<vmem>>, vector<1x128xf32>
    %c0_3 = arith.constant 0 : index
    %c0_4 = arith.constant 0 : index
    %c0_5 = arith.constant 0 : index
    %2 = vector.load %arg1[%c0_3, %c0_4, %c0_5] : memref<4x56x256xbf16, #tpu.memory_space<vmem>>, vector<1x56x256xbf16>
    %3 = vector.shape_cast %2 : vector<1x56x256xbf16> to vector<56x256xbf16>
    %cst = arith.constant dense<0.000000e+00> : vector<56x128xf32>
    %4 = tpu.matmul %3, %0, %cst {dimension_numbers = #tpu.dot_dimension_numbers<[1], [0], [0], [1], [0, 0, 1, 1], [], []>} : vector<56x256xbf16>, vector<256x128xbf16>, vector<56x128xf32> -> vector<56x128xf32>
    %5 = vector.broadcast %1 : vector<1x128xf32> to vector<56x128xf32>
    %6 = arith.addf %4, %5 : vector<56x128xf32>
    %cst_6 = arith.constant 0.000000e+00 : f32
    %7 = vector.broadcast %cst_6 : f32 to vector<56x128xf32>
    %8 = arith.maximumf %6, %7 : vector<56x128xf32>
    %c1 = arith.constant 1 : index
    %c0_7 = arith.constant 0 : index
    %c0_8 = arith.constant 0 : index
    %9 = vector.load %arg1[%c1, %c0_7, %c0_8] : memref<4x56x256xbf16, #tpu.memory_space<vmem>>, vector<1x56x256xbf16>
    %10 = vector.shape_cast %9 : vector<1x56x256xbf16> to vector<56x256xbf16>
    %cst_9 = arith.constant dense<0.000000e+00> : vector<56x128xf32>
    %11 = tpu.matmul %10, %0, %cst_9 {dimension_numbers = #tpu.dot_dimension_numbers<[1], [0], [0], [1], [0, 0, 1, 1], [], []>} : vector<56x256xbf16>, vector<256x128xbf16>, vector<56x128xf32> -> vector<56x128xf32>
    %12 = vector.broadcast %1 : vector<1x128xf32> to vector<56x128xf32>
    %13 = arith.addf %11, %12 : vector<56x128xf32>
    %cst_10 = arith.constant 0.000000e+00 : f32
    %14 = vector.broadcast %cst_10 : f32 to vector<56x128xf32>
    %15 = arith.maximumf %13, %14 : vector<56x128xf32>
    %16 = arith.maximumf %8, %15 : vector<56x128xf32>
    %c2 = arith.constant 2 : index
    %c0_11 = arith.constant 0 : index
    %c0_12 = arith.constant 0 : index
    %17 = vector.load %arg1[%c2, %c0_11, %c0_12] : memref<4x56x256xbf16, #tpu.memory_space<vmem>>, vector<1x56x256xbf16>
    %18 = vector.shape_cast %17 : vector<1x56x256xbf16> to vector<56x256xbf16>
    %cst_13 = arith.constant dense<0.000000e+00> : vector<56x128xf32>
    %19 = tpu.matmul %18, %0, %cst_13 {dimension_numbers = #tpu.dot_dimension_numbers<[1], [0], [0], [1], [0, 0, 1, 1], [], []>} : vector<56x256xbf16>, vector<256x128xbf16>, vector<56x128xf32> -> vector<56x128xf32>
    %20 = vector.broadcast %1 : vector<1x128xf32> to vector<56x128xf32>
    %21 = arith.addf %19, %20 : vector<56x128xf32>
    %cst_14 = arith.constant 0.000000e+00 : f32
    %22 = vector.broadcast %cst_14 : f32 to vector<56x128xf32>
    %23 = arith.maximumf %21, %22 : vector<56x128xf32>
    %24 = arith.maximumf %16, %23 : vector<56x128xf32>
    %c3 = arith.constant 3 : index
    %c0_15 = arith.constant 0 : index
    %c0_16 = arith.constant 0 : index
    %25 = vector.load %arg1[%c3, %c0_15, %c0_16] : memref<4x56x256xbf16, #tpu.memory_space<vmem>>, vector<1x56x256xbf16>
    %26 = vector.shape_cast %25 : vector<1x56x256xbf16> to vector<56x256xbf16>
    %cst_17 = arith.constant dense<0.000000e+00> : vector<56x128xf32>
    %27 = tpu.matmul %26, %0, %cst_17 {dimension_numbers = #tpu.dot_dimension_numbers<[1], [0], [0], [1], [0, 0, 1, 1], [], []>} : vector<56x256xbf16>, vector<256x128xbf16>, vector<56x128xf32> -> vector<56x128xf32>
    %28 = vector.broadcast %1 : vector<1x128xf32> to vector<56x128xf32>
    %29 = arith.addf %27, %28 : vector<56x128xf32>
    %cst_18 = arith.constant 0.000000e+00 : f32
    %30 = vector.broadcast %cst_18 : f32 to vector<56x128xf32>
    %31 = arith.maximumf %29, %30 : vector<56x128xf32>
    %32 = arith.maximumf %24, %31 : vector<56x128xf32>
    %33 = arith.truncf %32 : vector<56x128xf32> to vector<56x128xbf16>
    %c0_19 = arith.constant 0 : index
    %c0_20 = arith.constant 0 : index
    %34 = vector.load %arg4[%c0_19, %c0_20] : memref<56x128xbf16, #tpu.memory_space<vmem>>, vector<56x128xbf16>
    tpu.vector_store %arg4[%c0_19, %c0_20], %33 {strides = array<i32>} : memref<56x128xbf16, #tpu.memory_space<vmem>>, vector<56x128xbf16>,
    return
  }
  func.func @transform_0(%arg0: i32) -> (i32, i32, i32) {
    %c0_i32 = arith.constant 0 : i32
    %c0_i32_0 = arith.constant 0 : i32
    %c0_i32_1 = arith.constant 0 : i32
    return %c0_i32, %arg0, %c0_i32_0 : i32, i32, i32
  }
  func.func @transform_1(%arg0: i32) -> (i32, i32) {
    %c0_i32 = arith.constant 0 : i32
    %c0_i32_0 = arith.constant 0 : i32
    %c0_i32_1 = arith.constant 0 : i32
    return %c0_i32, %c0_i32_0 : i32, i32
  }
  func.func @transform_2(%arg0: i32) -> (i32, i32) {
    %c0_i32 = arith.constant 0 : i32
    %c0_i32_0 = arith.constant 0 : i32
    %c0_i32_1 = arith.constant 0 : i32
    return %c0_i32, %c0_i32_0 : i32, i32
  }
  func.func @transform_3(%arg0: i32) -> (i32, i32) {
    %c0_i32 = arith.constant 0 : i32
    %c0_i32_0 = arith.constant 0 : i32
    return %arg0, %c0_i32 : i32, i32
  }
}

module attributes {stable_mosaic.version = 11 : i64} {
  func.func @_fc_stack_kernel(%arg0: i32, %arg1: memref<8x3200xbf16, #tpu.memory_space<vmem>>, %arg2: memref<3200x128xbf16, #tpu.memory_space<vmem>>, %arg3: memref<1x128xf32, #tpu.memory_space<vmem>>, %arg4: memref<128x128xbf16, #tpu.memory_space<vmem>>, %arg5: memref<1x128xf32, #tpu.memory_space<vmem>>, %arg6: memref<128x128xbf16, #tpu.memory_space<vmem>>, %arg7: memref<1x128xf32, #tpu.memory_space<vmem>>, %arg8: memref<8x128xf32, #tpu.memory_space<vmem>>) attributes {dimension_semantics = [#tpu.dimension_semantics<parallel>], iteration_bounds = array<i64: 1>, scalar_prefetch = 0 : i64, scratch_operands = 0 : i64, tpu.core_type = #tpu.core_type<tc>, window_params = [{transform_indices = @transform_0, window_bounds = array<i64: 8, 3200>}, {pipeline_mode = #tpu.pipeline_mode<synchronous>, transform_indices = @transform_1, window_bounds = array<i64: 3200, 128>}, {pipeline_mode = #tpu.pipeline_mode<synchronous>, transform_indices = @transform_2, window_bounds = array<i64: 1, 128>}, {pipeline_mode = #tpu.pipeline_mode<synchronous>, transform_indices = @transform_3, window_bounds = array<i64: 128, 128>}, {pipeline_mode = #tpu.pipeline_mode<synchronous>, transform_indices = @transform_4, window_bounds = array<i64: 1, 128>}, {pipeline_mode = #tpu.pipeline_mode<synchronous>, transform_indices = @transform_5, window_bounds = array<i64: 128, 128>}, {pipeline_mode = #tpu.pipeline_mode<synchronous>, transform_indices = @transform_6, window_bounds = array<i64: 1, 128>}, {transform_indices = @transform_7, window_bounds = array<i64: 8, 128>}]} {
    %c0 = arith.constant 0 : index
    %c0_0 = arith.constant 0 : index
    %0 = vector.load %arg1[%c0, %c0_0] : memref<8x3200xbf16, #tpu.memory_space<vmem>>, vector<8x3200xbf16>
    %c0_1 = arith.constant 0 : index
    %c0_2 = arith.constant 0 : index
    %1 = vector.load %arg2[%c0_1, %c0_2] : memref<3200x128xbf16, #tpu.memory_space<vmem>>, vector<3200x128xbf16>
    %cst = arith.constant dense<0.000000e+00> : vector<8x128xf32>
    %2 = tpu.matmul %0, %1, %cst {dimension_numbers = #tpu.dot_dimension_numbers<[1], [0], [0], [1], [0, 0, 1, 1], [], []>} : vector<8x3200xbf16>, vector<3200x128xbf16>, vector<8x128xf32> -> vector<8x128xf32>
    %c0_3 = arith.constant 0 : index
    %c0_4 = arith.constant 0 : index
    %3 = vector.load %arg3[%c0_3, %c0_4] : memref<1x128xf32, #tpu.memory_space<vmem>>, vector<1x128xf32>
    %4 = vector.broadcast %3 : vector<1x128xf32> to vector<8x128xf32>
    %5 = arith.addf %2, %4 : vector<8x128xf32>
    %cst_5 = arith.constant 0.000000e+00 : f32
    %6 = vector.broadcast %cst_5 : f32 to vector<8x128xf32>
    %7 = arith.maximumf %5, %6 : vector<8x128xf32>
    %8 = arith.truncf %7 : vector<8x128xf32> to vector<8x128xbf16>
    %c0_6 = arith.constant 0 : index
    %c0_7 = arith.constant 0 : index
    %9 = vector.load %arg4[%c0_6, %c0_7] : memref<128x128xbf16, #tpu.memory_space<vmem>>, vector<128x128xbf16>
    %cst_8 = arith.constant dense<0.000000e+00> : vector<8x128xf32>
    %10 = tpu.matmul %8, %9, %cst_8 {dimension_numbers = #tpu.dot_dimension_numbers<[1], [0], [0], [1], [0, 0, 1, 1], [], []>} : vector<8x128xbf16>, vector<128x128xbf16>, vector<8x128xf32> -> vector<8x128xf32>
    %c0_9 = arith.constant 0 : index
    %c0_10 = arith.constant 0 : index
    %11 = vector.load %arg5[%c0_9, %c0_10] : memref<1x128xf32, #tpu.memory_space<vmem>>, vector<1x128xf32>
    %12 = vector.broadcast %11 : vector<1x128xf32> to vector<8x128xf32>
    %13 = arith.addf %10, %12 : vector<8x128xf32>
    %cst_11 = arith.constant 0.000000e+00 : f32
    %14 = vector.broadcast %cst_11 : f32 to vector<8x128xf32>
    %15 = arith.maximumf %13, %14 : vector<8x128xf32>
    %16 = arith.truncf %15 : vector<8x128xf32> to vector<8x128xbf16>
    %c0_12 = arith.constant 0 : index
    %c0_13 = arith.constant 0 : index
    %17 = vector.load %arg6[%c0_12, %c0_13] : memref<128x128xbf16, #tpu.memory_space<vmem>>, vector<128x128xbf16>
    %cst_14 = arith.constant dense<0.000000e+00> : vector<8x128xf32>
    %18 = tpu.matmul %16, %17, %cst_14 {dimension_numbers = #tpu.dot_dimension_numbers<[1], [0], [0], [1], [0, 0, 1, 1], [], []>} : vector<8x128xbf16>, vector<128x128xbf16>, vector<8x128xf32> -> vector<8x128xf32>
    %c0_15 = arith.constant 0 : index
    %c0_16 = arith.constant 0 : index
    %19 = vector.load %arg7[%c0_15, %c0_16] : memref<1x128xf32, #tpu.memory_space<vmem>>, vector<1x128xf32>
    %20 = vector.broadcast %19 : vector<1x128xf32> to vector<8x128xf32>
    %21 = arith.addf %18, %20 : vector<8x128xf32>
    %c0_17 = arith.constant 0 : index
    %c0_18 = arith.constant 0 : index
    %22 = vector.load %arg8[%c0_17, %c0_18] : memref<8x128xf32, #tpu.memory_space<vmem>>, vector<8x128xf32>
    tpu.vector_store %arg8[%c0_17, %c0_18], %21 {strides = array<i32>} : memref<8x128xf32, #tpu.memory_space<vmem>>, vector<8x128xf32>,
    return
  }
  func.func @transform_0(%arg0: i32) -> (i32, i32) {
    %c0_i32 = arith.constant 0 : i32
    %c0_i32_0 = arith.constant 0 : i32
    return %arg0, %c0_i32 : i32, i32
  }
  func.func @transform_1(%arg0: i32) -> (i32, i32) {
    %c0_i32 = arith.constant 0 : i32
    %c0_i32_0 = arith.constant 0 : i32
    %c0_i32_1 = arith.constant 0 : i32
    return %c0_i32, %c0_i32_0 : i32, i32
  }
  func.func @transform_2(%arg0: i32) -> (i32, i32) {
    %c0_i32 = arith.constant 0 : i32
    %c0_i32_0 = arith.constant 0 : i32
    %c0_i32_1 = arith.constant 0 : i32
    return %c0_i32, %c0_i32_0 : i32, i32
  }
  func.func @transform_3(%arg0: i32) -> (i32, i32) {
    %c0_i32 = arith.constant 0 : i32
    %c0_i32_0 = arith.constant 0 : i32
    %c0_i32_1 = arith.constant 0 : i32
    return %c0_i32, %c0_i32_0 : i32, i32
  }
  func.func @transform_4(%arg0: i32) -> (i32, i32) {
    %c0_i32 = arith.constant 0 : i32
    %c0_i32_0 = arith.constant 0 : i32
    %c0_i32_1 = arith.constant 0 : i32
    return %c0_i32, %c0_i32_0 : i32, i32
  }
  func.func @transform_5(%arg0: i32) -> (i32, i32) {
    %c0_i32 = arith.constant 0 : i32
    %c0_i32_0 = arith.constant 0 : i32
    %c0_i32_1 = arith.constant 0 : i32
    return %c0_i32, %c0_i32_0 : i32, i32
  }
  func.func @transform_6(%arg0: i32) -> (i32, i32) {
    %c0_i32 = arith.constant 0 : i32
    %c0_i32_0 = arith.constant 0 : i32
    %c0_i32_1 = arith.constant 0 : i32
    return %c0_i32, %c0_i32_0 : i32, i32
  }
  func.func @transform_7(%arg0: i32) -> (i32, i32) {
    %c0_i32 = arith.constant 0 : i32
    %c0_i32_0 = arith.constant 0 : i32
    return %arg0, %c0_i32 : i32, i32
  }
}

</mosaic_0001>

<bundles_post_ra>
// kernel: net_forward.3
= control target key start
LH: loop header
LB: loop body
LE: loop exit
PB: predicated region body
PF: predicated region fallthrough
CT: control target
= control target key end

     0   :  { %v3603_v0 = vmov 0.0   ;;  %vm3604_vm0 = vmmov 0   ;;  %s4614_s1 = inlined_call_operand.vmem [shape: bf16[128,128], index: 1, kind: input, shape index: {}]   ;;  %s4615_s0 = inlined_call_operand.vmem [shape: bf16[4,392,128], index: 0, kind: input, shape index: {}]   ;;  %s4616_s2 = inlined_call_operand.vmem [shape: f32[1,128], index: 2, kind: input, shape index: {}]   ;;  %s4617_s3 = inlined_call_operand.vmem [shape: bf16[392,128], index: 3, kind: output, shape index: {}]  }
   0x1   :  { %3027 = vmatprep.subr.bf16.mxu0 %v3603_v0  ;;  %3143 = vmatprep.subr.bf16.mxu1 %v3603_v0  ;;  %v3493_v1 = vld [vmem:[%s4614_s1] sm:$0xff]   ;;  %v3494_v2 = vld [vmem:[%s4614_s1 + $0x8] sm:$0xff]   ;;  %v3495_v3 = vld [vmem:[%s4614_s1 + $0x10] sm:$0xff]  }
   0x2   :  { %3043 = vmatprep.mubr.msk.bf16.mxu0 %vm3604_vm0, %v3603_v0  ;;  %3159 = vmatprep.mubr.msk.bf16.mxu1 %vm3604_vm0, %v3603_v0  ;;  %v3496_v4 = vld [vmem:[%s4614_s1 + $0x18] sm:$0xff]   ;;  %v3497_v5 = vld [vmem:[%s4614_s1 + $0x20] sm:$0xff]   ;;  %v3498_v6 = vld [vmem:[%s4614_s1 + $0x28] sm:$0xff]  }
   0x3   :  { %3028 = vmatpush3.bf16.msra.mxu0 %v3493_v1  ;;  %3144 = vmatpush3.bf16.msra.mxu1 %v3493_v1  ;;  %v3499_v7 = vld [vmem:[%s4614_s1 + $0x30] sm:$0xff]   ;;  %v3500_v8 = vld [vmem:[%s4614_s1 + $0x38] sm:$0xff]   ;;  %v3501_v9 = vld [vmem:[%s4615_s0] sm:$0xff]  }
   0x4   :  { %3029 = vmatprep.subr.bf16.mxu0 %v3603_v0  ;;  %3145 = vmatprep.subr.bf16.mxu1 %v3603_v0  ;;  %v3502_v10 = vld [vmem:[%s4615_s0 + $0xc4] sm:$0xff]   ;;  %v3504_v12 = vld [vmem:[%s4615_s0 + $0xcc] sm:$0xff]   ;;  %v3506_v14 = vld [vmem:[%s4615_s0 + $0xd4] sm:$0xff]  }
   0x5   :  { %v3503_v11 = vld [vmem:[%s4615_s0 + $0x8] sm:$0xff]   ;;  %v3505_v13 = vld [vmem:[%s4615_s0 + $0x10] sm:$0xff]   ;;  %v3507_v15 = vld [vmem:[%s4615_s0 + $0x18] sm:$0xff]  }
   0x6   :  { %v3508_v16 = vld [vmem:[%s4615_s0 + $0xdc] sm:$0xff]   ;;  %v3510_v18 = vld [vmem:[%s4615_s0 + $0xe4] sm:$0xff]   ;;  %v3512_v20 = vld [vmem:[%s4615_s0 + $0xec] sm:$0xff]  }
   0x7   :  { %3030 = vmatpush3.bf16.msra.mxu0 %v3494_v2  ;;  %3146 = vmatpush3.bf16.msra.mxu1 %v3494_v2  ;;  %v3509_v17 = vld [vmem:[%s4615_s0 + $0x20] sm:$0xff]   ;;  %v3511_v19 = vld [vmem:[%s4615_s0 + $0x28] sm:$0xff]   ;;  %v3513_v21 = vld [vmem:[%s4615_s0 + $0x30] sm:$0xff]  }
   0x8   :  { %3031 = vmatprep.subr.bf16.mxu0 %v3603_v0  ;;  %3147 = vmatprep.subr.bf16.mxu1 %v3603_v0  ;;  %v3514_v22 = vld [vmem:[%s4615_s0 + $0xf4] sm:$0xff]   ;;  %v3516_v24 = vld [vmem:[%s4615_s0 + $0xfc] sm:$0xff]   ;;  %v3518_v26 = vld [vmem:[%s4615_s0 + $0x104] sm:$0xff]  }
   0x9   :  { %v3515_v23 = vld [vmem:[%s4615_s0 + $0x38] sm:$0xff]   ;;  %v3517_v25 = vld [vmem:[%s4615_s0 + $0x40] sm:$0xff]   ;;  %v3519_v27 = vld [vmem:[%s4615_s0 + $0x48] sm:$0xff]  }
   0xa   :  { %v3520_v28 = vld [vmem:[%s4615_s0 + $0x10c] sm:$0xff]   ;;  %v3522_v30 = vld [vmem:[%s4615_s0 + $0x114] sm:$0xff]   ;;  %v3524_v32 = vld [vmem:[%s4615_s0 + $0x11c] sm:$0xff]  }
   0xb   :  { %3032 = vmatpush3.bf16.msra.mxu0 %v3495_v3  ;;  %3148 = vmatpush3.bf16.msra.mxu1 %v3495_v3  ;;  %v3521_v29 = vld [vmem:[%s4615_s0 + $0x50] sm:$0xff]   ;;  %v3523_v31 = vld [vmem:[%s4615_s0 + $0x58] sm:$0xff]   ;;  %v3525_v33 = vld [vmem:[%s4615_s0 + $0x60] sm:$0xff]  }
   0xc   :  { %3033 = vmatprep.subr.bf16.mxu0 %v3603_v0  ;;  %3149 = vmatprep.subr.bf16.mxu1 %v3603_v0  ;;  %v3526_v34 = vld [vmem:[%s4615_s0 + $0x124] sm:$0xff]   ;;  %v3528_v36 = vld [vmem:[%s4615_s0 + $0x12c] sm:$0xff]   ;;  %v3530_v38 = vld [vmem:[%s4615_s0 + $0x134] sm:$0xff]  }
   0xd   :  { %v3527_v35 = vld [vmem:[%s4615_s0 + $0x68] sm:$0xff]   ;;  %v3529_v37 = vld [vmem:[%s4615_s0 + $0x70] sm:$0xff]   ;;  %v3531_v39 = vld [vmem:[%s4615_s0 + $0x78] sm:$0xff]  }
   0xe   :  { %v3532_v40 = vld [vmem:[%s4615_s0 + $0x13c] sm:$0xff]   ;;  %v3534_v42 = vld [vmem:[%s4615_s0 + $0x144] sm:$0xff]   ;;  %v3536_v44 = vld [vmem:[%s4615_s0 + $0x14c] sm:$0xff]  }
   0xf   :  { %3034 = vmatpush3.bf16.msra.mxu0 %v3496_v4  ;;  %3150 = vmatpush3.bf16.msra.mxu1 %v3496_v4  ;;  %v3533_v41 = vld [vmem:[%s4615_s0 + $0x80] sm:$0xff]   ;;  %v3535_v43 = vld [vmem:[%s4615_s0 + $0x88] sm:$0xff]   ;;  %v3537_v45 = vld [vmem:[%s4615_s0 + $0x90] sm:$0xff]  }
  0x10   :  { %3035 = vmatprep.subr.bf16.mxu0 %v3603_v0  ;;  %3151 = vmatprep.subr.bf16.mxu1 %v3603_v0  ;;  %v3538_v46 = vld [vmem:[%s4615_s0 + $0x154] sm:$0xff]   ;;  %v3540_v48 = vld [vmem:[%s4615_s0 + $0x15c] sm:$0xff]   ;;  %v3542_v50 = vld [vmem:[%s4615_s0 + $0x164] sm:$0xff]  }
  0x11   :  { %v3539_v47 = vld [vmem:[%s4615_s0 + $0x98] sm:$0xff]   ;;  %v3541_v49 = vld [vmem:[%s4615_s0 + $0xa0] sm:$0xff]   ;;  %v3543_v51 = vld [vmem:[%s4615_s0 + $0xa8] sm:$0xff]  }
  0x12   :  { %v3544_v52 = vld [vmem:[%s4615_s0 + $0x16c] sm:$0xff]   ;;  %v3546_v54 = vld [vmem:[%s4615_s0 + $0x174] sm:$0xff]   ;;  %v3548_v56 = vld [vmem:[%s4615_s0 + $0x17c] sm:$0xff]  }
  0x13   :  { %3036 = vmatpush3.bf16.msra.mxu0 %v3497_v5  ;;  %3152 = vmatpush3.bf16.msra.mxu1 %v3497_v5  ;;  %v3545_v53 = vld [vmem:[%s4615_s0 + $0xb0] sm:$0xff]   ;;  %v3547_v55 = vld [vmem:[%s4615_s0 + $0xb8] sm:$0xff]   ;;  %v3549_v57 = vld [vmem:[%s4615_s0 + $0xc0] ss:$0 sps:$4 sm:$0xff]  }
  0x14   :  { %3037 = vmatprep.subr.bf16.mxu0 %v3603_v0  ;;  %3153 = vmatprep.subr.bf16.mxu1 %v3603_v0  ;;  %v3550_v58 = vld [vmem:[%s4615_s0 + $0x184] ss:$0 sps:$4 sm:$0xff]   ;;  %v3551_v59 = vld [vmem:[%s4615_s0 + $0x188] sm:$0xff]   ;;  %v3553_v61 = vld [vmem:[%s4615_s0 + $0x190] sm:$0xff]  }
  0x15   :  { %v3552_v60 = vld [vmem:[%s4615_s0 + $0x24c] sm:$0xff]   ;;  %v3554_v62 = vld [vmem:[%s4615_s0 + $0x254] sm:$0xff]   ;;  %v3954_v63 = vld [vmem:[%s4616_s2] ss:$0 sm:$0xff] }
  0x17   :  { %3038 = vmatpush3.bf16.msra.mxu0 %v3498_v6  ;;  %3154 = vmatpush3.bf16.msra.mxu1 %v3498_v6 }
  0x18   :  { %3039 = vmatprep.subr.bf16.mxu0 %v3603_v0  ;;  %3155 = vmatprep.subr.bf16.mxu1 %v3603_v0 }
  0x1b   :  { %3040 = vmatpush3.bf16.msra.mxu0 %v3499_v7  ;;  %3156 = vmatpush3.bf16.msra.mxu1 %v3499_v7 }
  0x1c   :  { %3041 = vmatprep.subr.bf16.mxu0 %v3603_v0  ;;  %3157 = vmatprep.subr.bf16.mxu1 %v3603_v0 }
  0x1f   :  { %3042 = vmatpush3.bf16.msra.mxu0 %v3500_v8  ;;  %3158 = vmatpush3.bf16.msra.mxu1 %v3500_v8 }
  0x20   :  { %3259 = vmatprep.subr.bf16.mxu0 %v3603_v0  ;;  %3375 = vmatprep.subr.bf16.mxu1 %v3603_v0 }
  0x22   :  { %3044 = vmatmul.mubr.bf16.vlgmr.msra.gmra.mrb[0].mxu0 %v3501_v9  ;;  %3160 = vmatmul.mubr.bf16.vlgmr.msra.gmra.mrb[0].mxu1 %v3502_v10 }
  0x23   :  { %3260 = vmatpush3.bf16.msra.mxu0 %v3493_v1  ;;  %3376 = vmatpush3.bf16.msra.mxu1 %v3493_v1 }
  0x24   :  { %3047 = vmatprep.mubr.msk.bf16.mxu0 %vm3604_vm0, %v3603_v0  ;;  %3163 = vmatprep.mubr.msk.bf16.mxu1 %vm3604_vm0, %v3603_v0 }
  0x25   :  { %3261 = vmatprep.subr.bf16.mxu0 %v3603_v0  ;;  %3377 = vmatprep.subr.bf16.mxu1 %v3603_v0 }
  0x27   :  { %3262 = vmatpush3.bf16.msra.mxu0 %v3494_v2  ;;  %3378 = vmatpush3.bf16.msra.mxu1 %v3494_v2 }
  0x28   :  { %3263 = vmatprep.subr.bf16.mxu0 %v3603_v0  ;;  %3379 = vmatprep.subr.bf16.mxu1 %v3603_v0 }
  0x2a   :  { %3048 = vmatmul.mubr.bf16.gmra.mrb[4].mxu0 %v3503_v11  ;;  %3164 = vmatmul.mubr.bf16.gmra.mrb[4].mxu1 %v3504_v12 }
  0x2b   :  { %3051 = vmatprep.mubr.msk.bf16.mxu0 %vm3604_vm0, %v3603_v0  ;;  %3167 = vmatprep.mubr.msk.bf16.mxu1 %vm3604_vm0, %v3603_v0 }
  0x2c   :  { %3264 = vmatpush3.bf16.msra.mxu0 %v3495_v3  ;;  %3380 = vmatpush3.bf16.msra.mxu1 %v3495_v3 }
  0x2d   :  { %3265 = vmatprep.subr.bf16.mxu0 %v3603_v0  ;;  %3381 = vmatprep.subr.bf16.mxu1 %v3603_v0 }
  0x30   :  { %3266 = vmatpush3.bf16.msra.mxu0 %v3496_v4  ;;  %3382 = vmatpush3.bf16.msra.mxu1 %v3496_v4 }
  0x31   :  { %3267 = vmatprep.subr.bf16.mxu0 %v3603_v0  ;;  %3383 = vmatprep.subr.bf16.mxu1 %v3603_v0 }
  0x32   :  { %3052 = vmatmul.mubr.bf16.gmra.mrb[8].mxu0 %v3505_v13  ;;  %3168 = vmatmul.mubr.bf16.gmra.mrb[8].mxu1 %v3506_v14 }
  0x33   :  { %3055 = vmatprep.mubr.msk.bf16.mxu0 %vm3604_vm0, %v3603_v0  ;;  %3171 = vmatprep.mubr.msk.bf16.mxu1 %vm3604_vm0, %v3603_v0 }
  0x34   :  { %3268 = vmatpush3.bf16.msra.mxu0 %v3497_v5  ;;  %3384 = vmatpush3.bf16.msra.mxu1 %v3497_v5 }
  0x35   :  { %3269 = vmatprep.subr.bf16.mxu0 %v3603_v0  ;;  %3385 = vmatprep.subr.bf16.mxu1 %v3603_v0 }
  0x38   :  { %3270 = vmatpush3.bf16.msra.mxu0 %v3498_v6  ;;  %3386 = vmatpush3.bf16.msra.mxu1 %v3498_v6 }
  0x39   :  { %3271 = vmatprep.subr.bf16.mxu0 %v3603_v0  ;;  %3387 = vmatprep.subr.bf16.mxu1 %v3603_v0 }
  0x3a   :  { %3056 = vmatmul.mubr.bf16.gmra.mrb[12].mxu0 %v3507_v15  ;;  %3172 = vmatmul.mubr.bf16.gmra.mrb[12].mxu1 %v3508_v16 }
  0x3b   :  { %3059 = vmatprep.mubr.msk.bf16.mxu0 %vm3604_vm0, %v3603_v0  ;;  %3175 = vmatprep.mubr.msk.bf16.mxu1 %vm3604_vm0, %v3603_v0 }
  0x3c   :  { %3272 = vmatpush3.bf16.msra.mxu0 %v3499_v7  ;;  %3388 = vmatpush3.bf16.msra.mxu1 %v3499_v7  ;;  %v3555_v7 = vld [vmem:[%s4615_s0 + $0x198] sm:$0xff]  }
  0x3d   :  { %3273 = vmatprep.subr.bf16.mxu0 %v3603_v0  ;;  %3389 = vmatprep.subr.bf16.mxu1 %v3603_v0 }
  0x40   :  { %3274 = vmatpush3.bf16.msra.mxu0 %v3500_v8  ;;  %3390 = vmatpush3.bf16.msra.mxu1 %v3500_v8  ;;  %v3556_v8 = vld [vmem:[%s4615_s0 + $0x25c] sm:$0xff]  }
  0x42   :  { %3060 = vmatmul.mubr.bf16.gmra.mrb[16].mxu0 %v3509_v17  ;;  %3176 = vmatmul.mubr.bf16.gmra.mrb[16].mxu1 %v3510_v18 }
  0x43   :  { %3063 = vmatprep.mubr.msk.bf16.mxu0 %vm3604_vm0, %v3603_v0  ;;  %3179 = vmatprep.mubr.msk.bf16.mxu1 %vm3604_vm0, %v3603_v0 }
  0x4a   :  { %3064 = vmatmul.mubr.bf16.gmra.mrb[20].mxu0 %v3511_v19  ;;  %3180 = vmatmul.mubr.bf16.gmra.mrb[20].mxu1 %v3512_v20 }
  0x4b   :  { %3067 = vmatprep.mubr.msk.bf16.mxu0 %vm3604_vm0, %v3603_v0  ;;  %3183 = vmatprep.mubr.msk.bf16.mxu1 %vm3604_vm0, %v3603_v0 }
  0x52   :  { %3068 = vmatmul.mubr.bf16.gmra.mrb[24].mxu0 %v3513_v21  ;;  %3184 = vmatmul.mubr.bf16.gmra.mrb[24].mxu1 %v3514_v22 }
  0x53   :  { %3071 = vmatprep.mubr.msk.bf16.mxu0 %vm3604_vm0, %v3603_v0  ;;  %3187 = vmatprep.mubr.msk.bf16.mxu1 %vm3604_vm0, %v3603_v0 }
  0x5a   :  { %3072 = vmatmul.mubr.bf16.gmra.mrb[28].mxu0 %v3515_v23  ;;  %3188 = vmatmul.mubr.bf16.gmra.mrb[28].mxu1 %v3516_v24 }
  0x5b   :  { %3075 = vmatprep.mubr.msk.bf16.mxu0 %vm3604_vm0, %v3603_v0  ;;  %3191 = vmatprep.mubr.msk.bf16.mxu1 %vm3604_vm0, %v3603_v0 }
  0x62   :  { %3076 = vmatmul.mubr.bf16.gmra.mrb[32].mxu0 %v3517_v25  ;;  %3192 = vmatmul.mubr.bf16.gmra.mrb[32].mxu1 %v3518_v26 }
  0x63   :  { %3079 = vmatprep.mubr.msk.bf16.mxu0 %vm3604_vm0, %v3603_v0  ;;  %3195 = vmatprep.mubr.msk.bf16.mxu1 %vm3604_vm0, %v3603_v0 }
  0x6a   :  { %3080 = vmatmul.mubr.bf16.gmra.mrb[36].mxu0 %v3519_v27  ;;  %3196 = vmatmul.mubr.bf16.gmra.mrb[36].mxu1 %v3520_v28  ;;  %v3557_v27 = vld [vmem:[%s4615_s0 + $0x1a0] sm:$0xff]  }
  0x6b   :  { %3083 = vmatprep.mubr.msk.bf16.mxu0 %vm3604_vm0, %v3603_v0  ;;  %3199 = vmatprep.mubr.msk.bf16.mxu1 %vm3604_vm0, %v3603_v0  ;;  %v3558_v28 = vld [vmem:[%s4615_s0 + $0x264] sm:$0xff]  }
  0x72   :  { %3084 = vmatmul.mubr.bf16.gmra.mrb[40].mxu0 %v3521_v29  ;;  %3200 = vmatmul.mubr.bf16.gmra.mrb[40].mxu1 %v3522_v30 }
  0x73   :  { %3087 = vmatprep.mubr.msk.bf16.mxu0 %vm3604_vm0, %v3603_v0  ;;  %3203 = vmatprep.mubr.msk.bf16.mxu1 %vm3604_vm0, %v3603_v0 }
  0x7a   :  { %3088 = vmatmul.mubr.bf16.gmra.mrb[44].mxu0 %v3523_v31  ;;  %3204 = vmatmul.mubr.bf16.gmra.mrb[44].mxu1 %v3524_v32 }
  0x7b   :  { %3091 = vmatprep.mubr.msk.bf16.mxu0 %vm3604_vm0, %v3603_v0  ;;  %3207 = vmatprep.mubr.msk.bf16.mxu1 %vm3604_vm0, %v3603_v0 }
  0x82   :  { %3092 = vmatmul.mubr.bf16.gmra.mrb[48].mxu0 %v3525_v33  ;;  %3208 = vmatmul.mubr.bf16.gmra.mrb[48].mxu1 %v3526_v34 }
  0x83   :  { %3095 = vmatprep.mubr.msk.bf16.mxu0 %vm3604_vm0, %v3603_v0  ;;  %3211 = vmatprep.mubr.msk.bf16.mxu1 %vm3604_vm0, %v3603_v0 }
  0x8a   :  { %3096 = vmatmul.mubr.bf16.gmra.mrb[52].mxu0 %v3527_v35  ;;  %3212 = vmatmul.mubr.bf16.gmra.mrb[52].mxu1 %v3528_v36 }
  0x8b   :  { %3099 = vmatprep.mubr.msk.bf16.mxu0 %vm3604_vm0, %v3603_v0  ;;  %3215 = vmatprep.mubr.msk.bf16.mxu1 %vm3604_vm0, %v3603_v0 }
  0x92   :  { %3100 = vmatmul.mubr.bf16.gmra.mrb[56].mxu0 %v3529_v37  ;;  %3216 = vmatmul.mubr.bf16.gmra.mrb[56].mxu1 %v3530_v38 }
  0x93   :  { %3103 = vmatprep.mubr.msk.bf16.mxu0 %vm3604_vm0, %v3603_v0  ;;  %3219 = vmatprep.mubr.msk.bf16.mxu1 %vm3604_vm0, %v3603_v0 }
  0x9a   :  { %3104 = vmatmul.mubr.bf16.gmra.mrb[60].mxu0 %v3531_v39  ;;  %3220 = vmatmul.mubr.bf16.gmra.mrb[60].mxu1 %v3532_v40 }
  0x9b   :  { %3107 = vmatprep.mubr.msk.bf16.mxu0 %vm3604_vm0, %v3603_v0  ;;  %3223 = vmatprep.mubr.msk.bf16.mxu1 %vm3604_vm0, %v3603_v0 }
  0xa2   :  { %3108 = vmatmul.mubr.bf16.gmra.mrb[64].mxu0 %v3533_v41  ;;  %3224 = vmatmul.mubr.bf16.gmra.mrb[64].mxu1 %v3534_v42 }
  0xa3   :  { %3111 = vmatprep.mubr.msk.bf16.mxu0 %vm3604_vm0, %v3603_v0  ;;  %3227 = vmatprep.mubr.msk.bf16.mxu1 %vm3604_vm0, %v3603_v0 }
  0xaa   :  { %3112 = vmatmul.mubr.bf16.gmra.mrb[68].mxu0 %v3535_v43  ;;  %3228 = vmatmul.mubr.bf16.gmra.mrb[68].mxu1 %v3536_v44 }
  0xab   :  { %3115 = vmatprep.mubr.msk.bf16.mxu0 %vm3604_vm0, %v3603_v0  ;;  %3231 = vmatprep.mubr.msk.bf16.mxu1 %vm3604_vm0, %v3603_v0 }
  0xb2   :  { %3116 = vmatmul.mubr.bf16.gmra.mrb[72].mxu0 %v3537_v45  ;;  %3232 = vmatmul.mubr.bf16.gmra.mrb[72].mxu1 %v3538_v46 }
  0xb3   :  { %3119 = vmatprep.mubr.msk.bf16.mxu0 %vm3604_vm0, %v3603_v0  ;;  %3235 = vmatprep.mubr.msk.bf16.mxu1 %vm3604_vm0, %v3603_v0 }
  0xba   :  { %3120 = vmatmul.mubr.bf16.gmra.mrb[76].mxu0 %v3539_v47  ;;  %3236 = vmatmul.mubr.bf16.gmra.mrb[76].mxu1 %v3540_v48  ;;  %v3559_v47 = vld [vmem:[%s4615_s0 + $0x1a8] sm:$0xff]  }
  0xbb   :  { %3123 = vmatprep.mubr.msk.bf16.mxu0 %vm3604_vm0, %v3603_v0  ;;  %3239 = vmatprep.mubr.msk.bf16.mxu1 %vm3604_vm0, %v3603_v0  ;;  %v3560_v48 = vld [vmem:[%s4615_s0 + $0x26c] sm:$0xff]  }
  0xc2   :  { %3124 = vmatmul.mubr.bf16.gmra.mrb[80].mxu0 %v3541_v49  ;;  %3240 = vmatmul.mubr.bf16.gmra.mrb[80].mxu1 %v3542_v50 }
  0xc3   :  { %3127 = vmatprep.mubr.msk.bf16.mxu0 %vm3604_vm0, %v3603_v0  ;;  %3243 = vmatprep.mubr.msk.bf16.mxu1 %vm3604_vm0, %v3603_v0 }
  0xca   :  { %3128 = vmatmul.mubr.bf16.gmra.mrb[84].mxu0 %v3543_v51  ;;  %3244 = vmatmul.mubr.bf16.gmra.mrb[84].mxu1 %v3544_v52 }
  0xcb   :  { %3131 = vmatprep.mubr.msk.bf16.mxu0 %vm3604_vm0, %v3603_v0  ;;  %3247 = vmatprep.mubr.msk.bf16.mxu1 %vm3604_vm0, %v3603_v0 }
  0xd2   :  { %3132 = vmatmul.mubr.bf16.gmra.mrb[88].mxu0 %v3545_v53  ;;  %3248 = vmatmul.mubr.bf16.gmra.mrb[88].mxu1 %v3546_v54 }
  0xd3   :  { %3135 = vmatprep.mubr.msk.bf16.mxu0 %vm3604_vm0, %v3603_v0  ;;  %3251 = vmatprep.mubr.msk.bf16.mxu1 %vm3604_vm0, %v3603_v0 }
  0xda   :  { %3136 = vmatmul.mubr.bf16.gmra.mrb[92].mxu0 %v3547_v55  ;;  %3252 = vmatmul.mubr.bf16.gmra.mrb[92].mxu1 %v3548_v56 }
  0xdb   :  { %3139 = vmatprep.mubr.msk.bf16.mxu0 %vm3604_vm0, %v3603_v0  ;;  %3255 = vmatprep.mubr.msk.bf16.mxu1 %vm3604_vm0, %v3603_v0 }
  0xe2   :  { %3140 = vmatmul.mubr.bf16.gmra.mrb[96].mxu0 %v3549_v57  ;;  %3256 = vmatmul.mubr.bf16.gmra.mrb[96].mxu1 %v3550_v58 }
  0xe3   :  { %3275 = vmatprep.mubr.msk.bf16.mxu0 %vm3604_vm0, %v3603_v0  ;;  %3391 = vmatprep.mubr.msk.bf16.mxu1 %vm3604_vm0, %v3603_v0 }
  0xea   :  { %3276 = vmatmul.mubr.bf16.vlgmr.msra.gmra.mrb[100].mxu0 %v3551_v59  ;;  %3392 = vmatmul.mubr.bf16.vlgmr.msra.gmra.mrb[100].mxu1 %v3552_v60 }
  0xeb   :  { %3279 = vmatprep.mubr.msk.bf16.mxu0 %vm3604_vm0, %v3603_v0  ;;  %3395 = vmatprep.mubr.msk.bf16.mxu1 %vm3604_vm0, %v3603_v0 }
  0xf2   :  { %3280 = vmatmul.mubr.bf16.gmra.mrb[104].mxu0 %v3553_v61  ;;  %3396 = vmatmul.mubr.bf16.gmra.mrb[104].mxu1 %v3554_v62 }
  0xf3   :  { %3283 = vmatprep.mubr.msk.bf16.mxu0 %vm3604_vm0, %v3603_v0  ;;  %3399 = vmatprep.mubr.msk.bf16.mxu1 %vm3604_vm0, %v3603_v0 }
  0xf5   :  { %v317_v1 = vpop.f32.mrb[0].mxu0  ;;  %v796_v2 = vpop.f32.mrb[0].mxu1 }
  0xf6   :  { %v318_v3 = vadd.f32 %v3954_v63, %v317_v1  ;;  %v797_v4 = vadd.f32 %v3954_v63, %v796_v2  ;;  %v3045_v5 = vpop.f32.mrb[1].mxu0  ;;  %v3161_v6 = vpop.f32.mrb[1].mxu1 }
  0xf7   :  { %v320_v9 = vpop.f32.mrb[2].mxu0  ;;  %v799_v10 = vpop.f32.mrb[2].mxu1  ;;  %v3561_v5 = vld [vmem:[%s4615_s0 + $0x1b0] sm:$0xff]  }
  0xf8   :  { %v515_v11 = vmax.f32 %v318_v3, 0.0  ;;  %v994_v12 = vmax.f32 %v797_v4, 0.0  ;;  %v321_v13 = vadd.f32 %v3954_v63, %v320_v9  ;;  %v800_v14 = vadd.f32 %v3954_v63, %v799_v10  ;;  %v3046_v15 = vpop.f32.mrb[3].mxu0  ;;  %v3162_v16 = vpop.f32.mrb[3].mxu1  ;;  %v3562_v6 = vld [vmem:[%s4615_s0 + $0x274] sm:$0xff]  }
  0xfa   :  { %v3970_v17 = vmax.f32 %v515_v11, %v994_v12  ;;  %v516_v18 = vmax.f32 %v321_v13, 0.0  ;;  %v995_v19 = vmax.f32 %v800_v14, 0.0  ;;  %3284 = vmatmul.mubr.bf16.gmra.mrb[108].mxu0 %v3555_v7  ;;  %3400 = vmatmul.mubr.bf16.gmra.mrb[108].mxu1 %v3556_v8 }
  0xfb   :  { %3287 = vmatprep.mubr.msk.bf16.mxu0 %vm3604_vm0, %v3603_v0  ;;  %3403 = vmatprep.mubr.msk.bf16.mxu1 %vm3604_vm0, %v3603_v0 }
  0xfc   :  { %v3976_v20 = vmax.f32 %v516_v18, %v995_v19 }
  0xfd   :  { %v325_v21 = vpop.f32.mrb[4].mxu0  ;;  %v804_v22 = vpop.f32.mrb[4].mxu1 }
  0xfe   :  { %v326_v23 = vadd.f32 %v3954_v63, %v325_v21  ;;  %v805_v24 = vadd.f32 %v3954_v63, %v804_v22  ;;  %v3049_v25 = vpop.f32.mrb[5].mxu0  ;;  %v3165_v26 = vpop.f32.mrb[5].mxu1 }
  0xff   :  { %v328_v29 = vpop.f32.mrb[6].mxu0  ;;  %v807_v30 = vpop.f32.mrb[6].mxu1 }
 0x100   :  { %v517_v31 = vmax.f32 %v326_v23, 0.0  ;;  %v996_v32 = vmax.f32 %v805_v24, 0.0  ;;  %v329_v33 = vadd.f32 %v3954_v63, %v328_v29  ;;  %v808_v34 = vadd.f32 %v3954_v63, %v807_v30  ;;  %v3050_v35 = vpop.f32.mrb[7].mxu0  ;;  %v3166_v36 = vpop.f32.mrb[7].mxu1 }
 0x102   :  { %v3988_v37 = vmax.f32 %v517_v31, %v996_v32  ;;  %v518_v38 = vmax.f32 %v329_v33, 0.0  ;;  %v997_v39 = vmax.f32 %v808_v34, 0.0  ;;  %3288 = vmatmul.mubr.bf16.gmra.mrb[112].mxu0 %v3557_v27  ;;  %3404 = vmatmul.mubr.bf16.gmra.mrb[112].mxu1 %v3558_v28  ;;  %v3563_v27 = vld [vmem:[%s4615_s0 + $0x1b8] sm:$0xff]  }
 0x103   :  { %3291 = vmatprep.mubr.msk.bf16.mxu0 %vm3604_vm0, %v3603_v0  ;;  %3407 = vmatprep.mubr.msk.bf16.mxu1 %vm3604_vm0, %v3603_v0  ;;  %v3564_v28 = vld [vmem:[%s4615_s0 + $0x27c] sm:$0xff]  }
 0x104   :  { %v3994_v40 = vmax.f32 %v518_v38, %v997_v39 }
 0x105   :  { %v333_v41 = vpop.f32.mrb[8].mxu0  ;;  %v812_v42 = vpop.f32.mrb[8].mxu1 }
 0x106   :  { %v334_v43 = vadd.f32 %v3954_v63, %v333_v41  ;;  %v813_v44 = vadd.f32 %v3954_v63, %v812_v42  ;;  %v3053_v45 = vpop.f32.mrb[9].mxu0  ;;  %v3169_v46 = vpop.f32.mrb[9].mxu1 }
 0x107   :  { %v336_v49 = vpop.f32.mrb[10].mxu0  ;;  %v815_v50 = vpop.f32.mrb[10].mxu1 }
 0x108   :  { %v519_v51 = vmax.f32 %v334_v43, 0.0  ;;  %v998_v52 = vmax.f32 %v813_v44, 0.0  ;;  %v337_v53 = vadd.f32 %v3954_v63, %v336_v49  ;;  %v816_v54 = vadd.f32 %v3954_v63, %v815_v50  ;;  %v3054_v55 = vpop.f32.mrb[11].mxu0  ;;  %v3170_v56 = vpop.f32.mrb[11].mxu1  ;;  %v3565_v49 = vld [vmem:[%s4615_s0 + $0x1c0] sm:$0xff]  }
 0x109   :  { %v3566_v50 = vld [vmem:[%s4615_s0 + $0x284] sm:$0xff]  }
 0x10a   :  { %v4006_v57 = vmax.f32 %v519_v51, %v998_v52  ;;  %v520_v58 = vmax.f32 %v337_v53, 0.0  ;;  %v999_v59 = vmax.f32 %v816_v54, 0.0  ;;  %3292 = vmatmul.mubr.bf16.gmra.mrb[116].mxu0 %v3559_v47  ;;  %3408 = vmatmul.mubr.bf16.gmra.mrb[116].mxu1 %v3560_v48 }
 0x10b   :  { %3295 = vmatprep.mubr.msk.bf16.mxu0 %vm3604_vm0, %v3603_v0  ;;  %3411 = vmatprep.mubr.msk.bf16.mxu1 %vm3604_vm0, %v3603_v0 }
 0x10c   :  { %v4012_v60 = vmax.f32 %v520_v58, %v999_v59 }
 0x10d   :  { %v341_v61 = vpop.f32.mrb[12].mxu0  ;;  %v820_v62 = vpop.f32.mrb[12].mxu1 }
 0x10e   :  { %v342_v1 = vadd.f32 %v3954_v63, %v341_v61  ;;  %v821_v2 = vadd.f32 %v3954_v63, %v820_v62  ;;  %v3057_v3 = vpop.f32.mrb[13].mxu0  ;;  %v3173_v4 = vpop.f32.mrb[13].mxu1 }
 0x10f   :  { %v344_v7 = vpop.f32.mrb[14].mxu0  ;;  %v823_v8 = vpop.f32.mrb[14].mxu1 }
 0x110   :  { %v521_v9 = vmax.f32 %v342_v1, 0.0  ;;  %v1000_v10 = vmax.f32 %v821_v2, 0.0  ;;  %v345_v11 = vadd.f32 %v3954_v63, %v344_v7  ;;  %v824_v12 = vadd.f32 %v3954_v63, %v823_v8  ;;  %v3058_v13 = vpop.f32.mrb[15].mxu0  ;;  %v3174_v14 = vpop.f32.mrb[15].mxu1 }
 0x112   :  { %v4024_v15 = vmax.f32 %v521_v9, %v1000_v10  ;;  %v522_v16 = vmax.f32 %v345_v11, 0.0  ;;  %v1001_v18 = vmax.f32 %v824_v12, 0.0  ;;  %3296 = vmatmul.mubr.bf16.gmra.mrb[120].mxu0 %v3561_v5  ;;  %3412 = vmatmul.mubr.bf16.gmra.mrb[120].mxu1 %v3562_v6  ;;  %v3567_v9 = vld [vmem:[%s4615_s0 + $0x1c8] sm:$0xff]  }
 0x113   :  { %3299 = vmatprep.mubr.msk.bf16.mxu0 %vm3604_vm0, %v3603_v0  ;;  %3415 = vmatprep.mubr.msk.bf16.mxu1 %vm3604_vm0, %v3603_v0  ;;  %v3568_v10 = vld [vmem:[%s4615_s0 + $0x28c] sm:$0xff]  }
 0x114   :  { %v4030_v19 = vmax.f32 %v522_v16, %v1001_v18 }
 0x115   :  { %v349_v21 = vpop.f32.mrb[16].mxu0  ;;  %v828_v22 = vpop.f32.mrb[16].mxu1 }
 0x116   :  { %v350_v23 = vadd.f32 %v3954_v63, %v349_v21  ;;  %v829_v24 = vadd.f32 %v3954_v63, %v828_v22  ;;  %v3061_v25 = vpop.f32.mrb[17].mxu0  ;;  %v3177_v26 = vpop.f32.mrb[17].mxu1 }
 0x117   :  { %v352_v29 = vpop.f32.mrb[18].mxu0  ;;  %v831_v30 = vpop.f32.mrb[18].mxu1 }
 0x118   :  { %v523_v31 = vmax.f32 %v350_v23, 0.0  ;;  %v1002_v32 = vmax.f32 %v829_v24, 0.0  ;;  %v353_v33 = vadd.f32 %v3954_v63, %v352_v29  ;;  %v832_v34 = vadd.f32 %v3954_v63, %v831_v30  ;;  %v3062_v35 = vpop.f32.mrb[19].mxu0  ;;  %v3178_v36 = vpop.f32.mrb[19].mxu1 }
 0x11a   :  { %v4042_v38 = vmax.f32 %v523_v31, %v1002_v32  ;;  %v524_v39 = vmax.f32 %v353_v33, 0.0  ;;  %v1003_v41 = vmax.f32 %v832_v34, 0.0  ;;  %3300 = vmatmul.mubr.bf16.gmra.mrb[124].mxu0 %v3563_v27  ;;  %3416 = vmatmul.mubr.bf16.gmra.mrb[124].mxu1 %v3564_v28  ;;  %v3569_v33 = vld [vmem:[%s4615_s0 + $0x1d0] sm:$0xff]  }
 0x11b   :  { %3303 = vmatprep.mubr.msk.bf16.mxu0 %vm3604_vm0, %v3603_v0  ;;  %3419 = vmatprep.mubr.msk.bf16.mxu1 %vm3604_vm0, %v3603_v0  ;;  %v3570_v34 = vld [vmem:[%s4615_s0 + $0x294] sm:$0xff]  }
 0x11c   :  { %v4048_v42 = vmax.f32 %v524_v39, %v1003_v41 }
 0x11d   :  { %v357_v43 = vpop.f32.mrb[20].mxu0  ;;  %v836_v44 = vpop.f32.mrb[20].mxu1 }
 0x11e   :  { %v358_v45 = vadd.f32 %v3954_v63, %v357_v43  ;;  %v837_v46 = vadd.f32 %v3954_v63, %v836_v44  ;;  %v3065_v47 = vpop.f32.mrb[21].mxu0  ;;  %v3181_v48 = vpop.f32.mrb[21].mxu1 }
 0x11f   :  { %v360_v51 = vpop.f32.mrb[22].mxu0  ;;  %v839_v52 = vpop.f32.mrb[22].mxu1 }
 0x120   :  { %v525_v53 = vmax.f32 %v358_v45, 0.0  ;;  %v1004_v54 = vmax.f32 %v837_v46, 0.0  ;;  %v361_v55 = vadd.f32 %v3954_v63, %v360_v51  ;;  %v840_v56 = vadd.f32 %v3954_v63, %v839_v52  ;;  %v3066_v58 = vpop.f32.mrb[23].mxu0  ;;  %v3182_v59 = vpop.f32.mrb[23].mxu1 }
 0x121   :  { %v3571_v58 = vld [vmem:[%s4615_s0 + $0x1d8] sm:$0xff]  }
 0x122   :  { %v4060_v61 = vmax.f32 %v525_v53, %v1004_v54  ;;  %v526_v62 = vmax.f32 %v361_v55, 0.0  ;;  %v1005_v1 = vmax.f32 %v840_v56, 0.0  ;;  %3304 = vmatmul.mubr.bf16.gmra.mrb[128].mxu0 %v3565_v49  ;;  %3420 = vmatmul.mubr.bf16.gmra.mrb[128].mxu1 %v3566_v50  ;;  %v3572_v59 = vld [vmem:[%s4615_s0 + $0x29c] sm:$0xff]  }
 0x123   :  { %3307 = vmatprep.mubr.msk.bf16.mxu0 %vm3604_vm0, %v3603_v0  ;;  %3423 = vmatprep.mubr.msk.bf16.mxu1 %vm3604_vm0, %v3603_v0 }
 0x124   :  { %v4066_v2 = vmax.f32 %v526_v62, %v1005_v1 }
 0x125   :  { %v365_v3 = vpop.f32.mrb[24].mxu0  ;;  %v844_v4 = vpop.f32.mrb[24].mxu1 }
 0x126   :  { %v366_v5 = vadd.f32 %v3954_v63, %v365_v3  ;;  %v845_v6 = vadd.f32 %v3954_v63, %v844_v4  ;;  %v3069_v7 = vpop.f32.mrb[25].mxu0  ;;  %v3185_v8 = vpop.f32.mrb[25].mxu1 }
 0x127   :  { %v368_v11 = vpop.f32.mrb[26].mxu0  ;;  %v847_v12 = vpop.f32.mrb[26].mxu1 }
 0x128   :  { %v527_v13 = vmax.f32 %v366_v5, 0.0  ;;  %v1006_v14 = vmax.f32 %v845_v6, 0.0  ;;  %v369_v16 = vadd.f32 %v3954_v63, %v368_v11  ;;  %v848_v18 = vadd.f32 %v3954_v63, %v847_v12  ;;  %v3070_v21 = vpop.f32.mrb[27].mxu0  ;;  %v3186_v22 = vpop.f32.mrb[27].mxu1 }
 0x12a   :  { %v4078_v23 = vmax.f32 %v527_v13, %v1006_v14  ;;  %v528_v24 = vmax.f32 %v369_v16, 0.0  ;;  %v1007_v25 = vmax.f32 %v848_v18, 0.0  ;;  %3308 = vmatmul.mubr.bf16.gmra.mrb[132].mxu0 %v3567_v9  ;;  %3424 = vmatmul.mubr.bf16.gmra.mrb[132].mxu1 %v3568_v10 }
 0x12b   :  { %3311 = vmatprep.mubr.msk.bf16.mxu0 %vm3604_vm0, %v3603_v0  ;;  %3427 = vmatprep.mubr.msk.bf16.mxu1 %vm3604_vm0, %v3603_v0 }
 0x12c   :  { %v4084_v26 = vmax.f32 %v528_v24, %v1007_v25  ;;  %v3573_v24 = vld [vmem:[%s4615_s0 + $0x1e0] sm:$0xff]  }
 0x12d   :  { %v373_v27 = vpop.f32.mrb[28].mxu0  ;;  %v852_v28 = vpop.f32.mrb[28].mxu1  ;;  %v3574_v25 = vld [vmem:[%s4615_s0 + $0x2a4] sm:$0xff]  }
 0x12e   :  { %v374_v29 = vadd.f32 %v3954_v63, %v373_v27  ;;  %v853_v30 = vadd.f32 %v3954_v63, %v852_v28  ;;  %v3073_v31 = vpop.f32.mrb[29].mxu0  ;;  %v3189_v32 = vpop.f32.mrb[29].mxu1 }
 0x12f   :  { %v376_v35 = vpop.f32.mrb[30].mxu0  ;;  %v855_v36 = vpop.f32.mrb[30].mxu1 }
 0x130   :  { %v529_v39 = vmax.f32 %v374_v29, 0.0  ;;  %v1008_v41 = vmax.f32 %v853_v30, 0.0  ;;  %v377_v43 = vadd.f32 %v3954_v63, %v376_v35  ;;  %v856_v44 = vadd.f32 %v3954_v63, %v855_v36  ;;  %v3074_v45 = vpop.f32.mrb[31].mxu0  ;;  %v3190_v46 = vpop.f32.mrb[31].mxu1 }
 0x132   :  { %v4096_v47 = vmax.f32 %v529_v39, %v1008_v41  ;;  %v530_v48 = vmax.f32 %v377_v43, 0.0  ;;  %v1009_v49 = vmax.f32 %v856_v44, 0.0  ;;  %3312 = vmatmul.mubr.bf16.gmra.mrb[136].mxu0 %v3569_v33  ;;  %3428 = vmatmul.mubr.bf16.gmra.mrb[136].mxu1 %v3570_v34 }
 0x133   :  { %3315 = vmatprep.mubr.msk.bf16.mxu0 %vm3604_vm0, %v3603_v0  ;;  %3431 = vmatprep.mubr.msk.bf16.mxu1 %vm3604_vm0, %v3603_v0 }
 0x134   :  { %v4102_v50 = vmax.f32 %v530_v48, %v1009_v49 }
 0x135   :  { %v381_v51 = vpop.f32.mrb[32].mxu0  ;;  %v860_v52 = vpop.f32.mrb[32].mxu1 }
 0x136   :  { %v382_v53 = vadd.f32 %v3954_v63, %v381_v51  ;;  %v861_v54 = vadd.f32 %v3954_v63, %v860_v52  ;;  %v3077_v55 = vpop.f32.mrb[33].mxu0  ;;  %v3193_v56 = vpop.f32.mrb[33].mxu1  ;;  %v3575_v51 = vld [vmem:[%s4615_s0 + $0x1e8] sm:$0xff]  }
 0x137   :  { %v384_v62 = vpop.f32.mrb[34].mxu0  ;;  %v863_v1 = vpop.f32.mrb[34].mxu1  ;;  %v3576_v52 = vld [vmem:[%s4615_s0 + $0x2ac] sm:$0xff]  }
 0x138   :  { %v531_v3 = vmax.f32 %v382_v53, 0.0  ;;  %v1010_v4 = vmax.f32 %v861_v54, 0.0  ;;  %v385_v5 = vadd.f32 %v3954_v63, %v384_v62  ;;  %v864_v6 = vadd.f32 %v3954_v63, %v863_v1  ;;  %v3078_v7 = vpop.f32.mrb[35].mxu0  ;;  %v3194_v8 = vpop.f32.mrb[35].mxu1 }
 0x13a   :  { %v4114_v9 = vmax.f32 %v531_v3, %v1010_v4  ;;  %v532_v10 = vmax.f32 %v385_v5, 0.0  ;;  %v1011_v11 = vmax.f32 %v864_v6, 0.0  ;;  %3316 = vmatmul.mubr.bf16.gmra.mrb[140].mxu0 %v3571_v58  ;;  %3432 = vmatmul.mubr.bf16.gmra.mrb[140].mxu1 %v3572_v59 }
 0x13b   :  { %3319 = vmatprep.mubr.msk.bf16.mxu0 %vm3604_vm0, %v3603_v0  ;;  %3435 = vmatprep.mubr.msk.bf16.mxu1 %vm3604_vm0, %v3603_v0 }
 0x13c   :  { %v4120_v12 = vmax.f32 %v532_v10, %v1011_v11 }
 0x13d   :  { %v389_v13 = vpop.f32.mrb[36].mxu0  ;;  %v868_v14 = vpop.f32.mrb[36].mxu1 }
 0x13e   :  { %v390_v16 = vadd.f32 %v3954_v63, %v389_v13  ;;  %v869_v18 = vadd.f32 %v3954_v63, %v868_v14  ;;  %v3081_v21 = vpop.f32.mrb[37].mxu0  ;;  %v3197_v22 = vpop.f32.mrb[37].mxu1 }
 0x13f   :  { %v392_v27 = vpop.f32.mrb[38].mxu0  ;;  %v871_v28 = vpop.f32.mrb[38].mxu1 }
 0x140   :  { %v533_v29 = vmax.f32 %v390_v16, 0.0  ;;  %v1012_v30 = vmax.f32 %v869_v18, 0.0  ;;  %v393_v31 = vadd.f32 %v3954_v63, %v392_v27  ;;  %v872_v32 = vadd.f32 %v3954_v63, %v871_v28  ;;  %v3082_v33 = vpop.f32.mrb[39].mxu0  ;;  %v3198_v34 = vpop.f32.mrb[39].mxu1  ;;  %v3577_v16 = vld [vmem:[%s4615_s0 + $0x1f0] sm:$0xff]  }
 0x141   :  { %v3578_v18 = vld [vmem:[%s4615_s0 + $0x2b4] sm:$0xff]  }
 0x142   :  { %v4132_v35 = vmax.f32 %v533_v29, %v1012_v30  ;;  %v534_v36 = vmax.f32 %v393_v31, 0.0  ;;  %v1013_v39 = vmax.f32 %v872_v32, 0.0  ;;  %3320 = vmatmul.mubr.bf16.gmra.mrb[144].mxu0 %v3573_v24  ;;  %3436 = vmatmul.mubr.bf16.gmra.mrb[144].mxu1 %v3574_v25 }
 0x143   :  { %3323 = vmatprep.mubr.msk.bf16.mxu0 %vm3604_vm0, %v3603_v0  ;;  %3439 = vmatprep.mubr.msk.bf16.mxu1 %vm3604_vm0, %v3603_v0 }
 0x144   :  { %v4138_v41 = vmax.f32 %v534_v36, %v1013_v39 }
 0x145   :  { %v397_v43 = vpop.f32.mrb[40].mxu0  ;;  %v876_v44 = vpop.f32.mrb[40].mxu1 }
 0x146   :  { %v398_v45 = vadd.f32 %v3954_v63, %v397_v43  ;;  %v877_v46 = vadd.f32 %v3954_v63, %v876_v44  ;;  %v3085_v48 = vpop.f32.mrb[41].mxu0  ;;  %v3201_v49 = vpop.f32.mrb[41].mxu1 }
 0x147   :  { %v400_v53 = vpop.f32.mrb[42].mxu0  ;;  %v879_v54 = vpop.f32.mrb[42].mxu1  ;;  %v3579_v48 = vld [vmem:[%s4615_s0 + $0x1f8] sm:$0xff]  }
 0x148   :  { %v535_v55 = vmax.f32 %v398_v45, 0.0  ;;  %v1014_v56 = vmax.f32 %v877_v46, 0.0  ;;  %v401_v58 = vadd.f32 %v3954_v63, %v400_v53  ;;  %v880_v59 = vadd.f32 %v3954_v63, %v879_v54  ;;  %v3086_v62 = vpop.f32.mrb[43].mxu0  ;;  %v3202_v1 = vpop.f32.mrb[43].mxu1  ;;  %v3580_v49 = vld [vmem:[%s4615_s0 + $0x2bc] sm:$0xff]  }
 0x14a   :  { %v4150_v3 = vmax.f32 %v535_v55, %v1014_v56  ;;  %v536_v4 = vmax.f32 %v401_v58, 0.0  ;;  %v1015_v5 = vmax.f32 %v880_v59, 0.0  ;;  %3324 = vmatmul.mubr.bf16.gmra.mrb[148].mxu0 %v3575_v51  ;;  %3440 = vmatmul.mubr.bf16.gmra.mrb[148].mxu1 %v3576_v52 }
 0x14b   :  { %3327 = vmatprep.mubr.msk.bf16.mxu0 %vm3604_vm0, %v3603_v0  ;;  %3443 = vmatprep.mubr.msk.bf16.mxu1 %vm3604_vm0, %v3603_v0 }
 0x14c   :  { %v4156_v6 = vmax.f32 %v536_v4, %v1015_v5 }
 0x14d   :  { %v405_v7 = vpop.f32.mrb[44].mxu0  ;;  %v884_v8 = vpop.f32.mrb[44].mxu1 }
 0x14e   :  { %v406_v10 = vadd.f32 %v3954_v63, %v405_v7  ;;  %v885_v11 = vadd.f32 %v3954_v63, %v884_v8  ;;  %v3089_v13 = vpop.f32.mrb[45].mxu0  ;;  %v3205_v14 = vpop.f32.mrb[45].mxu1 }
 0x14f   :  { %v408_v21 = vpop.f32.mrb[46].mxu0  ;;  %v887_v22 = vpop.f32.mrb[46].mxu1 }
 0x150   :  { %v537_v24 = vmax.f32 %v406_v10, 0.0  ;;  %v1016_v25 = vmax.f32 %v885_v11, 0.0  ;;  %v409_v27 = vadd.f32 %v3954_v63, %v408_v21  ;;  %v888_v28 = vadd.f32 %v3954_v63, %v887_v22  ;;  %v3090_v29 = vpop.f32.mrb[47].mxu0  ;;  %v3206_v30 = vpop.f32.mrb[47].mxu1 }
 0x152   :  { %v4168_v31 = vmax.f32 %v537_v24, %v1016_v25  ;;  %v538_v32 = vmax.f32 %v409_v27, 0.0  ;;  %v1017_v33 = vmax.f32 %v888_v28, 0.0  ;;  %3328 = vmatmul.mubr.bf16.gmra.mrb[152].mxu0 %v3577_v16  ;;  %3444 = vmatmul.mubr.bf16.gmra.mrb[152].mxu1 %v3578_v18  ;;  %v3581_v16 = vld [vmem:[%s4615_s0 + $0x200] sm:$0xff]  }
 0x153   :  { %3331 = vmatprep.mubr.msk.bf16.mxu0 %vm3604_vm0, %v3603_v0  ;;  %3447 = vmatprep.mubr.msk.bf16.mxu1 %vm3604_vm0, %v3603_v0  ;;  %v3582_v18 = vld [vmem:[%s4615_s0 + $0x2c4] sm:$0xff]  }
 0x154   :  { %v4174_v34 = vmax.f32 %v538_v32, %v1017_v33 }
 0x155   :  { %v413_v36 = vpop.f32.mrb[48].mxu0  ;;  %v892_v39 = vpop.f32.mrb[48].mxu1 }
 0x156   :  { %v414_v43 = vadd.f32 %v3954_v63, %v413_v36  ;;  %v893_v44 = vadd.f32 %v3954_v63, %v892_v39  ;;  %v3093_v45 = vpop.f32.mrb[49].mxu0  ;;  %v3209_v46 = vpop.f32.mrb[49].mxu1 }
 0x157   :  { %v416_v51 = vpop.f32.mrb[50].mxu0  ;;  %v895_v52 = vpop.f32.mrb[50].mxu1 }
 0x158   :  { %v539_v53 = vmax.f32 %v414_v43, 0.0  ;;  %v1018_v54 = vmax.f32 %v893_v44, 0.0  ;;  %v417_v55 = vadd.f32 %v3954_v63, %v416_v51  ;;  %v896_v56 = vadd.f32 %v3954_v63, %v895_v52  ;;  %v3094_v58 = vpop.f32.mrb[51].mxu0  ;;  %v3210_v59 = vpop.f32.mrb[51].mxu1  ;;  %v3583_v51 = vld [vmem:[%s4615_s0 + $0x208] sm:$0xff]  }
 0x159   :  { %v3584_v52 = vld [vmem:[%s4615_s0 + $0x2cc] sm:$0xff]  }
 0x15a   :  { %v4186_v62 = vmax.f32 %v539_v53, %v1018_v54  ;;  %v540_v1 = vmax.f32 %v417_v55, 0.0  ;;  %v1019_v4 = vmax.f32 %v896_v56, 0.0  ;;  %3332 = vmatmul.mubr.bf16.gmra.mrb[156].mxu0 %v3579_v48  ;;  %3448 = vmatmul.mubr.bf16.gmra.mrb[156].mxu1 %v3580_v49 }
 0x15b   :  { %3335 = vmatprep.mubr.msk.bf16.mxu0 %vm3604_vm0, %v3603_v0  ;;  %3451 = vmatprep.mubr.msk.bf16.mxu1 %vm3604_vm0, %v3603_v0 }
 0x15c   :  { %v4192_v5 = vmax.f32 %v540_v1, %v1019_v4 }
 0x15d   :  { %v421_v7 = vpop.f32.mrb[52].mxu0  ;;  %v900_v8 = vpop.f32.mrb[52].mxu1 }
 0x15e   :  { %v422_v10 = vadd.f32 %v3954_v63, %v421_v7  ;;  %v901_v11 = vadd.f32 %v3954_v63, %v900_v8  ;;  %v3097_v13 = vpop.f32.mrb[53].mxu0  ;;  %v3213_v14 = vpop.f32.mrb[53].mxu1 }
 0x15f   :  { %v424_v21 = vpop.f32.mrb[54].mxu0  ;;  %v903_v22 = vpop.f32.mrb[54].mxu1 }
 0x160   :  { %v541_v24 = vmax.f32 %v422_v10, 0.0  ;;  %v1020_v25 = vmax.f32 %v901_v11, 0.0  ;;  %v425_v27 = vadd.f32 %v3954_v63, %v424_v21  ;;  %v904_v28 = vadd.f32 %v3954_v63, %v903_v22  ;;  %v3098_v29 = vpop.f32.mrb[55].mxu0  ;;  %v3214_v30 = vpop.f32.mrb[55].mxu1 }
 0x162   :  { %v4204_v32 = vmax.f32 %v541_v24, %v1020_v25  ;;  %v542_v33 = vmax.f32 %v425_v27, 0.0  ;;  %v1021_v36 = vmax.f32 %v904_v28, 0.0  ;;  %3336 = vmatmul.mubr.bf16.gmra.mrb[160].mxu0 %v3581_v16  ;;  %3452 = vmatmul.mubr.bf16.gmra.mrb[160].mxu1 %v3582_v18  ;;  %v3585_v24 = vld [vmem:[%s4615_s0 + $0x210] sm:$0xff]  }
 0x163   :  { %3339 = vmatprep.mubr.msk.bf16.mxu0 %vm3604_vm0, %v3603_v0  ;;  %3455 = vmatprep.mubr.msk.bf16.mxu1 %vm3604_vm0, %v3603_v0  ;;  %v3586_v25 = vld [vmem:[%s4615_s0 + $0x2d4] sm:$0xff]  }
 0x164   :  { %v4210_v39 = vmax.f32 %v542_v33, %v1021_v36 }
 0x165   :  { %v429_v43 = vpop.f32.mrb[56].mxu0  ;;  %v908_v44 = vpop.f32.mrb[56].mxu1 }
 0x166   :  { %v430_v45 = vadd.f32 %v3954_v63, %v429_v43  ;;  %v909_v46 = vadd.f32 %v3954_v63, %v908_v44  ;;  %v3101_v48 = vpop.f32.mrb[57].mxu0  ;;  %v3217_v49 = vpop.f32.mrb[57].mxu1 }
 0x167   :  { %v432_v53 = vpop.f32.mrb[58].mxu0  ;;  %v911_v54 = vpop.f32.mrb[58].mxu1 }
 0x168   :  { %v543_v55 = vmax.f32 %v430_v45, 0.0  ;;  %v1022_v56 = vmax.f32 %v909_v46, 0.0  ;;  %v433_v58 = vadd.f32 %v3954_v63, %v432_v53  ;;  %v912_v59 = vadd.f32 %v3954_v63, %v911_v54  ;;  %v3102_v1 = vpop.f32.mrb[59].mxu0  ;;  %v3218_v4 = vpop.f32.mrb[59].mxu1 }
 0x16a   :  { %v4222_v7 = vmax.f32 %v543_v55, %v1022_v56  ;;  %v544_v8 = vmax.f32 %v433_v58, 0.0  ;;  %v1023_v10 = vmax.f32 %v912_v59, 0.0  ;;  %3340 = vmatmul.mubr.bf16.gmra.mrb[164].mxu0 %v3583_v51  ;;  %3456 = vmatmul.mubr.bf16.gmra.mrb[164].mxu1 %v3584_v52  ;;  %v3587_v58 = vld [vmem:[%s4615_s0 + $0x218] sm:$0xff]  }
 0x16b   :  { %3343 = vmatprep.mubr.msk.bf16.mxu0 %vm3604_vm0, %v3603_v0  ;;  %3459 = vmatprep.mubr.msk.bf16.mxu1 %vm3604_vm0, %v3603_v0  ;;  %v3588_v59 = vld [vmem:[%s4615_s0 + $0x2dc] sm:$0xff]  }
 0x16c   :  { %v4228_v11 = vmax.f32 %v544_v8, %v1023_v10 }
 0x16d   :  { %v437_v13 = vpop.f32.mrb[60].mxu0  ;;  %v916_v14 = vpop.f32.mrb[60].mxu1 }
 0x16e   :  { %v438_v16 = vadd.f32 %v3954_v63, %v437_v13  ;;  %v917_v18 = vadd.f32 %v3954_v63, %v916_v14  ;;  %v3105_v21 = vpop.f32.mrb[61].mxu0  ;;  %v3221_v22 = vpop.f32.mrb[61].mxu1 }
 0x16f   :  { %v440_v27 = vpop.f32.mrb[62].mxu0  ;;  %v919_v28 = vpop.f32.mrb[62].mxu1 }
 0x170   :  { %v545_v29 = vmax.f32 %v438_v16, 0.0  ;;  %v1024_v30 = vmax.f32 %v917_v18, 0.0  ;;  %v441_v33 = vadd.f32 %v3954_v63, %v440_v27  ;;  %v920_v36 = vadd.f32 %v3954_v63, %v919_v28  ;;  %v3106_v43 = vpop.f32.mrb[63].mxu0  ;;  %v3222_v44 = vpop.f32.mrb[63].mxu1 }
 0x171   :  { %v3589_v43 = vld [vmem:[%s4615_s0 + $0x220] sm:$0xff]  }
 0x172   :  { %v4240_v45 = vmax.f32 %v545_v29, %v1024_v30  ;;  %v546_v46 = vmax.f32 %v441_v33, 0.0  ;;  %v1025_v48 = vmax.f32 %v920_v36, 0.0  ;;  %3344 = vmatmul.mubr.bf16.gmra.mrb[168].mxu0 %v3585_v24  ;;  %3460 = vmatmul.mubr.bf16.gmra.mrb[168].mxu1 %v3586_v25  ;;  %v3590_v44 = vld [vmem:[%s4615_s0 + $0x2e4] sm:$0xff]  }
 0x173   :  { %3347 = vmatprep.mubr.msk.bf16.mxu0 %vm3604_vm0, %v3603_v0  ;;  %3463 = vmatprep.mubr.msk.bf16.mxu1 %vm3604_vm0, %v3603_v0 }
 0x174   :  { %v4246_v49 = vmax.f32 %v546_v46, %v1025_v48 }
 0x175   :  { %v445_v51 = vpop.f32.mrb[64].mxu0  ;;  %v924_v52 = vpop.f32.mrb[64].mxu1 }
 0x176   :  { %v446_v53 = vadd.f32 %v3954_v63, %v445_v51  ;;  %v925_v54 = vadd.f32 %v3954_v63, %v924_v52  ;;  %v3109_v55 = vpop.f32.mrb[65].mxu0  ;;  %v3225_v56 = vpop.f32.mrb[65].mxu1 }
 0x177   :  { %v448_v1 = vpop.f32.mrb[66].mxu0  ;;  %v927_v4 = vpop.f32.mrb[66].mxu1 }
 0x178   :  { %v547_v8 = vmax.f32 %v446_v53, 0.0  ;;  %v1026_v10 = vmax.f32 %v925_v54, 0.0  ;;  %v449_v13 = vadd.f32 %v3954_v63, %v448_v1  ;;  %v928_v14 = vadd.f32 %v3954_v63, %v927_v4  ;;  %v3110_v16 = vpop.f32.mrb[67].mxu0  ;;  %v3226_v18 = vpop.f32.mrb[67].mxu1 }
 0x17a   :  { %v4258_v21 = vmax.f32 %v547_v8, %v1026_v10  ;;  %v548_v22 = vmax.f32 %v449_v13, 0.0  ;;  %v1027_v24 = vmax.f32 %v928_v14, 0.0  ;;  %3348 = vmatmul.mubr.bf16.gmra.mrb[172].mxu0 %v3587_v58  ;;  %3464 = vmatmul.mubr.bf16.gmra.mrb[172].mxu1 %v3588_v59 }
 0x17b   :  { %3351 = vmatprep.mubr.msk.bf16.mxu0 %vm3604_vm0, %v3603_v0  ;;  %3467 = vmatprep.mubr.msk.bf16.mxu1 %vm3604_vm0, %v3603_v0 }
 0x17c   :  { %v4264_v25 = vmax.f32 %v548_v22, %v1027_v24  ;;  %v3591_v22 = vld [vmem:[%s4615_s0 + $0x228] sm:$0xff]  }
 0x17d   :  { %v453_v27 = vpop.f32.mrb[68].mxu0  ;;  %v932_v28 = vpop.f32.mrb[68].mxu1  ;;  %v3592_v24 = vld [vmem:[%s4615_s0 + $0x2ec] sm:$0xff]  }
 0x17e   :  { %v454_v29 = vadd.f32 %v3954_v63, %v453_v27  ;;  %v933_v30 = vadd.f32 %v3954_v63, %v932_v28  ;;  %v3113_v33 = vpop.f32.mrb[69].mxu0  ;;  %v3229_v36 = vpop.f32.mrb[69].mxu1 }
 0x17f   :  { %v456_v46 = vpop.f32.mrb[70].mxu0  ;;  %v935_v48 = vpop.f32.mrb[70].mxu1 }
 0x180   :  { %v549_v51 = vmax.f32 %v454_v29, 0.0  ;;  %v1028_v52 = vmax.f32 %v933_v30, 0.0  ;;  %v457_v53 = vadd.f32 %v3954_v63, %v456_v46  ;;  %v936_v54 = vadd.f32 %v3954_v63, %v935_v48  ;;  %v3114_v55 = vpop.f32.mrb[71].mxu0  ;;  %v3230_v56 = vpop.f32.mrb[71].mxu1 }
 0x182   :  { %v4276_v58 = vmax.f32 %v549_v51, %v1028_v52  ;;  %v550_v59 = vmax.f32 %v457_v53, 0.0  ;;  %v1029_v1 = vmax.f32 %v936_v54, 0.0  ;;  %3352 = vmatmul.mubr.bf16.gmra.mrb[176].mxu0 %v3589_v43  ;;  %3468 = vmatmul.mubr.bf16.gmra.mrb[176].mxu1 %v3590_v44 }
 0x183   :  { %3355 = vmatprep.mubr.msk.bf16.mxu0 %vm3604_vm0, %v3603_v0  ;;  %3471 = vmatprep.mubr.msk.bf16.mxu1 %vm3604_vm0, %v3603_v0 }
 0x184   :  { %v4282_v4 = vmax.f32 %v550_v59, %v1029_v1 }
 0x185   :  { %v461_v8 = vpop.f32.mrb[72].mxu0  ;;  %v940_v10 = vpop.f32.mrb[72].mxu1 }
 0x186   :  { %v462_v13 = vadd.f32 %v3954_v63, %v461_v8  ;;  %v941_v14 = vadd.f32 %v3954_v63, %v940_v10  ;;  %v3117_v16 = vpop.f32.mrb[73].mxu0  ;;  %v3233_v18 = vpop.f32.mrb[73].mxu1  ;;  %v3593_v8 = vld [vmem:[%s4615_s0 + $0x230] sm:$0xff]  }
 0x187   :  { %v464_v27 = vpop.f32.mrb[74].mxu0  ;;  %v943_v28 = vpop.f32.mrb[74].mxu1  ;;  %v3594_v10 = vld [vmem:[%s4615_s0 + $0x2f4] sm:$0xff]  }
 0x188   :  { %v551_v29 = vmax.f32 %v462_v13, 0.0  ;;  %v1030_v30 = vmax.f32 %v941_v14, 0.0  ;;  %v465_v33 = vadd.f32 %v3954_v63, %v464_v27  ;;  %v944_v36 = vadd.f32 %v3954_v63, %v943_v28  ;;  %v3118_v43 = vpop.f32.mrb[75].mxu0  ;;  %v3234_v44 = vpop.f32.mrb[75].mxu1 }
 0x18a   :  { %v4294_v46 = vmax.f32 %v551_v29, %v1030_v30  ;;  %v552_v48 = vmax.f32 %v465_v33, 0.0  ;;  %v1031_v51 = vmax.f32 %v944_v36, 0.0  ;;  %3356 = vmatmul.mubr.bf16.gmra.mrb[180].mxu0 %v3591_v22  ;;  %3472 = vmatmul.mubr.bf16.gmra.mrb[180].mxu1 %v3592_v24 }
 0x18b   :  { %3359 = vmatprep.mubr.msk.bf16.mxu0 %vm3604_vm0, %v3603_v0  ;;  %3475 = vmatprep.mubr.msk.bf16.mxu1 %vm3604_vm0, %v3603_v0 }
 0x18c   :  { %v4300_v52 = vmax.f32 %v552_v48, %v1031_v51 }
 0x18d   :  { %v469_v53 = vpop.f32.mrb[76].mxu0  ;;  %v948_v54 = vpop.f32.mrb[76].mxu1 }
 0x18e   :  { %v470_v55 = vadd.f32 %v3954_v63, %v469_v53  ;;  %v949_v56 = vadd.f32 %v3954_v63, %v948_v54  ;;  %v3121_v59 = vpop.f32.mrb[77].mxu0  ;;  %v3237_v1 = vpop.f32.mrb[77].mxu1 }
 0x18f   :  { %v472_v13 = vpop.f32.mrb[78].mxu0  ;;  %v951_v14 = vpop.f32.mrb[78].mxu1 }
 0x190   :  { %v553_v16 = vmax.f32 %v470_v55, 0.0  ;;  %v1032_v18 = vmax.f32 %v949_v56, 0.0  ;;  %v473_v22 = vadd.f32 %v3954_v63, %v472_v13  ;;  %v952_v24 = vadd.f32 %v3954_v63, %v951_v14  ;;  %v3122_v27 = vpop.f32.mrb[79].mxu0  ;;  %v3238_v28 = vpop.f32.mrb[79].mxu1  ;;  %v3595_v55 = vld [vmem:[%s4615_s0 + $0x238] sm:$0xff]  }
 0x191   :  { %v3596_v56 = vld [vmem:[%s4615_s0 + $0x2fc] sm:$0xff]  }
 0x192   :  { %v4312_v29 = vmax.f32 %v553_v16, %v1032_v18  ;;  %v554_v30 = vmax.f32 %v473_v22, 0.0  ;;  %v1033_v33 = vmax.f32 %v952_v24, 0.0  ;;  %3360 = vmatmul.mubr.bf16.gmra.mrb[184].mxu0 %v3593_v8  ;;  %3476 = vmatmul.mubr.bf16.gmra.mrb[184].mxu1 %v3594_v10 }
 0x193   :  { %3363 = vmatprep.mubr.msk.bf16.mxu0 %vm3604_vm0, %v3603_v0  ;;  %3479 = vmatprep.mubr.msk.bf16.mxu1 %vm3604_vm0, %v3603_v0 }
 0x194   :  { %v4318_v36 = vmax.f32 %v554_v30, %v1033_v33 }
 0x195   :  { %v477_v43 = vpop.f32.mrb[80].mxu0  ;;  %v956_v44 = vpop.f32.mrb[80].mxu1 }
 0x196   :  { %v478_v48 = vadd.f32 %v3954_v63, %v477_v43  ;;  %v957_v51 = vadd.f32 %v3954_v63, %v956_v44  ;;  %v3125_v53 = vpop.f32.mrb[81].mxu0  ;;  %v3241_v54 = vpop.f32.mrb[81].mxu1 }
 0x197   :  { %v480_v59 = vpop.f32.mrb[82].mxu0  ;;  %v959_v1 = vpop.f32.mrb[82].mxu1  ;;  %v3597_v53 = vld [vmem:[%s4615_s0 + $0x240] sm:$0xff]  }
 0x198   :  { %v555_v8 = vmax.f32 %v478_v48, 0.0  ;;  %v1034_v10 = vmax.f32 %v957_v51, 0.0  ;;  %v481_v13 = vadd.f32 %v3954_v63, %v480_v59  ;;  %v960_v14 = vadd.f32 %v3954_v63, %v959_v1  ;;  %v3126_v16 = vpop.f32.mrb[83].mxu0  ;;  %v3242_v18 = vpop.f32.mrb[83].mxu1  ;;  %v3598_v54 = vld [vmem:[%s4615_s0 + $0x304] sm:$0xff]  }
 0x19a   :  { %v4330_v22 = vmax.f32 %v555_v8, %v1034_v10  ;;  %v556_v24 = vmax.f32 %v481_v13, 0.0  ;;  %v1035_v27 = vmax.f32 %v960_v14, 0.0  ;;  %3364 = vmatmul.mubr.bf16.gmra.mrb[188].mxu0 %v3595_v55  ;;  %3480 = vmatmul.mubr.bf16.gmra.mrb[188].mxu1 %v3596_v56  ;;  %v4349_v8 = vld [vmem:[%s4616_s2] ss:$0 sm:$0xff] }
 0x19b   :  { %3367 = vmatprep.mubr.msk.bf16.mxu0 %vm3604_vm0, %v3603_v0  ;;  %3483 = vmatprep.mubr.msk.bf16.mxu1 %vm3604_vm0, %v3603_v0 }
 0x19c   :  { %v4336_v28 = vmax.f32 %v556_v24, %v1035_v27 }
 0x19d   :  { %v485_v30 = vpop.f32.mrb[84].mxu0  ;;  %v964_v33 = vpop.f32.mrb[84].mxu1 }
 0x19e   :  { %v486_v43 = vadd.f32 %v3954_v63, %v485_v30  ;;  %v965_v44 = vadd.f32 %v3954_v63, %v964_v33  ;;  %v3129_v48 = vpop.f32.mrb[85].mxu0  ;;  %v3245_v51 = vpop.f32.mrb[85].mxu1 }
 0x19f   :  { %v488_v55 = vpop.f32.mrb[86].mxu0  ;;  %v967_v56 = vpop.f32.mrb[86].mxu1 }
 0x1a0   :  { %v557_v59 = vmax.f32 %v486_v43, 0.0  ;;  %v1036_v1 = vmax.f32 %v965_v44, 0.0  ;;  %v489_v63 = vadd.f32 %v4349_v8, %v488_v55  ;;  %v968_v10 = vadd.f32 %v4349_v8, %v967_v56  ;;  %v3130_v13 = vpop.f32.mrb[87].mxu0  ;;  %v3246_v14 = vpop.f32.mrb[87].mxu1 }
 0x1a2   :  { %v4353_v16 = vmax.f32 %v557_v59, %v1036_v1  ;;  %v558_v18 = vmax.f32 %v489_v63, 0.0  ;;  %v1037_v24 = vmax.f32 %v968_v10, 0.0  ;;  %3368 = vmatmul.mubr.bf16.gmra.mrb[192].mxu0 %v3597_v53  ;;  %3484 = vmatmul.mubr.bf16.gmra.mrb[192].mxu1 %v3598_v54  ;;  %v3599_v53 = vld [vmem:[%s4615_s0 + $0x248] ss:$0 sps:$4 sm:$0xff]   ;;  %v3600_v54 = vld [vmem:[%s4615_s0 + $0x30c] ss:$0 sps:$4 sm:$0xff]  }
 0x1a3   :  { %3371 = vmatprep.mubr.msk.bf16.mxu0 %vm3604_vm0, %v3603_v0  ;;  %3487 = vmatprep.mubr.msk.bf16.mxu1 %vm3604_vm0, %v3603_v0 }
 0x1a4   :  { %4618 = vst [vmem:[#allocation2_spill] sm:$0xff] %v4353_v16  ;;  %v4359_v27 = vmax.f32 %v558_v18, %v1037_v24 }
 0x1a5   :  { %v493_v30 = vpop.f32.mrb[88].mxu0  ;;  %v972_v33 = vpop.f32.mrb[88].mxu1 }
 0x1a6   :  { %4619 = vst [vmem:[#allocation3_spill] sm:$0xff] %v4359_v27  ;;  %v494_v43 = vadd.f32 %v4349_v8, %v493_v30  ;;  %v973_v44 = vadd.f32 %v4349_v8, %v972_v33  ;;  %v3133_v48 = vpop.f32.mrb[89].mxu0  ;;  %v3249_v51 = vpop.f32.mrb[89].mxu1 }
 0x1a7   :  { %v496_v55 = vpop.f32.mrb[90].mxu0  ;;  %v975_v0 = vpop.f32.mrb[90].mxu1 }
 0x1a8   :  { %v559_v56 = vmax.f32 %v494_v43, 0.0  ;;  %v1038_v59 = vmax.f32 %v973_v44, 0.0  ;;  %v497_v1 = vadd.f32 %v4349_v8, %v496_v55  ;;  %v976_v63 = vadd.f32 %v4349_v8, %v975_v0  ;;  %v3134_v10 = vpop.f32.mrb[91].mxu0  ;;  %v3250_v13 = vpop.f32.mrb[91].mxu1 }
 0x1aa   :  { %v4371_v14 = vmax.f32 %v559_v56, %v1038_v59  ;;  %v560_v18 = vmax.f32 %v497_v1, 0.0  ;;  %v1039_v24 = vmax.f32 %v976_v63, 0.0  ;;  %3372 = vmatmul.mubr.bf16.gmra.mrb[196].mxu0 %v3599_v53  ;;  %3488 = vmatmul.mubr.bf16.gmra.mrb[196].mxu1 %v3600_v54 }
 0x1ac   :  { %4620 = vst [vmem:[#allocation4_spill] sm:$0xff] %v4371_v14  ;;  %v4373_v30 = vmax.f32 %v560_v18, %v1039_v24 }
 0x1ad   :  { %v501_v33 = vpop.f32.mrb[92].mxu0  ;;  %v980_v48 = vpop.f32.mrb[92].mxu1 }
 0x1ae   :  { %4621 = vst [vmem:[#allocation5_spill] sm:$0xff] %v4373_v30  ;;  %v502_v51 = vadd.f32 %v4349_v8, %v501_v33  ;;  %v981_v43 = vadd.f32 %v4349_v8, %v980_v48  ;;  %v3137_v44 = vpop.f32.mrb[93].mxu0  ;;  %v3253_v55 = vpop.f32.mrb[93].mxu1 }
 0x1af   :  { %v504_v27 = vpop.f32.mrb[94].mxu0  ;;  %v983_v0 = vpop.f32.mrb[94].mxu1 }
 0x1b0   :  { %v561_v10 = vmax.f32 %v502_v51, 0.0  ;;  %v1040_v13 = vmax.f32 %v981_v43, 0.0  ;;  %v505_v56 = vadd.f32 %v4349_v8, %v504_v27  ;;  %v984_v59 = vadd.f32 %v4349_v8, %v983_v0  ;;  %v3138_v53 = vpop.f32.mrb[95].mxu0  ;;  %v3254_v54 = vpop.f32.mrb[95].mxu1 }
 0x1b2   :  { %v4379_v1 = vmax.f32 %v561_v10, %v1040_v13  ;;  %v562_v63 = vmax.f32 %v505_v56, 0.0  ;;  %v1041_v18 = vmax.f32 %v984_v59, 0.0 }
 0x1b4   :  { %4622 = vst [vmem:[#allocation6_spill] sm:$0xff] %v4379_v1  ;;  %v4381_v24 = vmax.f32 %v562_v63, %v1041_v18 }
 0x1b5   :  { %v509_v33 = vpop.f32.mrb[96].mxu0  ;;  %v988_v48 = vpop.f32.mrb[96].mxu1 }
 0x1b6   :  { %4623 = vst [vmem:[#allocation7_spill] sm:$0xff] %v4381_v24  ;;  %v510_v44 = vadd.f32 %v4349_v8, %v509_v33  ;;  %v989_v55 = vadd.f32 %v4349_v8, %v988_v48  ;;  %v3141_v51 = vpop.f32.mrb[97].mxu0  ;;  %v3257_v43 = vpop.f32.mrb[97].mxu1 }
 0x1b7   :  { %v512_v30 = vpop.f32.mrb[98].mxu0  ;;  %v991_v27 = vpop.f32.mrb[98].mxu1 }
 0x1b8   :  { %v563_v14 = vmax.f32 %v510_v44, 0.0  ;;  %v1042_v0 = vmax.f32 %v989_v55, 0.0  ;;  %v3142_v53 = vpop.f32.mrb[99].mxu0  ;;  %v3258_v54 = vpop.f32.mrb[99].mxu1 }
 0x1ba   :  { %v4385_v10 = vmax.f32 %v563_v14, %v1042_v0 }
 0x1bc   :  { %4624 = vst [vmem:[#allocation8_spill] sm:$0xff] %v4385_v10 }
 0x1bd   :  { %v1324_v13 = vpop.f32.mrb[100].mxu0  ;;  %v1852_v56 = vpop.f32.mrb[100].mxu1 }
 0x1be   :  { %v1325_v59 = vadd.f32 %v4349_v8, %v1324_v13  ;;  %v1853_v63 = vadd.f32 %v4349_v8, %v1852_v56  ;;  %v3277_v18 = vpop.f32.mrb[101].mxu0  ;;  %v3393_v33 = vpop.f32.mrb[101].mxu1 }
 0x1bf   :  { %v1327_v24 = vpop.f32.mrb[102].mxu0  ;;  %v1855_v48 = vpop.f32.mrb[102].mxu1 }
 0x1c0   :  { %v1522_v51 = vmax.f32 %v1325_v59, 0.0  ;;  %v2050_v43 = vmax.f32 %v1853_v63, 0.0  ;;  %v1328_v30 = vadd.f32 %v4349_v8, %v1327_v24  ;;  %v1856_v44 = vadd.f32 %v4349_v8, %v1855_v48  ;;  %v3278_v55 = vpop.f32.mrb[103].mxu0  ;;  %v3394_v27 = vpop.f32.mrb[103].mxu1 }
 0x1c2   :  { %v1571_v14 = vmax.f32 %v3970_v17, %v1522_v51  ;;  %v1523_v0 = vmax.f32 %v1328_v30, 0.0  ;;  %v2051_v13 = vmax.f32 %v1856_v44, 0.0 }
 0x1c4   :  { %v2099_v53 = vmax.f32 %v1571_v14, %v2050_v43  ;;  %v1572_v54 = vmax.f32 %v3976_v20, %v1523_v0 }
 0x1c5   :  { %v1332_v56 = vpop.f32.mrb[104].mxu0  ;;  %v1860_v18 = vpop.f32.mrb[104].mxu1 }
 0x1c6   :  { %v2100_v33 = vmax.f32 %v1572_v54, %v2051_v13  ;;  %v1333_v10 = vadd.f32 %v4349_v8, %v1332_v56  ;;  %v1861_v59 = vadd.f32 %v4349_v8, %v1860_v18  ;;  %v3281_v63 = vpop.f32.mrb[105].mxu0  ;;  %v3397_v24 = vpop.f32.mrb[105].mxu1 }
 0x1c7   :  { %v1335_v1 = vpop.f32.mrb[106].mxu0  ;;  %v1863_v48 = vpop.f32.mrb[106].mxu1 }
 0x1c8   :  { %v2755_v55 = vpack.c.bf16 %v2100_v33, %v2099_v53  ;;  %v1524_v27 = vmax.f32 %v1333_v10, 0.0  ;;  %v2052_v16 = vmax.f32 %v1861_v59, 0.0  ;;  %v1336_v17 = vadd.f32 %v4349_v8, %v1335_v1  ;;  %v3282_v51 = vpop.f32.mrb[107].mxu0  ;;  %v3398_v43 = vpop.f32.mrb[107].mxu1 }
 0x1c9   :  { %v1864_v20 = vadd.f32 %v4349_v8, %v1863_v48 }
 0x1ca   :  { %2756 = vst [vmem:[%s4617_s3] sm:$0xff] %v2755_v55   ;;  %v1573_v30 = vmax.f32 %v3988_v37, %v1524_v27  ;;  %v1525_v44 = vmax.f32 %v1336_v17, 0.0 }
 0x1cb   :  { %v2053_v54 = vmax.f32 %v1864_v20, 0.0 }
 0x1cc   :  { %v2101_v14 = vmax.f32 %v1573_v30, %v2052_v16  ;;  %v1574_v0 = vmax.f32 %v3994_v40, %v1525_v44 }
 0x1cd   :  { %v1340_v53 = vpop.f32.mrb[108].mxu0  ;;  %v1868_v10 = vpop.f32.mrb[108].mxu1 }
 0x1ce   :  { %v2102_v13 = vmax.f32 %v1574_v0, %v2053_v54  ;;  %v1341_v1 = vadd.f32 %v4349_v8, %v1340_v53  ;;  %v1869_v56 = vadd.f32 %v4349_v8, %v1868_v10  ;;  %v3285_v18 = vpop.f32.mrb[109].mxu0  ;;  %v3401_v33 = vpop.f32.mrb[109].mxu1 }
 0x1cf   :  { %v1343_v59 = vpop.f32.mrb[110].mxu0  ;;  %v1871_v63 = vpop.f32.mrb[110].mxu1 }
 0x1d0   :  { %v2760_v24 = vpack.c.bf16 %v2102_v13, %v2101_v14  ;;  %v1526_v48 = vmax.f32 %v1341_v1, 0.0  ;;  %v2054_v55 = vmax.f32 %v1869_v56, 0.0  ;;  %v1344_v37 = vadd.f32 %v4349_v8, %v1343_v59  ;;  %v3286_v16 = vpop.f32.mrb[111].mxu0  ;;  %v3402_v27 = vpop.f32.mrb[111].mxu1 }
 0x1d1   :  { %v1872_v40 = vadd.f32 %v4349_v8, %v1871_v63 }
 0x1d2   :  { %2872 = vst [vmem:[%s4617_s3 + $0x8] sm:$0xff] %v2760_v24   ;;  %v1575_v17 = vmax.f32 %v4006_v57, %v1526_v48  ;;  %v1527_v51 = vmax.f32 %v1344_v37, 0.0 }
 0x1d3   :  { %v2055_v30 = vmax.f32 %v1872_v40, 0.0 }
 0x1d4   :  { %v2103_v43 = vmax.f32 %v1575_v17, %v2054_v55  ;;  %v1576_v20 = vmax.f32 %v4012_v60, %v1527_v51 }
 0x1d5   :  { %v1348_v44 = vpop.f32.mrb[112].mxu0  ;;  %v1876_v14 = vpop.f32.mrb[112].mxu1 }
 0x1d6   :  { %v2104_v0 = vmax.f32 %v1576_v20, %v2055_v30  ;;  %v1349_v54 = vadd.f32 %v4349_v8, %v1348_v44  ;;  %v1877_v53 = vadd.f32 %v4349_v8, %v1876_v14  ;;  %v3289_v10 = vpop.f32.mrb[113].mxu0  ;;  %v3405_v13 = vpop.f32.mrb[113].mxu1 }
 0x1d7   :  { %v1351_v1 = vpop.f32.mrb[114].mxu0  ;;  %v1879_v56 = vpop.f32.mrb[114].mxu1 }
 0x1d8   :  { %v2765_v18 = vpack.c.bf16 %v2104_v0, %v2103_v43  ;;  %v1528_v33 = vmax.f32 %v1349_v54, 0.0  ;;  %v2056_v59 = vmax.f32 %v1877_v53, 0.0  ;;  %v1352_v57 = vadd.f32 %v4349_v8, %v1351_v1  ;;  %v3290_v63 = vpop.f32.mrb[115].mxu0  ;;  %v3406_v24 = vpop.f32.mrb[115].mxu1 }
 0x1d9   :  { %v1880_v60 = vadd.f32 %v4349_v8, %v1879_v56 }
 0x1da   :  { %2873 = vst [vmem:[%s4617_s3 + $0x10] sm:$0xff] %v2765_v18   ;;  %v1577_v48 = vmax.f32 %v4024_v15, %v1528_v33  ;;  %v1529_v55 = vmax.f32 %v1352_v57, 0.0 }
 0x1db   :  { %v2057_v27 = vmax.f32 %v1880_v60, 0.0 }
 0x1dc   :  { %v2105_v37 = vmax.f32 %v1577_v48, %v2056_v59  ;;  %v1578_v16 = vmax.f32 %v4030_v19, %v1529_v55 }
 0x1dd   :  { %v1356_v40 = vpop.f32.mrb[116].mxu0  ;;  %v1884_v17 = vpop.f32.mrb[116].mxu1 }
 0x1de   :  { %v2106_v51 = vmax.f32 %v1578_v16, %v2057_v27  ;;  %v1357_v43 = vadd.f32 %v4349_v8, %v1356_v40  ;;  %v1885_v20 = vadd.f32 %v4349_v8, %v1884_v17  ;;  %v3293_v30 = vpop.f32.mrb[117].mxu0  ;;  %v3409_v44 = vpop.f32.mrb[117].mxu1 }
 0x1df   :  { %v1359_v14 = vpop.f32.mrb[118].mxu0  ;;  %v1887_v0 = vpop.f32.mrb[118].mxu1 }
 0x1e0   :  { %v2770_v54 = vpack.c.bf16 %v2106_v51, %v2105_v37  ;;  %v1530_v53 = vmax.f32 %v1357_v43, 0.0  ;;  %v2058_v10 = vmax.f32 %v1885_v20, 0.0  ;;  %v1360_v15 = vadd.f32 %v4349_v8, %v1359_v14  ;;  %v3294_v13 = vpop.f32.mrb[119].mxu0  ;;  %v3410_v1 = vpop.f32.mrb[119].mxu1 }
 0x1e1   :  { %v1888_v19 = vadd.f32 %v4349_v8, %v1887_v0 }
 0x1e2   :  { %2874 = vst [vmem:[%s4617_s3 + $0x18] sm:$0xff] %v2770_v54   ;;  %v1579_v56 = vmax.f32 %v4042_v38, %v1530_v53  ;;  %v1531_v18 = vmax.f32 %v1360_v15, 0.0 }
 0x1e3   :  { %v2059_v57 = vmax.f32 %v1888_v19, 0.0 }
 0x1e4   :  { %v2107_v33 = vmax.f32 %v1579_v56, %v2058_v10  ;;  %v1580_v59 = vmax.f32 %v4048_v42, %v1531_v18 }
 0x1e5   :  { %v1364_v63 = vpop.f32.mrb[120].mxu0  ;;  %v1892_v24 = vpop.f32.mrb[120].mxu1 }
 0x1e6   :  { %v2108_v60 = vmax.f32 %v1580_v59, %v2059_v57  ;;  %v1365_v48 = vadd.f32 %v4349_v8, %v1364_v63  ;;  %v1893_v55 = vadd.f32 %v4349_v8, %v1892_v24  ;;  %v3297_v37 = vpop.f32.mrb[121].mxu0  ;;  %v3413_v16 = vpop.f32.mrb[121].mxu1 }
 0x1e7   :  { %v1367_v27 = vpop.f32.mrb[122].mxu0  ;;  %v1895_v40 = vpop.f32.mrb[122].mxu1 }
 0x1e8   :  { %v2775_v17 = vpack.c.bf16 %v2108_v60, %v2107_v33  ;;  %v1532_v51 = vmax.f32 %v1365_v48, 0.0  ;;  %v2060_v43 = vmax.f32 %v1893_v55, 0.0  ;;  %v1368_v38 = vadd.f32 %v4349_v8, %v1367_v27  ;;  %v3298_v20 = vpop.f32.mrb[123].mxu0  ;;  %v3414_v30 = vpop.f32.mrb[123].mxu1 }
 0x1e9   :  { %v1896_v42 = vadd.f32 %v4349_v8, %v1895_v40 }
 0x1ea   :  { %2875 = vst [vmem:[%s4617_s3 + $0x20] sm:$0xff] %v2775_v17   ;;  %v1581_v44 = vmax.f32 %v4060_v61, %v1532_v51  ;;  %v1533_v14 = vmax.f32 %v1368_v38, 0.0 }
 0x1eb   :  { %v2061_v53 = vmax.f32 %v1896_v42, 0.0 }
 0x1ec   :  { %v2109_v0 = vmax.f32 %v1581_v44, %v2060_v43  ;;  %v1582_v54 = vmax.f32 %v4066_v2, %v1533_v14 }
 0x1ed   :  { %v1372_v10 = vpop.f32.mrb[124].mxu0  ;;  %v1900_v15 = vpop.f32.mrb[124].mxu1 }
 0x1ee   :  { %v2110_v13 = vmax.f32 %v1582_v54, %v2061_v53  ;;  %v1373_v1 = vadd.f32 %v4349_v8, %v1372_v10  ;;  %v1901_v19 = vadd.f32 %v4349_v8, %v1900_v15  ;;  %v3301_v56 = vpop.f32.mrb[125].mxu0  ;;  %v3417_v18 = vpop.f32.mrb[125].mxu1 }
 0x1ef   :  { %v1375_v33 = vpop.f32.mrb[126].mxu0  ;;  %v1903_v59 = vpop.f32.mrb[126].mxu1 }
 0x1f0   :  { %v2780_v57 = vpack.c.bf16 %v2110_v13, %v2109_v0  ;;  %v1534_v63 = vmax.f32 %v1373_v1, 0.0  ;;  %v2062_v24 = vmax.f32 %v1901_v19, 0.0  ;;  %v1376_v61 = vadd.f32 %v4349_v8, %v1375_v33  ;;  %v3302_v60 = vpop.f32.mrb[127].mxu0  ;;  %v3418_v48 = vpop.f32.mrb[127].mxu1 }
 0x1f1   :  { %v1904_v2 = vadd.f32 %v4349_v8, %v1903_v59 }
 0x1f2   :  { %2876 = vst [vmem:[%s4617_s3 + $0x28] sm:$0xff] %v2780_v57   ;;  %v1583_v55 = vmax.f32 %v4078_v23, %v1534_v63  ;;  %v1535_v37 = vmax.f32 %v1376_v61, 0.0 }
 0x1f3   :  { %v2063_v40 = vmax.f32 %v1904_v2, 0.0 }
 0x1f4   :  { %v2111_v16 = vmax.f32 %v1583_v55, %v2062_v24  ;;  %v1584_v27 = vmax.f32 %v4084_v26, %v1535_v37 }
 0x1f5   :  { %v1380_v17 = vpop.f32.mrb[128].mxu0  ;;  %v1908_v51 = vpop.f32.mrb[128].mxu1 }
 0x1f6   :  { %v2112_v43 = vmax.f32 %v1584_v27, %v2063_v40  ;;  %v1381_v38 = vadd.f32 %v4349_v8, %v1380_v17  ;;  %v1909_v20 = vadd.f32 %v4349_v8, %v1908_v51  ;;  %v3305_v30 = vpop.f32.mrb[129].mxu0  ;;  %v3421_v42 = vpop.f32.mrb[129].mxu1 }
 0x1f7   :  { %v1383_v44 = vpop.f32.mrb[130].mxu0  ;;  %v1911_v14 = vpop.f32.mrb[130].mxu1 }
 0x1f8   :  { %v2785_v0 = vpack.c.bf16 %v2112_v43, %v2111_v16  ;;  %v1536_v54 = vmax.f32 %v1381_v38, 0.0  ;;  %v2064_v53 = vmax.f32 %v1909_v20, 0.0  ;;  %v1384_v23 = vadd.f32 %v4349_v8, %v1383_v44  ;;  %v3306_v10 = vpop.f32.mrb[131].mxu0  ;;  %v3422_v15 = vpop.f32.mrb[131].mxu1 }
 0x1f9   :  { %v1912_v26 = vadd.f32 %v4349_v8, %v1911_v14 }
 0x1fa   :  { %2877 = vst [vmem:[%s4617_s3 + $0x30] sm:$0xff] %v2785_v0   ;;  %v1585_v13 = vmax.f32 %v4096_v47, %v1536_v54  ;;  %v1537_v1 = vmax.f32 %v1384_v23, 0.0 }
 0x1fb   :  { %v2065_v18 = vmax.f32 %v1912_v26, 0.0 }
 0x1fc   :  { %v2113_v19 = vmax.f32 %v1585_v13, %v2064_v53  ;;  %v1586_v56 = vmax.f32 %v4102_v50, %v1537_v1 }
 0x1fd   :  { %v1388_v33 = vpop.f32.mrb[132].mxu0  ;;  %v1916_v59 = vpop.f32.mrb[132].mxu1 }
 0x1fe   :  { %v2114_v57 = vmax.f32 %v1586_v56, %v2065_v18  ;;  %v1389_v63 = vadd.f32 %v4349_v8, %v1388_v33  ;;  %v1917_v24 = vadd.f32 %v4349_v8, %v1916_v59  ;;  %v3309_v61 = vpop.f32.mrb[133].mxu0  ;;  %v3425_v60 = vpop.f32.mrb[133].mxu1 }
 0x1ff   :  { %v1391_v48 = vpop.f32.mrb[134].mxu0  ;;  %v1919_v2 = vpop.f32.mrb[134].mxu1 }
 0x200   :  { %v2790_v55 = vpack.c.bf16 %v2114_v57, %v2113_v19  ;;  %v1538_v37 = vmax.f32 %v1389_v63, 0.0  ;;  %v2066_v16 = vmax.f32 %v1917_v24, 0.0  ;;  %v1392_v47 = vadd.f32 %v4349_v8, %v1391_v48  ;;  %v3310_v27 = vpop.f32.mrb[135].mxu0  ;;  %v3426_v40 = vpop.f32.mrb[135].mxu1 }
 0x201   :  { %v1920_v50 = vadd.f32 %v4349_v8, %v1919_v2 }
 0x202   :  { %2878 = vst [vmem:[%s4617_s3 + $0x38] sm:$0xff] %v2790_v55   ;;  %v1587_v17 = vmax.f32 %v4114_v9, %v1538_v37  ;;  %v1539_v51 = vmax.f32 %v1392_v47, 0.0 }
 0x203   :  { %v2067_v20 = vmax.f32 %v1920_v50, 0.0 }
 0x204   :  { %v2115_v43 = vmax.f32 %v1587_v17, %v2066_v16  ;;  %v1588_v38 = vmax.f32 %v4120_v12, %v1539_v51 }
 0x205   :  { %v1396_v30 = vpop.f32.mrb[136].mxu0  ;;  %v1924_v42 = vpop.f32.mrb[136].mxu1 }
 0x206   :  { %v2116_v44 = vmax.f32 %v1588_v38, %v2067_v20  ;;  %v1397_v14 = vadd.f32 %v4349_v8, %v1396_v30  ;;  %v1925_v0 = vadd.f32 %v4349_v8, %v1924_v42  ;;  %v3313_v54 = vpop.f32.mrb[137].mxu0  ;;  %v3429_v53 = vpop.f32.mrb[137].mxu1 }
 0x207   :  { %v1399_v23 = vpop.f32.mrb[138].mxu0  ;;  %v1927_v10 = vpop.f32.mrb[138].mxu1 }
 0x208   :  { %v2795_v15 = vpack.c.bf16 %v2116_v44, %v2115_v43  ;;  %v1540_v26 = vmax.f32 %v1397_v14, 0.0  ;;  %v2068_v13 = vmax.f32 %v1925_v0, 0.0  ;;  %v1400_v9 = vadd.f32 %v4349_v8, %v1399_v23  ;;  %v3314_v1 = vpop.f32.mrb[139].mxu0  ;;  %v3430_v19 = vpop.f32.mrb[139].mxu1 }
 0x209   :  { %v1928_v12 = vadd.f32 %v4349_v8, %v1927_v10 }
 0x20a   :  { %2879 = vst [vmem:[%s4617_s3 + $0x40] sm:$0xff] %v2795_v15   ;;  %v1589_v56 = vmax.f32 %v4132_v35, %v1540_v26  ;;  %v1541_v18 = vmax.f32 %v1400_v9, 0.0 }
 0x20b   :  { %v2069_v57 = vmax.f32 %v1928_v12, 0.0 }
 0x20c   :  { %v2117_v33 = vmax.f32 %v1589_v56, %v2068_v13  ;;  %v1590_v59 = vmax.f32 %v4138_v41, %v1541_v18 }
 0x20d   :  { %v1404_v63 = vpop.f32.mrb[140].mxu0  ;;  %v1932_v24 = vpop.f32.mrb[140].mxu1 }
 0x20e   :  { %v2118_v61 = vmax.f32 %v1590_v59, %v2069_v57  ;;  %v1405_v60 = vadd.f32 %v4349_v8, %v1404_v63  ;;  %v1933_v48 = vadd.f32 %v4349_v8, %v1932_v24  ;;  %v3317_v2 = vpop.f32.mrb[141].mxu0  ;;  %v3433_v55 = vpop.f32.mrb[141].mxu1 }
 0x20f   :  { %v1407_v37 = vpop.f32.mrb[142].mxu0  ;;  %v1935_v16 = vpop.f32.mrb[142].mxu1 }
 0x210   :  { %v2800_v47 = vpack.c.bf16 %v2118_v61, %v2117_v33  ;;  %v1542_v27 = vmax.f32 %v1405_v60, 0.0  ;;  %v2070_v40 = vmax.f32 %v1933_v48, 0.0  ;;  %v1408_v35 = vadd.f32 %v4349_v8, %v1407_v37  ;;  %v3318_v50 = vpop.f32.mrb[143].mxu0  ;;  %v3434_v17 = vpop.f32.mrb[143].mxu1 }
 0x211   :  { %v1936_v41 = vadd.f32 %v4349_v8, %v1935_v16 }
 0x212   :  { %2880 = vst [vmem:[%s4617_s3 + $0x48] sm:$0xff] %v2800_v47   ;;  %v1591_v51 = vmax.f32 %v4150_v3, %v1542_v27  ;;  %v1543_v43 = vmax.f32 %v1408_v35, 0.0 }
 0x213   :  { %v2071_v30 = vmax.f32 %v1936_v41, 0.0 }
 0x214   :  { %v2119_v38 = vmax.f32 %v1591_v51, %v2070_v40  ;;  %v1592_v20 = vmax.f32 %v4156_v6, %v1543_v43 }
 0x215   :  { %v1412_v42 = vpop.f32.mrb[144].mxu0  ;;  %v1940_v44 = vpop.f32.mrb[144].mxu1 }
 0x216   :  { %v2120_v14 = vmax.f32 %v1592_v20, %v2071_v30  ;;  %v1413_v0 = vadd.f32 %v4349_v8, %v1412_v42  ;;  %v1941_v54 = vadd.f32 %v4349_v8, %v1940_v44  ;;  %v3321_v53 = vpop.f32.mrb[145].mxu0  ;;  %v3437_v23 = vpop.f32.mrb[145].mxu1 }
 0x217   :  { %v1415_v10 = vpop.f32.mrb[146].mxu0  ;;  %v1943_v15 = vpop.f32.mrb[146].mxu1 }
 0x218   :  { %v2805_v26 = vpack.c.bf16 %v2120_v14, %v2119_v38  ;;  %v1544_v13 = vmax.f32 %v1413_v0, 0.0  ;;  %v2072_v9 = vmax.f32 %v1941_v54, 0.0  ;;  %v1416_v3 = vadd.f32 %v4349_v8, %v1415_v10  ;;  %v3322_v1 = vpop.f32.mrb[147].mxu0  ;;  %v3438_v19 = vpop.f32.mrb[147].mxu1 }
 0x219   :  { %v1944_v6 = vadd.f32 %v4349_v8, %v1943_v15 }
 0x21a   :  { %2881 = vst [vmem:[%s4617_s3 + $0x50] sm:$0xff] %v2805_v26   ;;  %v1593_v12 = vmax.f32 %v4168_v31, %v1544_v13  ;;  %v1545_v56 = vmax.f32 %v1416_v3, 0.0 }
 0x21b   :  { %v2073_v59 = vmax.f32 %v1944_v6, 0.0 }
 0x21c   :  { %v2121_v18 = vmax.f32 %v1593_v12, %v2072_v9  ;;  %v1594_v33 = vmax.f32 %v4174_v34, %v1545_v56 }
 0x21d   :  { %v1420_v57 = vpop.f32.mrb[148].mxu0  ;;  %v1948_v63 = vpop.f32.mrb[148].mxu1 }
 0x21e   :  { %v2122_v24 = vmax.f32 %v1594_v33, %v2073_v59  ;;  %v1421_v61 = vadd.f32 %v4349_v8, %v1420_v57  ;;  %v1949_v60 = vadd.f32 %v4349_v8, %v1948_v63  ;;  %v3325_v48 = vpop.f32.mrb[149].mxu0  ;;  %v3441_v2 = vpop.f32.mrb[149].mxu1 }
 0x21f   :  { %v1423_v55 = vpop.f32.mrb[150].mxu0  ;;  %v1951_v37 = vpop.f32.mrb[150].mxu1 }
 0x220   :  { %v2810_v16 = vpack.c.bf16 %v2122_v24, %v2121_v18  ;;  %v1546_v47 = vmax.f32 %v1421_v61, 0.0  ;;  %v2074_v27 = vmax.f32 %v1949_v60, 0.0  ;;  %v1424_v31 = vadd.f32 %v4349_v8, %v1423_v55  ;;  %v3326_v40 = vpop.f32.mrb[151].mxu0  ;;  %v3442_v35 = vpop.f32.mrb[151].mxu1 }
 0x221   :  { %v1952_v34 = vadd.f32 %v4349_v8, %v1951_v37 }
 0x222   :  { %2882 = vst [vmem:[%s4617_s3 + $0x58] sm:$0xff] %v2810_v16   ;;  %v1595_v50 = vmax.f32 %v4186_v62, %v1546_v47  ;;  %v1547_v17 = vmax.f32 %v1424_v31, 0.0 }
 0x223   :  { %v2075_v43 = vmax.f32 %v1952_v34, 0.0 }
 0x224   :  { %v2123_v41 = vmax.f32 %v1595_v50, %v2074_v27  ;;  %v1596_v51 = vmax.f32 %v4192_v5, %v1547_v17 }
 0x225   :  { %v1428_v38 = vpop.f32.mrb[152].mxu0  ;;  %v1956_v20 = vpop.f32.mrb[152].mxu1 }
 0x226   :  { %v2124_v30 = vmax.f32 %v1596_v51, %v2075_v43  ;;  %v1429_v42 = vadd.f32 %v4349_v8, %v1428_v38  ;;  %v1957_v44 = vadd.f32 %v4349_v8, %v1956_v20  ;;  %v3329_v14 = vpop.f32.mrb[153].mxu0  ;;  %v3445_v0 = vpop.f32.mrb[153].mxu1 }
 0x227   :  { %v1431_v54 = vpop.f32.mrb[154].mxu0  ;;  %v1959_v53 = vpop.f32.mrb[154].mxu1 }
 0x228   :  { %v2815_v23 = vpack.c.bf16 %v2124_v30, %v2123_v41  ;;  %v1548_v10 = vmax.f32 %v1429_v42, 0.0  ;;  %v2076_v15 = vmax.f32 %v1957_v44, 0.0  ;;  %v1432_v62 = vadd.f32 %v4349_v8, %v1431_v54  ;;  %v3330_v26 = vpop.f32.mrb[155].mxu0  ;;  %v3446_v13 = vpop.f32.mrb[155].mxu1 }
 0x229   :  { %v1960_v5 = vadd.f32 %v4349_v8, %v1959_v53 }
 0x22a   :  { %2883 = vst [vmem:[%s4617_s3 + $0x60] sm:$0xff] %v2815_v23   ;;  %v1597_v9 = vmax.f32 %v4204_v32, %v1548_v10  ;;  %v1549_v3 = vmax.f32 %v1432_v62, 0.0 }
 0x22b   :  { %v2077_v6 = vmax.f32 %v1960_v5, 0.0 }
 0x22c   :  { %v2125_v1 = vmax.f32 %v1597_v9, %v2076_v15  ;;  %v1598_v19 = vmax.f32 %v4210_v39, %v1549_v3 }
 0x22d   :  { %v1436_v12 = vpop.f32.mrb[156].mxu0  ;;  %v1964_v56 = vpop.f32.mrb[156].mxu1 }
 0x22e   :  { %v2126_v18 = vmax.f32 %v1598_v19, %v2077_v6  ;;  %v1437_v33 = vadd.f32 %v4349_v8, %v1436_v12  ;;  %v1965_v59 = vadd.f32 %v4349_v8, %v1964_v56  ;;  %v3333_v57 = vpop.f32.mrb[157].mxu0  ;;  %v3449_v63 = vpop.f32.mrb[157].mxu1 }
 0x22f   :  { %v1439_v24 = vpop.f32.mrb[158].mxu0  ;;  %v1967_v61 = vpop.f32.mrb[158].mxu1 }
 0x230   :  { %v2820_v60 = vpack.c.bf16 %v2126_v18, %v2125_v1  ;;  %v1550_v48 = vmax.f32 %v1437_v33, 0.0  ;;  %v2078_v2 = vmax.f32 %v1965_v59, 0.0  ;;  %v1440_v32 = vadd.f32 %v4349_v8, %v1439_v24  ;;  %v3334_v55 = vpop.f32.mrb[159].mxu0  ;;  %v3450_v37 = vpop.f32.mrb[159].mxu1 }
 0x231   :  { %v1968_v39 = vadd.f32 %v4349_v8, %v1967_v61 }
 0x232   :  { %2884 = vst [vmem:[%s4617_s3 + $0x68] sm:$0xff] %v2820_v60   ;;  %v1599_v16 = vmax.f32 %v4222_v7, %v1550_v48  ;;  %v1551_v47 = vmax.f32 %v1440_v32, 0.0 }
 0x233   :  { %v2079_v40 = vmax.f32 %v1968_v39, 0.0 }
 0x234   :  { %v2127_v27 = vmax.f32 %v1599_v16, %v2078_v2  ;;  %v1600_v31 = vmax.f32 %v4228_v11, %v1551_v47 }
 0x235   :  { %v1444_v35 = vpop.f32.mrb[160].mxu0  ;;  %v1972_v34 = vpop.f32.mrb[160].mxu1 }
 0x236   :  { %v2128_v50 = vmax.f32 %v1600_v31, %v2079_v40  ;;  %v1445_v17 = vadd.f32 %v4349_v8, %v1444_v35  ;;  %v1973_v41 = vadd.f32 %v4349_v8, %v1972_v34  ;;  %v3337_v51 = vpop.f32.mrb[161].mxu0  ;;  %v3453_v43 = vpop.f32.mrb[161].mxu1 }
 0x237   :  { %v1447_v38 = vpop.f32.mrb[162].mxu0  ;;  %v1975_v20 = vpop.f32.mrb[162].mxu1 }
 0x238   :  { %v2825_v30 = vpack.c.bf16 %v2128_v50, %v2127_v27  ;;  %v1552_v42 = vmax.f32 %v1445_v17, 0.0  ;;  %v2080_v44 = vmax.f32 %v1973_v41, 0.0  ;;  %v1448_v7 = vadd.f32 %v4349_v8, %v1447_v38  ;;  %v3338_v14 = vpop.f32.mrb[163].mxu0  ;;  %v3454_v0 = vpop.f32.mrb[163].mxu1 }
 0x239   :  { %v1976_v11 = vadd.f32 %v4349_v8, %v1975_v20 }
 0x23a   :  { %2885 = vst [vmem:[%s4617_s3 + $0x70] sm:$0xff] %v2825_v30   ;;  %v1601_v54 = vmax.f32 %v4240_v45, %v1552_v42  ;;  %v1553_v53 = vmax.f32 %v1448_v7, 0.0 }
 0x23b   :  { %v2081_v15 = vmax.f32 %v1976_v11, 0.0 }
 0x23c   :  { %v2129_v23 = vmax.f32 %v1601_v54, %v2080_v44  ;;  %v1602_v10 = vmax.f32 %v4246_v49, %v1553_v53 }
 0x23d   :  { %v1452_v62 = vpop.f32.mrb[164].mxu0  ;;  %v1980_v26 = vpop.f32.mrb[164].mxu1 }
 0x23e   :  { %v2130_v13 = vmax.f32 %v1602_v10, %v2081_v15  ;;  %v1453_v5 = vadd.f32 %v4349_v8, %v1452_v62  ;;  %v1981_v9 = vadd.f32 %v4349_v8, %v1980_v26  ;;  %v3341_v3 = vpop.f32.mrb[165].mxu0  ;;  %v3457_v1 = vpop.f32.mrb[165].mxu1 }
 0x23f   :  { %v1455_v19 = vpop.f32.mrb[166].mxu0  ;;  %v1983_v6 = vpop.f32.mrb[166].mxu1 }
 0x240   :  { %v2830_v12 = vpack.c.bf16 %v2130_v13, %v2129_v23  ;;  %v1554_v56 = vmax.f32 %v1453_v5, 0.0  ;;  %v2082_v18 = vmax.f32 %v1981_v9, 0.0  ;;  %v1456_v45 = vadd.f32 %v4349_v8, %v1455_v19  ;;  %v3342_v33 = vpop.f32.mrb[167].mxu0  ;;  %v3458_v59 = vpop.f32.mrb[167].mxu1 }
 0x241   :  { %v1984_v49 = vadd.f32 %v4349_v8, %v1983_v6 }
 0x242   :  { %2886 = vst [vmem:[%s4617_s3 + $0x78] sm:$0xff] %v2830_v12   ;;  %v1603_v57 = vmax.f32 %v4258_v21, %v1554_v56  ;;  %v1555_v63 = vmax.f32 %v1456_v45, 0.0 }
 0x243   :  { %v2083_v60 = vmax.f32 %v1984_v49, 0.0 }
 0x244   :  { %v2131_v24 = vmax.f32 %v1603_v57, %v2082_v18  ;;  %v1604_v61 = vmax.f32 %v4264_v25, %v1555_v63 }
 0x245   :  { %v1460_v48 = vpop.f32.mrb[168].mxu0  ;;  %v1988_v2 = vpop.f32.mrb[168].mxu1 }
 0x246   :  { %v2132_v32 = vmax.f32 %v1604_v61, %v2083_v60  ;;  %v1461_v55 = vadd.f32 %v4349_v8, %v1460_v48  ;;  %v1989_v37 = vadd.f32 %v4349_v8, %v1988_v2  ;;  %v3345_v39 = vpop.f32.mrb[169].mxu0  ;;  %v3461_v16 = vpop.f32.mrb[169].mxu1 }
 0x247   :  { %v1463_v47 = vpop.f32.mrb[170].mxu0  ;;  %v1991_v27 = vpop.f32.mrb[170].mxu1 }
 0x248   :  { %v2835_v31 = vpack.c.bf16 %v2132_v32, %v2131_v24  ;;  %v1556_v40 = vmax.f32 %v1461_v55, 0.0  ;;  %v2084_v35 = vmax.f32 %v1989_v37, 0.0  ;;  %v1464_v21 = vadd.f32 %v4349_v8, %v1463_v47  ;;  %v3346_v34 = vpop.f32.mrb[171].mxu0  ;;  %v3462_v50 = vpop.f32.mrb[171].mxu1 }
 0x249   :  { %v1992_v25 = vadd.f32 %v4349_v8, %v1991_v27 }
 0x24a   :  { %2887 = vst [vmem:[%s4617_s3 + $0x80] sm:$0xff] %v2835_v31   ;;  %v1605_v17 = vmax.f32 %v4276_v58, %v1556_v40  ;;  %v1557_v41 = vmax.f32 %v1464_v21, 0.0 }
 0x24b   :  { %v2085_v38 = vmax.f32 %v1992_v25, 0.0 }
 0x24c   :  { %v2133_v51 = vmax.f32 %v1605_v17, %v2084_v35  ;;  %v1606_v43 = vmax.f32 %v4282_v4, %v1557_v41 }
 0x24d   :  { %v1468_v20 = vpop.f32.mrb[172].mxu0  ;;  %v1996_v30 = vpop.f32.mrb[172].mxu1 }
 0x24e   :  { %v2134_v42 = vmax.f32 %v1606_v43, %v2085_v38  ;;  %v1469_v44 = vadd.f32 %v4349_v8, %v1468_v20  ;;  %v1997_v7 = vadd.f32 %v4349_v8, %v1996_v30  ;;  %v3349_v14 = vpop.f32.mrb[173].mxu0  ;;  %v3465_v0 = vpop.f32.mrb[173].mxu1 }
 0x24f   :  { %v1471_v11 = vpop.f32.mrb[174].mxu0  ;;  %v1999_v54 = vpop.f32.mrb[174].mxu1 }
 0x250   :  { %v2840_v53 = vpack.c.bf16 %v2134_v42, %v2133_v51  ;;  %v1558_v23 = vmax.f32 %v1469_v44, 0.0  ;;  %v2086_v10 = vmax.f32 %v1997_v7, 0.0  ;;  %v1472_v58 = vadd.f32 %v4349_v8, %v1471_v11  ;;  %v3350_v15 = vpop.f32.mrb[175].mxu0  ;;  %v3466_v62 = vpop.f32.mrb[175].mxu1 }
 0x251   :  { %v2000_v4 = vadd.f32 %v4349_v8, %v1999_v54 }
 0x252   :  { %2888 = vst [vmem:[%s4617_s3 + $0x88] sm:$0xff] %v2840_v53   ;;  %v1607_v26 = vmax.f32 %v4294_v46, %v1558_v23  ;;  %v1559_v13 = vmax.f32 %v1472_v58, 0.0 }
 0x253   :  { %v2087_v3 = vmax.f32 %v2000_v4, 0.0 }
 0x254   :  { %v2135_v5 = vmax.f32 %v1607_v26, %v2086_v10  ;;  %v1608_v9 = vmax.f32 %v4300_v52, %v1559_v13  ;;  %v4625_v26 = vld [vmem:[#allocation2_spill] sm:$0xff] }
 0x255   :  { %v1476_v1 = vpop.f32.mrb[176].mxu0  ;;  %v2004_v19 = vpop.f32.mrb[176].mxu1 }
 0x256   :  { %v2136_v6 = vmax.f32 %v1608_v9, %v2087_v3  ;;  %v1477_v12 = vadd.f32 %v4349_v8, %v1476_v1  ;;  %v2005_v56 = vadd.f32 %v4349_v8, %v2004_v19  ;;  %v3353_v18 = vpop.f32.mrb[177].mxu0  ;;  %v3469_v45 = vpop.f32.mrb[177].mxu1  ;;  %v4626_v3 = vld [vmem:[#allocation3_spill] sm:$0xff] }
 0x257   :  { %v1479_v33 = vpop.f32.mrb[178].mxu0  ;;  %v2007_v59 = vpop.f32.mrb[178].mxu1 }
 0x258   :  { %v2845_v49 = vpack.c.bf16 %v2136_v6, %v2135_v5  ;;  %v1560_v57 = vmax.f32 %v1477_v12, 0.0  ;;  %v2088_v63 = vmax.f32 %v2005_v56, 0.0  ;;  %v1480_v46 = vadd.f32 %v4349_v8, %v1479_v33  ;;  %v3354_v24 = vpop.f32.mrb[179].mxu0  ;;  %v3470_v61 = vpop.f32.mrb[179].mxu1 }
 0x259   :  { %v2008_v52 = vadd.f32 %v4349_v8, %v2007_v59 }
 0x25a   :  { %2889 = vst [vmem:[%s4617_s3 + $0x90] sm:$0xff] %v2845_v49   ;;  %v1609_v60 = vmax.f32 %v4312_v29, %v1560_v57  ;;  %v1561_v48 = vmax.f32 %v1480_v46, 0.0  ;;  %v4569_v29 = vld [vmem:[%s4616_s2] ss:$0 sm:$0xff] }
 0x25b   :  { %v2089_v55 = vmax.f32 %v2008_v52, 0.0 }
 0x25c   :  { %v2137_v2 = vmax.f32 %v1609_v60, %v2088_v63  ;;  %v1610_v32 = vmax.f32 %v4318_v36, %v1561_v48 }
 0x25d   :  { %v1484_v37 = vpop.f32.mrb[180].mxu0  ;;  %v2012_v39 = vpop.f32.mrb[180].mxu1 }
 0x25e   :  { %v2138_v16 = vmax.f32 %v1610_v32, %v2089_v55  ;;  %v1485_v47 = vadd.f32 %v4349_v8, %v1484_v37  ;;  %v2013_v27 = vadd.f32 %v4349_v8, %v2012_v39  ;;  %v3357_v31 = vpop.f32.mrb[181].mxu0  ;;  %v3473_v40 = vpop.f32.mrb[181].mxu1  ;;  %v4628_v39 = vld [vmem:[#allocation5_spill] sm:$0xff] }
 0x25f   :  { %v1487_v35 = vpop.f32.mrb[182].mxu0  ;;  %v2015_v21 = vpop.f32.mrb[182].mxu1 }
 0x260   :  { %v2850_v34 = vpack.c.bf16 %v2138_v16, %v2137_v2  ;;  %v1562_v50 = vmax.f32 %v1485_v47, 0.0  ;;  %v2090_v25 = vmax.f32 %v2013_v27, 0.0  ;;  %v1488_v36 = vadd.f32 %v4569_v29, %v1487_v35  ;;  %v3358_v17 = vpop.f32.mrb[183].mxu0  ;;  %v3474_v41 = vpop.f32.mrb[183].mxu1  ;;  %v4627_v2 = vld [vmem:[#allocation4_spill] sm:$0xff] }
 0x261   :  { %v2016_v51 = vadd.f32 %v4569_v29, %v2015_v21 }
 0x262   :  { %2890 = vst [vmem:[%s4617_s3 + $0x98] sm:$0xff] %v2850_v34   ;;  %v1611_v8 = vmax.f32 %v4330_v22, %v1562_v50  ;;  %v1563_v43 = vmax.f32 %v1488_v36, 0.0 }
 0x263   :  { %v2091_v30 = vmax.f32 %v2016_v51, 0.0 }
 0x264   :  { %v2139_v38 = vmax.f32 %v1611_v8, %v2090_v25  ;;  %v1612_v20 = vmax.f32 %v4336_v28, %v1563_v43 }
 0x265   :  { %v1492_v42 = vpop.f32.mrb[184].mxu0  ;;  %v2020_v44 = vpop.f32.mrb[184].mxu1 }
 0x266   :  { %v2140_v7 = vmax.f32 %v1612_v20, %v2091_v30  ;;  %v1493_v14 = vadd.f32 %v4569_v29, %v1492_v42  ;;  %v2021_v0 = vadd.f32 %v4569_v29, %v2020_v44  ;;  %v3361_v11 = vpop.f32.mrb[185].mxu0  ;;  %v3477_v54 = vpop.f32.mrb[185].mxu1  ;;  %v4629_v30 = vld [vmem:[#allocation6_spill] sm:$0xff] }
 0x267   :  { %v1495_v53 = vpop.f32.mrb[186].mxu0  ;;  %v2023_v23 = vpop.f32.mrb[186].mxu1 }
 0x268   :  { %v2855_v10 = vpack.c.bf16 %v2140_v7, %v2139_v38  ;;  %v1564_v58 = vmax.f32 %v1493_v14, 0.0  ;;  %v2092_v15 = vmax.f32 %v2021_v0, 0.0  ;;  %v1496_v22 = vadd.f32 %v4569_v29, %v1495_v53  ;;  %v3362_v62 = vpop.f32.mrb[187].mxu0  ;;  %v3478_v4 = vpop.f32.mrb[187].mxu1  ;;  %v4630_v14 = vld [vmem:[#allocation7_spill] sm:$0xff] }
 0x269   :  { %v2024_v28 = vadd.f32 %v4569_v29, %v2023_v23 }
 0x26a   :  { %2891 = vst [vmem:[%s4617_s3 + $0xa0] sm:$0xff] %v2855_v10   ;;  %v1613_v13 = vmax.f32 %v4625_v26, %v1564_v58  ;;  %v1565_v5 = vmax.f32 %v1496_v22, 0.0 }
 0x26b   :  { %v2093_v19 = vmax.f32 %v2024_v28, 0.0 }
 0x26c   :  { %v2141_v9 = vmax.f32 %v1613_v13, %v2092_v15  ;;  %v1614_v1 = vmax.f32 %v4626_v3, %v1565_v5  ;;  %v4631_v3 = vld [vmem:[#allocation8_spill] sm:$0xff] }
 0x26d   :  { %v1500_v6 = vpop.f32.mrb[188].mxu0  ;;  %v2028_v12 = vpop.f32.mrb[188].mxu1 }
 0x26e   :  { %v2142_v56 = vmax.f32 %v1614_v1, %v2093_v19  ;;  %v1501_v18 = vadd.f32 %v4569_v29, %v1500_v6  ;;  %v2029_v45 = vadd.f32 %v4569_v29, %v2028_v12  ;;  %v3365_v33 = vpop.f32.mrb[189].mxu0  ;;  %v3481_v59 = vpop.f32.mrb[189].mxu1 }
 0x26f   :  { %v1503_v49 = vpop.f32.mrb[190].mxu0  ;;  %v2031_v57 = vpop.f32.mrb[190].mxu1 }
 0x270   :  { %v2860_v63 = vpack.c.bf16 %v2142_v56, %v2141_v9  ;;  %v1566_v46 = vmax.f32 %v1501_v18, 0.0  ;;  %v2094_v24 = vmax.f32 %v2029_v45, 0.0  ;;  %v1504_v61 = vadd.f32 %v4569_v29, %v1503_v49  ;;  %v3366_v52 = vpop.f32.mrb[191].mxu0  ;;  %v3482_v60 = vpop.f32.mrb[191].mxu1 }
 0x271   :  { %v2032_v48 = vadd.f32 %v4569_v29, %v2031_v57 }
 0x272   :  { %2892 = vst [vmem:[%s4617_s3 + $0xa8] sm:$0xff] %v2860_v63   ;;  %v1615_v32 = vmax.f32 %v4627_v2, %v1566_v46  ;;  %v1567_v55 = vmax.f32 %v1504_v61, 0.0 }
 0x273   :  { %v2095_v47 = vmax.f32 %v2032_v48, 0.0 }
 0x274   :  { %v2143_v37 = vmax.f32 %v1615_v32, %v2094_v24  ;;  %v1616_v16 = vmax.f32 %v4628_v39, %v1567_v55 }
 0x275   :  { %v1508_v27 = vpop.f32.mrb[192].mxu0  ;;  %v2036_v31 = vpop.f32.mrb[192].mxu1 }
 0x276   :  { %v2144_v40 = vmax.f32 %v1616_v16, %v2095_v47  ;;  %v1509_v35 = vadd.f32 %v4569_v29, %v1508_v27  ;;  %v2037_v21 = vadd.f32 %v4569_v29, %v2036_v31  ;;  %v3369_v34 = vpop.f32.mrb[193].mxu0  ;;  %v3485_v50 = vpop.f32.mrb[193].mxu1 }
 0x277   :  { %v1511_v25 = vpop.f32.mrb[194].mxu0  ;;  %v2039_v36 = vpop.f32.mrb[194].mxu1 }
 0x278   :  { %v2865_v17 = vpack.c.bf16 %v2144_v40, %v2143_v37  ;;  %v1568_v41 = vmax.f32 %v1509_v35, 0.0  ;;  %v2096_v51 = vmax.f32 %v2037_v21, 0.0  ;;  %v1512_v8 = vadd.f32 %v4569_v29, %v1511_v25  ;;  %v3370_v43 = vpop.f32.mrb[195].mxu0  ;;  %v3486_v38 = vpop.f32.mrb[195].mxu1 }
 0x279   :  { %v2040_v20 = vadd.f32 %v4569_v29, %v2039_v36 }
 0x27a   :  { %2893 = vst [vmem:[%s4617_s3 + $0xb0] sm:$0xff] %v2865_v17   ;;  %v1617_v42 = vmax.f32 %v4629_v30, %v1568_v41  ;;  %v1569_v44 = vmax.f32 %v1512_v8, 0.0 }
 0x27b   :  { %v2097_v11 = vmax.f32 %v2040_v20, 0.0 }
 0x27c   :  { %v2145_v7 = vmax.f32 %v1617_v42, %v2096_v51  ;;  %v1618_v0 = vmax.f32 %v4630_v14, %v1569_v44 }
 0x27d   :  { %v1516_v54 = vpop.f32.mrb[196].mxu0  ;;  %v2044_v53 = vpop.f32.mrb[196].mxu1 }
 0x27e   :  { %v2146_v23 = vmax.f32 %v1618_v0, %v2097_v11  ;;  %v1517_v10 = vadd.f32 %v4569_v29, %v1516_v54  ;;  %v2045_v58 = vadd.f32 %v4569_v29, %v2044_v53  ;;  %v3373_v15 = vpop.f32.mrb[197].mxu0  ;;  %v3489_v22 = vpop.f32.mrb[197].mxu1 }
 0x27f   :  { %v1519_v62 = vpop.f32.mrb[198].mxu0  ;;  %v2047_v4 = vpop.f32.mrb[198].mxu1 }
 0x280   :  { %v2870_v28 = vpack.c.bf16 %v2146_v23, %v2145_v7  ;;  %v1570_v26 = vmax.f32 %v1517_v10, 0.0  ;;  %v2098_v13 = vmax.f32 %v2045_v58, 0.0  ;;  %v3374_v5 = vpop.f32.mrb[199].mxu0  ;;  %v3490_v9 = vpop.f32.mrb[199].mxu1 }
 0x282   :  { %2894 = vst [vmem:[%s4617_s3 + $0xb8] sm:$0xff] %v2870_v28   ;;  %v1619_v1 = vmax.f32 %v4631_v3, %v1570_v26 }
 0x284   :  { %v2147_v19 = vmax.f32 %v1619_v1, %v2098_v13 }
 0x286   :  { %v2751_v6 = vpack.c.bf16 %v2147_v19, %v2147_v19 }
 0x288   :  { %2393 = vst [vmem:[%s4617_s3 + $0xc0] sm:$0xf] %v2751_v6 }

// kernel: net_forward.4
= control target key start
LH: loop header
LB: loop body
LE: loop exit
PB: predicated region body
PF: predicated region fallthrough
CT: control target
= control target key end

     0   :  { %s1279_s1 = inlined_call_operand.vmem [shape: bf16[256,128], index: 1, kind: input, shape index: {}]   ;;  %s1280_s0 = inlined_call_operand.vmem [shape: bf16[4,56,256], index: 0, kind: input, shape index: {}]   ;;  %s1281_s2 = inlined_call_operand.vmem [shape: f32[1,128], index: 2, kind: input, shape index: {}]   ;;  %s1282_s3 = inlined_call_operand.vmem [shape: bf16[56,128], index: 3, kind: output, shape index: {}]  }
   0x1   :  { %v935_v0 = vld [vmem:[%s1279_s1 + $0x40] sm:$0xff]   ;;  %v937_v2 = vld [vmem:[%s1279_s1 + $0x48] sm:$0xff]   ;;  %v939_v4 = vld [vmem:[%s1279_s1 + $0x50] sm:$0xff]  }
   0x2   :  { %v936_v1 = vld [vmem:[%s1279_s1] sm:$0xff]   ;;  %775 = vmatprep.subr.bf16.mxu0 %v935_v0  ;;  %815 = vmatprep.subr.bf16.mxu1 %v935_v0  ;;  %v938_v3 = vld [vmem:[%s1279_s1 + $0x8] sm:$0xff]   ;;  %v1033_v5 = vld [vmem:[%s1279_s1 + $0x10] sm:$0xff]  }
   0x3   :  { %776 = vmatpush3.bf16.msra.mxu0 %v936_v1  ;;  %816 = vmatpush3.bf16.msra.mxu1 %v936_v1  ;;  %v1038_v6 = vld [vmem:[%s1279_s1 + $0x58] sm:$0xff]   ;;  %v1052_v8 = vld [vmem:[%s1279_s1 + $0x60] sm:$0xff]   ;;  %v1066_v10 = vld [vmem:[%s1279_s1 + $0x68] sm:$0xff]  }
   0x4   :  { %777 = vmatprep.subr.bf16.mxu0 %v937_v2  ;;  %817 = vmatprep.subr.bf16.mxu1 %v937_v2  ;;  %v1045_v7 = vld [vmem:[%s1279_s1 + $0x18] sm:$0xff]   ;;  %v1059_v9 = vld [vmem:[%s1279_s1 + $0x20] sm:$0xff]   ;;  %v1079_v13 = vld [vmem:[%s1279_s1 + $0x28] sm:$0xff]  }
   0x5   :  { %v953_v11 = vld [vmem:[%s1280_s0 + $0x4] ss:$8 sps:$4 sm:$0xff]   ;;  %v1086_v14 = vld [vmem:[%s1279_s1 + $0x70] sm:$0xff]   ;;  %v1100_v16 = vld [vmem:[%s1279_s1 + $0x78] sm:$0xff]  }
   0x6   :  { %v956_v12 = vld [vmem:[%s1280_s0 + $0x3c] ss:$8 sps:$4 sm:$0xff]   ;;  %226 = vmatprep.mubr.bf16.mxu0 %v953_v11  ;;  %v1093_v15 = vld [vmem:[%s1279_s1 + $0x30] sm:$0xff]   ;;  %v951_v18 = vld [vmem:[%s1280_s0] ss:$8 sps:$4 sm:$0xff]  }
   0x7   :  { %778 = vmatpush3.bf16.msra.mxu0 %v938_v3  ;;  %818 = vmatpush3.bf16.msra.mxu1 %v938_v3  ;;  %v1107_v17 = vld [vmem:[%s1279_s1 + $0x38] sm:$0xff]   ;;  %v959_v21 = vld [vmem:[%s1280_s0 + $0x4c] ss:$8 sps:$4 sm:$0xff]   ;;  %v962_v23 = vld [vmem:[%s1280_s0 + $0x48] ss:$8 sps:$4 sm:$0xff]  }
   0x8   :  { %779 = vmatprep.subr.bf16.mxu0 %v939_v4  ;;  %819 = vmatprep.subr.bf16.mxu1 %v939_v4  ;;  %v954_v19 = vld [vmem:[%s1280_s0 + $0x38] ss:$8 sps:$4 sm:$0xff]   ;;  %v957_v20 = vld [vmem:[%s1280_s0 + $0x14] ss:$8 sps:$4 sm:$0xff]   ;;  %v963_v24 = vld [vmem:[%s1280_s0 + $0x24] ss:$8 sps:$4 sm:$0xff]  }
   0x9   :  { %342 = vmatprep.mubr.bf16.mxu1 %v956_v12  ;;  %v961_v22 = vld [vmem:[%s1280_s0 + $0x10] ss:$8 sps:$4 sm:$0xff]   ;;  %v965_v25 = vld [vmem:[%s1280_s0 + $0x5c] ss:$8 sps:$4 sm:$0xff]   ;;  %v967_v26 = vld [vmem:[%s1280_s0 + $0x20] ss:$8 sps:$4 sm:$0xff]  }
   0xa   :  { %v968_v27 = vld [vmem:[%s1280_s0 + $0x58] ss:$8 sps:$4 sm:$0xff]   ;;  %v54_v28 = vld [vmem:[%s1280_s0 + $0x30] sm:$0xff]  ;;  %v705_v29 = vld [vmem:[%s1280_s0 + $0x68] sm:$0xff] }
   0xb   :  { %780 = vmatpush3.bf16.msra.mxu0 %v1033_v5  ;;  %820 = vmatpush3.bf16.msra.mxu1 %v1033_v5  ;;  %v682_v30 = vcombine.high %v54_v28, %v54_v28  ;;  %v713_v31 = vcombine.high %v705_v29, %v705_v29  ;;  %v681_v32 = vcombine.low %v54_v28, %v54_v28  ;;  %v975_v34 = vld [vmem:[%s1280_s0 + $0x74] ss:$8 sps:$4 sm:$0xff]   ;;  %v973_v36 = vld [vmem:[%s1280_s0 + $0x70] ss:$8 sps:$4 sm:$0xff]   ;;  %v979_v38 = vld [vmem:[%s1280_s0 + $0x84] ss:$8 sps:$4 sm:$0xff]  }
   0xc   :  { %781 = vmatprep.subr.bf16.mxu0 %v1038_v6  ;;  %821 = vmatprep.subr.bf16.mxu1 %v1038_v6  ;;  %v712_v33 = vcombine.low %v705_v29, %v705_v29  ;;  %v978_v35 = vld [vmem:[%s1280_s0 + $0xac] ss:$8 sps:$4 sm:$0xff]   ;;  %v976_v37 = vld [vmem:[%s1280_s0 + $0xa8] ss:$8 sps:$4 sm:$0xff]   ;;  %v981_v39 = vld [vmem:[%s1280_s0 + $0xbc] ss:$8 sps:$4 sm:$0xff]  }
   0xd   :  { %v983_v40 = vld [vmem:[%s1280_s0 + $0x80] ss:$8 sps:$4 sm:$0xff]   ;;  %v985_v42 = vld [vmem:[%s1280_s0 + $0x94] ss:$8 sps:$4 sm:$0xff]   ;;  %v989_v46 = vld [vmem:[%s1280_s0 + $0x90] ss:$8 sps:$4 sm:$0xff]  }
   0xe   :  { %v984_v41 = vld [vmem:[%s1280_s0 + $0xb8] ss:$8 sps:$4 sm:$0xff]   ;;  %v987_v43 = vld [vmem:[%s1280_s0 + $0xcc] ss:$8 sps:$4 sm:$0xff]   ;;  %v990_v47 = vld [vmem:[%s1280_s0 + $0xc8] ss:$8 sps:$4 sm:$0xff]  }
   0xf   :  { %782 = vmatpush3.bf16.msra.mxu0 %v1045_v7  ;;  %822 = vmatpush3.bf16.msra.mxu1 %v1045_v7  ;;  %v720_v44 = vld [vmem:[%s1280_s0 + $0xa0] sm:$0xff]  ;;  %v735_v45 = vld [vmem:[%s1280_s0 + $0xd8] sm:$0xff] }
  0x10   :  { %783 = vmatprep.subr.bf16.mxu0 %v1052_v8  ;;  %823 = vmatprep.subr.bf16.mxu1 %v1052_v8  ;;  %v728_v48 = vcombine.high %v720_v44, %v720_v44  ;;  %v743_v49 = vcombine.high %v735_v45, %v735_v45  ;;  %v727_v50 = vcombine.low %v720_v44, %v720_v44  ;;  %v1216_v54 = vld [vmem:[%s1281_s2] ss:$0 sm:$0xff] }
  0x11   :  { %v742_v51 = vcombine.low %v735_v45, %v735_v45 }
  0x13   :  { %784 = vmatpush3.bf16.msra.mxu0 %v1059_v9  ;;  %824 = vmatpush3.bf16.msra.mxu1 %v1059_v9 }
  0x14   :  { %785 = vmatprep.subr.bf16.mxu0 %v1066_v10  ;;  %825 = vmatprep.subr.bf16.mxu1 %v1066_v10 }
  0x17   :  { %786 = vmatpush3.bf16.msra.mxu0 %v1079_v13  ;;  %826 = vmatpush3.bf16.msra.mxu1 %v1079_v13 }
  0x18   :  { %787 = vmatprep.subr.bf16.mxu0 %v1086_v14  ;;  %827 = vmatprep.subr.bf16.mxu1 %v1086_v14 }
  0x1b   :  { %788 = vmatpush3.bf16.msra.mxu0 %v1093_v15  ;;  %828 = vmatpush3.bf16.msra.mxu1 %v1093_v15 }
  0x1c   :  { %789 = vmatprep.subr.bf16.mxu0 %v1100_v16  ;;  %829 = vmatprep.subr.bf16.mxu1 %v1100_v16 }
  0x1f   :  { %790 = vmatpush3.bf16.msra.mxu0 %v1107_v17  ;;  %830 = vmatpush3.bf16.msra.mxu1 %v1107_v17 }
  0x20   :  { %855 = vmatprep.subr.bf16.mxu0 %v935_v0  ;;  %895 = vmatprep.subr.bf16.mxu1 %v935_v0 }
  0x22   :  { %227 = vmatmul.mubr.bf16.vlgmr.msra.gmra.mrb[0].mxu0 %v951_v18  ;;  %343 = vmatmul.mubr.bf16.vlgmr.msra.gmra.mrb[0].mxu1 %v954_v19 }
  0x23   :  { %856 = vmatpush3.bf16.msra.mxu0 %v936_v1  ;;  %896 = vmatpush3.bf16.msra.mxu1 %v936_v1 }
  0x24   :  { %857 = vmatprep.subr.bf16.mxu0 %v937_v2  ;;  %897 = vmatprep.subr.bf16.mxu1 %v937_v2 }
  0x25   :  { %234 = vmatprep.mubr.bf16.mxu0 %v957_v20  ;;  %350 = vmatprep.mubr.bf16.mxu1 %v959_v21 }
  0x27   :  { %858 = vmatpush3.bf16.msra.mxu0 %v938_v3  ;;  %898 = vmatpush3.bf16.msra.mxu1 %v938_v3 }
  0x28   :  { %859 = vmatprep.subr.bf16.mxu0 %v939_v4  ;;  %899 = vmatprep.subr.bf16.mxu1 %v939_v4 }
  0x2a   :  { %235 = vmatmul.mubr.bf16.gmra.mrb[4].mxu0 %v961_v22  ;;  %351 = vmatmul.mubr.bf16.gmra.mrb[4].mxu1 %v962_v23 }
  0x2b   :  { %860 = vmatpush3.bf16.msra.mxu0 %v1033_v5  ;;  %900 = vmatpush3.bf16.msra.mxu1 %v1033_v5 }
  0x2c   :  { %861 = vmatprep.subr.bf16.mxu0 %v1038_v6  ;;  %901 = vmatprep.subr.bf16.mxu1 %v1038_v6 }
  0x2d   :  { %242 = vmatprep.mubr.bf16.mxu0 %v963_v24  ;;  %358 = vmatprep.mubr.bf16.mxu1 %v965_v25 }
  0x2f   :  { %862 = vmatpush3.bf16.msra.mxu0 %v1045_v7  ;;  %902 = vmatpush3.bf16.msra.mxu1 %v1045_v7 }
  0x30   :  { %863 = vmatprep.subr.bf16.mxu0 %v1052_v8  ;;  %903 = vmatprep.subr.bf16.mxu1 %v1052_v8 }
  0x32   :  { %243 = vmatmul.mubr.bf16.gmra.mrb[8].mxu0 %v967_v26  ;;  %359 = vmatmul.mubr.bf16.gmra.mrb[8].mxu1 %v968_v27 }
  0x33   :  { %864 = vmatpush3.bf16.msra.mxu0 %v1059_v9  ;;  %904 = vmatpush3.bf16.msra.mxu1 %v1059_v9 }
  0x34   :  { %865 = vmatprep.subr.bf16.mxu0 %v1066_v10  ;;  %905 = vmatprep.subr.bf16.mxu1 %v1066_v10 }
  0x35   :  { %250 = vmatprep.mubr.bf16.mxu0 %v682_v30  ;;  %366 = vmatprep.mubr.bf16.mxu1 %v713_v31 }
  0x37   :  { %866 = vmatpush3.bf16.msra.mxu0 %v1079_v13  ;;  %906 = vmatpush3.bf16.msra.mxu1 %v1079_v13 }
  0x38   :  { %867 = vmatprep.subr.bf16.mxu0 %v1086_v14  ;;  %907 = vmatprep.subr.bf16.mxu1 %v1086_v14 }
  0x3a   :  { %251 = vmatmul.mubr.bf16.gmra.mrb[12].mxu0 %v681_v32  ;;  %367 = vmatmul.mubr.bf16.gmra.mrb[12].mxu1 %v712_v33 }
  0x3b   :  { %868 = vmatpush3.bf16.msra.mxu0 %v1093_v15  ;;  %908 = vmatpush3.bf16.msra.mxu1 %v1093_v15 }
  0x3c   :  { %869 = vmatprep.subr.bf16.mxu0 %v1100_v16  ;;  %909 = vmatprep.subr.bf16.mxu1 %v1100_v16 }
  0x3d   :  { %465 = vmatprep.mubr.bf16.mxu0 %v975_v34  ;;  %588 = vmatprep.mubr.bf16.mxu1 %v978_v35 }
  0x3f   :  { %870 = vmatpush3.bf16.msra.mxu0 %v1107_v17  ;;  %910 = vmatpush3.bf16.msra.mxu1 %v1107_v17 }
  0x42   :  { %466 = vmatmul.mubr.bf16.vlgmr.msra.gmra.mrb[16].mxu0 %v973_v36  ;;  %589 = vmatmul.mubr.bf16.vlgmr.msra.gmra.mrb[16].mxu1 %v976_v37 }
  0x43   :  { %473 = vmatprep.mubr.bf16.mxu0 %v979_v38  ;;  %596 = vmatprep.mubr.bf16.mxu1 %v981_v39 }
  0x4a   :  { %474 = vmatmul.mubr.bf16.gmra.mrb[20].mxu0 %v983_v40  ;;  %597 = vmatmul.mubr.bf16.gmra.mrb[20].mxu1 %v984_v41 }
  0x4b   :  { %481 = vmatprep.mubr.bf16.mxu0 %v985_v42  ;;  %604 = vmatprep.mubr.bf16.mxu1 %v987_v43 }
  0x52   :  { %482 = vmatmul.mubr.bf16.gmra.mrb[24].mxu0 %v989_v46  ;;  %605 = vmatmul.mubr.bf16.gmra.mrb[24].mxu1 %v990_v47 }
  0x53   :  { %489 = vmatprep.mubr.bf16.mxu0 %v728_v48  ;;  %612 = vmatprep.mubr.bf16.mxu1 %v743_v49 }
  0x5a   :  { %490 = vmatmul.mubr.bf16.gmra.mrb[28].mxu0 %v727_v50  ;;  %613 = vmatmul.mubr.bf16.gmra.mrb[28].mxu1 %v742_v51 }
  0xf5   :  { %v791_v52 = vpop.f32.mrb[0].mxu0  ;;  %v831_v53 = vpop.f32.mrb[0].mxu1 }
  0xf6   :  { %v792_v55 = vpop.f32.mrb[1].mxu0  ;;  %v832_v56 = vpop.f32.mrb[1].mxu1 }
  0xf7   :  { %v793_v57 = vadd.f32 %v792_v55, %v791_v52  ;;  %v833_v58 = vadd.f32 %v832_v56, %v831_v53  ;;  %v794_v59 = vpop.f32.mrb[2].mxu0  ;;  %v834_v60 = vpop.f32.mrb[2].mxu1 }
  0xf8   :  { %v795_v61 = vpop.f32.mrb[3].mxu0  ;;  %v835_v62 = vpop.f32.mrb[3].mxu1 }
  0xf9   :  { %v229_v63 = vadd.f32 %v793_v57, %v1216_v54  ;;  %v345_v0 = vadd.f32 %v833_v58, %v1216_v54  ;;  %v796_v1 = vadd.f32 %v795_v61, %v794_v59  ;;  %v836_v2 = vadd.f32 %v835_v62, %v834_v60 }
  0xfb   :  { %v258_v3 = vmax.f32 %v229_v63, 0.0  ;;  %v374_v4 = vmax.f32 %v345_v0, 0.0  ;;  %v232_v5 = vadd.f32 %v796_v1, %v1216_v54  ;;  %v348_v6 = vadd.f32 %v836_v2, %v1216_v54 }
  0xfd   :  { %v1222_v7 = vmax.f32 %v258_v3, %v374_v4  ;;  %v259_v8 = vmax.f32 %v232_v5, 0.0  ;;  %v375_v9 = vmax.f32 %v348_v6, 0.0  ;;  %v797_v10 = vpop.f32.mrb[4].mxu0  ;;  %v837_v11 = vpop.f32.mrb[4].mxu1 }
  0xfe   :  { %v798_v12 = vpop.f32.mrb[5].mxu0  ;;  %v838_v13 = vpop.f32.mrb[5].mxu1 }
  0xff   :  { %v1224_v14 = vmax.f32 %v259_v8, %v375_v9  ;;  %v799_v15 = vadd.f32 %v798_v12, %v797_v10  ;;  %v839_v16 = vadd.f32 %v838_v13, %v837_v11  ;;  %v800_v17 = vpop.f32.mrb[6].mxu0  ;;  %v840_v18 = vpop.f32.mrb[6].mxu1 }
 0x100   :  { %v801_v19 = vpop.f32.mrb[7].mxu0  ;;  %v841_v20 = vpop.f32.mrb[7].mxu1 }
 0x101   :  { %v237_v21 = vadd.f32 %v799_v15, %v1216_v54  ;;  %v353_v22 = vadd.f32 %v839_v16, %v1216_v54  ;;  %v802_v23 = vadd.f32 %v801_v19, %v800_v17  ;;  %v842_v24 = vadd.f32 %v841_v20, %v840_v18 }
 0x103   :  { %v260_v25 = vmax.f32 %v237_v21, 0.0  ;;  %v376_v26 = vmax.f32 %v353_v22, 0.0  ;;  %v240_v27 = vadd.f32 %v802_v23, %v1216_v54  ;;  %v356_v28 = vadd.f32 %v842_v24, %v1216_v54 }
 0x105   :  { %v1230_v29 = vmax.f32 %v260_v25, %v376_v26  ;;  %v261_v30 = vmax.f32 %v240_v27, 0.0  ;;  %v377_v31 = vmax.f32 %v356_v28, 0.0  ;;  %v803_v32 = vpop.f32.mrb[8].mxu0  ;;  %v843_v33 = vpop.f32.mrb[8].mxu1 }
 0x106   :  { %v804_v34 = vpop.f32.mrb[9].mxu0  ;;  %v844_v35 = vpop.f32.mrb[9].mxu1 }
 0x107   :  { %v1232_v36 = vmax.f32 %v261_v30, %v377_v31  ;;  %v805_v37 = vadd.f32 %v804_v34, %v803_v32  ;;  %v845_v38 = vadd.f32 %v844_v35, %v843_v33  ;;  %v806_v39 = vpop.f32.mrb[10].mxu0  ;;  %v846_v40 = vpop.f32.mrb[10].mxu1 }
 0x108   :  { %v807_v41 = vpop.f32.mrb[11].mxu0  ;;  %v847_v42 = vpop.f32.mrb[11].mxu1 }
 0x109   :  { %v245_v43 = vadd.f32 %v805_v37, %v1216_v54  ;;  %v361_v44 = vadd.f32 %v845_v38, %v1216_v54  ;;  %v808_v45 = vadd.f32 %v807_v41, %v806_v39  ;;  %v848_v46 = vadd.f32 %v847_v42, %v846_v40 }
 0x10b   :  { %v262_v47 = vmax.f32 %v245_v43, 0.0  ;;  %v378_v48 = vmax.f32 %v361_v44, 0.0  ;;  %v248_v49 = vadd.f32 %v808_v45, %v1216_v54  ;;  %v364_v50 = vadd.f32 %v848_v46, %v1216_v54 }
 0x10d   :  { %v1238_v51 = vmax.f32 %v262_v47, %v378_v48  ;;  %v263_v52 = vmax.f32 %v248_v49, 0.0  ;;  %v379_v53 = vmax.f32 %v364_v50, 0.0  ;;  %v809_v55 = vpop.f32.mrb[12].mxu0  ;;  %v849_v56 = vpop.f32.mrb[12].mxu1 }
 0x10e   :  { %v810_v57 = vpop.f32.mrb[13].mxu0  ;;  %v850_v58 = vpop.f32.mrb[13].mxu1 }
 0x10f   :  { %v1240_v59 = vmax.f32 %v263_v52, %v379_v53  ;;  %v811_v60 = vadd.f32 %v810_v57, %v809_v55  ;;  %v851_v61 = vadd.f32 %v850_v58, %v849_v56  ;;  %v812_v62 = vpop.f32.mrb[14].mxu0  ;;  %v852_v63 = vpop.f32.mrb[14].mxu1 }
 0x110   :  { %v813_v0 = vpop.f32.mrb[15].mxu0  ;;  %v853_v1 = vpop.f32.mrb[15].mxu1 }
 0x111   :  { %v253_v2 = vadd.f32 %v811_v60, %v1216_v54  ;;  %v369_v3 = vadd.f32 %v851_v61, %v1216_v54 }
 0x113   :  { %v264_v4 = vmax.f32 %v253_v2, 0.0  ;;  %v380_v5 = vmax.f32 %v369_v3, 0.0 }
 0x115   :  { %v1244_v6 = vmax.f32 %v264_v4, %v380_v5  ;;  %v871_v8 = vpop.f32.mrb[16].mxu0  ;;  %v911_v9 = vpop.f32.mrb[16].mxu1 }
 0x116   :  { %v872_v10 = vpop.f32.mrb[17].mxu0  ;;  %v912_v11 = vpop.f32.mrb[17].mxu1 }
 0x117   :  { %v873_v12 = vadd.f32 %v872_v10, %v871_v8  ;;  %v913_v13 = vadd.f32 %v912_v11, %v911_v9  ;;  %v874_v15 = vpop.f32.mrb[18].mxu0  ;;  %v914_v16 = vpop.f32.mrb[18].mxu1 }
 0x118   :  { %v875_v17 = vpop.f32.mrb[19].mxu0  ;;  %v915_v18 = vpop.f32.mrb[19].mxu1 }
 0x119   :  { %v468_v19 = vadd.f32 %v873_v12, %v1216_v54  ;;  %v591_v20 = vadd.f32 %v913_v13, %v1216_v54  ;;  %v876_v21 = vadd.f32 %v875_v17, %v874_v15  ;;  %v916_v22 = vadd.f32 %v915_v18, %v914_v16 }
 0x11b   :  { %v497_v23 = vmax.f32 %v468_v19, 0.0  ;;  %v620_v24 = vmax.f32 %v591_v20, 0.0  ;;  %v471_v25 = vadd.f32 %v876_v21, %v1216_v54  ;;  %v594_v26 = vadd.f32 %v916_v22, %v1216_v54 }
 0x11d   :  { %v504_v27 = vmax.f32 %v1222_v7, %v497_v23  ;;  %v498_v28 = vmax.f32 %v471_v25, 0.0  ;;  %v877_v30 = vpop.f32.mrb[20].mxu0  ;;  %v917_v31 = vpop.f32.mrb[20].mxu1  ;;  %v621_v32 = vmax.f32 %v594_v26, 0.0 }
 0x11e   :  { %v878_v33 = vpop.f32.mrb[21].mxu0  ;;  %v918_v34 = vpop.f32.mrb[21].mxu1 }
 0x11f   :  { %v627_v35 = vmax.f32 %v504_v27, %v620_v24  ;;  %v505_v37 = vmax.f32 %v1224_v14, %v498_v28  ;;  %v879_v38 = vadd.f32 %v878_v33, %v877_v30  ;;  %v919_v39 = vadd.f32 %v918_v34, %v917_v31  ;;  %v880_v40 = vpop.f32.mrb[22].mxu0  ;;  %v920_v41 = vpop.f32.mrb[22].mxu1 }
 0x120   :  { %v881_v42 = vpop.f32.mrb[23].mxu0  ;;  %v921_v43 = vpop.f32.mrb[23].mxu1 }
 0x121   :  { %v628_v44 = vmax.f32 %v505_v37, %v621_v32  ;;  %v476_v45 = vadd.f32 %v879_v38, %v1216_v54  ;;  %v599_v7 = vadd.f32 %v919_v39, %v1216_v54  ;;  %v882_v46 = vadd.f32 %v881_v42, %v880_v40 }
 0x122   :  { %v922_v47 = vadd.f32 %v921_v43, %v920_v41 }
 0x123   :  { %v761_v48 = vpack.c.bf16 %v628_v44, %v627_v35  ;;  %v499_v49 = vmax.f32 %v476_v45, 0.0  ;;  %v622_v50 = vmax.f32 %v599_v7, 0.0  ;;  %v479_v52 = vadd.f32 %v882_v46, %v1216_v54 }
 0x124   :  { %v602_v14 = vadd.f32 %v922_v47, %v1216_v54 }
 0x125   :  { %762 = vst [vmem:[%s1282_s3] sm:$0xff] %v761_v48   ;;  %v506_v53 = vmax.f32 %v1230_v29, %v499_v49  ;;  %v500_v55 = vmax.f32 %v479_v52, 0.0  ;;  %v883_v56 = vpop.f32.mrb[24].mxu0  ;;  %v923_v57 = vpop.f32.mrb[24].mxu1 }
 0x126   :  { %v623_v58 = vmax.f32 %v602_v14, 0.0  ;;  %v884_v60 = vpop.f32.mrb[25].mxu0  ;;  %v924_v61 = vpop.f32.mrb[25].mxu1 }
 0x127   :  { %v629_v62 = vmax.f32 %v506_v53, %v622_v50  ;;  %v507_v63 = vmax.f32 %v1232_v36, %v500_v55  ;;  %v885_v0 = vadd.f32 %v884_v60, %v883_v56  ;;  %v925_v1 = vadd.f32 %v924_v61, %v923_v57  ;;  %v886_v2 = vpop.f32.mrb[26].mxu0  ;;  %v926_v3 = vpop.f32.mrb[26].mxu1 }
 0x128   :  { %v887_v4 = vpop.f32.mrb[27].mxu0  ;;  %v927_v5 = vpop.f32.mrb[27].mxu1 }
 0x129   :  { %v630_v8 = vmax.f32 %v507_v63, %v623_v58  ;;  %v484_v9 = vadd.f32 %v885_v0, %v1216_v54  ;;  %v607_v29 = vadd.f32 %v925_v1, %v1216_v54  ;;  %v888_v10 = vadd.f32 %v887_v4, %v886_v2 }
 0x12a   :  { %v928_v11 = vadd.f32 %v927_v5, %v926_v3 }
 0x12b   :  { %v766_v12 = vpack.c.bf16 %v630_v8, %v629_v62  ;;  %v501_v13 = vmax.f32 %v484_v9, 0.0  ;;  %v624_v15 = vmax.f32 %v607_v29, 0.0  ;;  %v487_v16 = vadd.f32 %v888_v10, %v1216_v54 }
 0x12c   :  { %v610_v36 = vadd.f32 %v928_v11, %v1216_v54 }
 0x12d   :  { %773 = vst [vmem:[%s1282_s3 + $0x8] sm:$0xff] %v766_v12   ;;  %v508_v17 = vmax.f32 %v1238_v51, %v501_v13  ;;  %v502_v18 = vmax.f32 %v487_v16, 0.0  ;;  %v889_v19 = vpop.f32.mrb[28].mxu0  ;;  %v929_v20 = vpop.f32.mrb[28].mxu1 }
 0x12e   :  { %v625_v21 = vmax.f32 %v610_v36, 0.0  ;;  %v890_v22 = vpop.f32.mrb[29].mxu0  ;;  %v930_v23 = vpop.f32.mrb[29].mxu1 }
 0x12f   :  { %v631_v24 = vmax.f32 %v508_v17, %v624_v15  ;;  %v509_v25 = vmax.f32 %v1240_v59, %v502_v18  ;;  %v891_v26 = vadd.f32 %v890_v22, %v889_v19  ;;  %v931_v27 = vadd.f32 %v930_v23, %v929_v20  ;;  %v892_v28 = vpop.f32.mrb[30].mxu0  ;;  %v932_v30 = vpop.f32.mrb[30].mxu1 }
 0x130   :  { %v893_v31 = vpop.f32.mrb[31].mxu0  ;;  %v933_v32 = vpop.f32.mrb[31].mxu1 }
 0x131   :  { %v632_v33 = vmax.f32 %v509_v25, %v625_v21  ;;  %v492_v34 = vadd.f32 %v891_v26, %v1216_v54  ;;  %v615_v51 = vadd.f32 %v931_v27, %v1216_v54 }
 0x133   :  { %v771_v35 = vpack.c.bf16 %v632_v33, %v631_v24  ;;  %v503_v37 = vmax.f32 %v492_v34, 0.0  ;;  %v626_v38 = vmax.f32 %v615_v51, 0.0 }
 0x135   :  { %774 = vst [vmem:[%s1282_s3 + $0x10] sm:$0xff] %v771_v35   ;;  %v510_v59 = vmax.f32 %v1244_v6, %v503_v37 }
 0x137   :  { %v633_v39 = vmax.f32 %v510_v59, %v626_v38 }
 0x139   :  { %v757_v40 = vpack.c.bf16 %v633_v39, %v633_v39 }
 0x13b   :  { %669 = vst [vmem:[%s1282_s3 + $0x18] sm:$0xf] %v757_v40 }

// kernel: net_forward.5
= control target key start
LH: loop header
LB: loop body
LE: loop exit
PB: predicated region body
PF: predicated region fallthrough
CT: control target
= control target key end

     0   :  { %vm3325_vm0 = vmmov 0   ;;  %s4095_s1 = inlined_call_operand.vmem [shape: bf16[3200,128], index: 1, kind: input, shape index: {}]   ;;  %s4096_s0 = inlined_call_operand.vmem [shape: bf16[8,3200], index: 0, kind: input, shape index: {}]   ;;  %s4097_s2 = inlined_call_operand.vmem [shape: f32[1,128], index: 2, kind: input, shape index: {}]   ;;  %s4098_s3 = inlined_call_operand.vmem [shape: bf16[128,128], index: 3, kind: input, shape index: {}]   ;;  %s4099_s5 = inlined_call_operand.vmem [shape: bf16[128,128], index: 5, kind: input, shape index: {}]   ;;  %s4100_s4 = inlined_call_operand.vmem [shape: f32[1,128], index: 4, kind: input, shape index: {}]   ;;  %s4101_s6 = inlined_call_operand.vmem [shape: f32[1,128], index: 6, kind: input, shape index: {}]   ;;  %s4102_s7 = inlined_call_operand.vmem [shape: f32[8,128], index: 7, kind: output, shape index: {}]  }
   0x1   :  { %v3083_v0 = vld [vmem:[%s4095_s1 + $0x40] sm:$0xff]   ;;  %v3087_v4 = vld [vmem:[%s4095_s1 + $0x48] sm:$0xff]   ;;  %v3091_v8 = vld [vmem:[%s4095_s1 + $0x50] sm:$0xff]  }
   0x2   :  { %v3084_v1 = vld [vmem:[%s4095_s1] sm:$0xff]   ;;  %2730 = vmatprep.subr.bf16.mxu0 %v3083_v0  ;;  %v3088_v5 = vld [vmem:[%s4095_s1 + $0x8] sm:$0xff]   ;;  %v3092_v9 = vld [vmem:[%s4095_s1 + $0x10] sm:$0xff]  }
   0x3   :  { %v3085_v2 = vld [vmem:[%s4095_s1 + $0xc0] sm:$0xff]   ;;  %2731 = vmatpush3.bf16.msra.mxu0 %v3084_v1  ;;  %v3089_v6 = vld [vmem:[%s4095_s1 + $0xc8] sm:$0xff]   ;;  %v3093_v10 = vld [vmem:[%s4095_s1 + $0xd0] sm:$0xff]  }
   0x4   :  { %v3086_v3 = vld [vmem:[%s4095_s1 + $0x80] sm:$0xff]   ;;  %2752 = vmatprep.subr.bf16.mxu1 %v3085_v2  ;;  %2732 = vmatprep.subr.bf16.mxu0 %v3087_v4  ;;  %v3090_v7 = vld [vmem:[%s4095_s1 + $0x88] sm:$0xff]   ;;  %v3094_v11 = vld [vmem:[%s4095_s1 + $0x90] sm:$0xff]  }
   0x5   :  { %2753 = vmatpush3.bf16.msra.mxu1 %v3086_v3  ;;  %v3095_v12 = vld [vmem:[%s4095_s1 + $0x58] sm:$0xff]   ;;  %v3099_v16 = vld [vmem:[%s4095_s1 + $0x60] sm:$0xff]   ;;  %v3103_v20 = vld [vmem:[%s4095_s1 + $0x68] sm:$0xff]  }
   0x6   :  { %2754 = vmatprep.subr.bf16.mxu1 %v3089_v6  ;;  %v3096_v13 = vld [vmem:[%s4095_s1 + $0x18] sm:$0xff]   ;;  %v3100_v17 = vld [vmem:[%s4095_s1 + $0x20] sm:$0xff]   ;;  %v3104_v21 = vld [vmem:[%s4095_s1 + $0x28] sm:$0xff]  }
   0x7   :  { %2733 = vmatpush3.bf16.msra.mxu0 %v3088_v5  ;;  %v3097_v14 = vld [vmem:[%s4095_s1 + $0xd8] sm:$0xff]   ;;  %v3101_v18 = vld [vmem:[%s4095_s1 + $0xe0] sm:$0xff]   ;;  %v3105_v22 = vld [vmem:[%s4095_s1 + $0xe8] sm:$0xff]  }
   0x8   :  { %2734 = vmatprep.subr.bf16.mxu0 %v3091_v8  ;;  %v3098_v15 = vld [vmem:[%s4095_s1 + $0x98] sm:$0xff]   ;;  %v3102_v19 = vld [vmem:[%s4095_s1 + $0xa0] sm:$0xff]   ;;  %v3106_v23 = vld [vmem:[%s4095_s1 + $0xa8] sm:$0xff]  }
   0x9   :  { %2755 = vmatpush3.bf16.msra.mxu1 %v3090_v7  ;;  %v3107_v24 = vld [vmem:[%s4095_s1 + $0x70] sm:$0xff]   ;;  %v3111_v28 = vld [vmem:[%s4095_s1 + $0x78] sm:$0xff]   ;;  %v27_v31 = vld [vmem:[%s4096_s0] sm:$0xff] }
   0xa   :  { %2756 = vmatprep.subr.bf16.mxu1 %v3093_v10  ;;  %v3108_v25 = vld [vmem:[%s4095_s1 + $0x30] sm:$0xff]   ;;  %v3112_v29 = vld [vmem:[%s4095_s1 + $0x38] sm:$0xff]   ;;  %v2487_v32 = vcombine.low %v27_v31, %v27_v31  ;;  %v2488_v33 = vcombine.high %v27_v31, %v27_v31  ;;  %v3117_v35 = vld [vmem:[%s4095_s1 + $0x140] sm:$0xff]  }
   0xb   :  { %2735 = vmatpush3.bf16.msra.mxu0 %v3092_v9  ;;  %v3109_v26 = vld [vmem:[%s4095_s1 + $0xf0] sm:$0xff]   ;;  %v3113_v30 = vld [vmem:[%s4095_s1 + $0xf8] sm:$0xff]   ;;  %v28_v36 = vld [vmem:[%s4096_s0 + $0x8] sm:$0xff] }
   0xc   :  { %2736 = vmatprep.subr.bf16.mxu0 %v3095_v12  ;;  %v3110_v27 = vld [vmem:[%s4095_s1 + $0xb0] sm:$0xff]   ;;  %v3116_v34 = vld [vmem:[%s4095_s1 + $0xb8] sm:$0xff]   ;;  %1767 = vmatprep.mubr.bf16.mxu0 %v2488_v33  ;;  %v2489_v37 = vcombine.low %v28_v36, %v28_v36  ;;  %v2490_v38 = vcombine.high %v28_v36, %v28_v36  ;;  %v3120_v39 = vld [vmem:[%s4095_s1 + $0x100] sm:$0xff]  }
   0xd   :  { %2757 = vmatpush3.bf16.msra.mxu1 %v3094_v11  ;;  %v3121_v40 = vld [vmem:[%s4095_s1 + $0x1c0] sm:$0xff]   ;;  %v3123_v42 = vld [vmem:[%s4095_s1 + $0x148] sm:$0xff]   ;;  %v3127_v46 = vld [vmem:[%s4095_s1 + $0x150] sm:$0xff]  }
   0xe   :  { %2758 = vmatprep.subr.bf16.mxu1 %v3097_v14  ;;  %1807 = vmatprep.mubr.bf16.mxu1 %v2490_v38  ;;  %v3122_v41 = vld [vmem:[%s4095_s1 + $0x180] sm:$0xff]   ;;  %v3124_v43 = vld [vmem:[%s4095_s1 + $0x108] sm:$0xff]   ;;  %v3128_v47 = vld [vmem:[%s4095_s1 + $0x110] sm:$0xff]  }
   0xf   :  { %2737 = vmatpush3.bf16.msra.mxu0 %v3096_v13  ;;  %v3125_v44 = vld [vmem:[%s4095_s1 + $0x1c8] sm:$0xff]   ;;  %v3129_v48 = vld [vmem:[%s4095_s1 + $0x1d0] sm:$0xff]   ;;  %v3131_v50 = vld [vmem:[%s4095_s1 + $0x158] sm:$0xff]  }
  0x10   :  { %2738 = vmatprep.subr.bf16.mxu0 %v3099_v16  ;;  %v3126_v45 = vld [vmem:[%s4095_s1 + $0x188] sm:$0xff]   ;;  %v3130_v49 = vld [vmem:[%s4095_s1 + $0x190] sm:$0xff]   ;;  %v3132_v51 = vld [vmem:[%s4095_s1 + $0x118] sm:$0xff]  }
  0x11   :  { %2759 = vmatpush3.bf16.msra.mxu1 %v3098_v15  ;;  %v3133_v52 = vld [vmem:[%s4095_s1 + $0x1d8] sm:$0xff]   ;;  %v3135_v54 = vld [vmem:[%s4095_s1 + $0x160] sm:$0xff]   ;;  %v3139_v58 = vld [vmem:[%s4095_s1 + $0x168] sm:$0xff]  }
  0x12   :  { %2760 = vmatprep.subr.bf16.mxu1 %v3101_v18  ;;  %v3134_v53 = vld [vmem:[%s4095_s1 + $0x198] sm:$0xff]   ;;  %v3136_v55 = vld [vmem:[%s4095_s1 + $0x120] sm:$0xff]   ;;  %v3140_v59 = vld [vmem:[%s4095_s1 + $0x128] sm:$0xff]  }
  0x13   :  { %2739 = vmatpush3.bf16.msra.mxu0 %v3100_v17  ;;  %v3137_v56 = vld [vmem:[%s4095_s1 + $0x1e0] sm:$0xff]   ;;  %v3141_v60 = vld [vmem:[%s4095_s1 + $0x1e8] sm:$0xff]   ;;  %v3143_v62 = vld [vmem:[%s4095_s1 + $0x170] sm:$0xff]  }
  0x14   :  { %2740 = vmatprep.subr.bf16.mxu0 %v3103_v20  ;;  %v3138_v57 = vld [vmem:[%s4095_s1 + $0x1a0] sm:$0xff]   ;;  %v3142_v61 = vld [vmem:[%s4095_s1 + $0x1a8] sm:$0xff]   ;;  %v3144_v63 = vld [vmem:[%s4095_s1 + $0x130] sm:$0xff]  }
  0x15   :  { %2761 = vmatpush3.bf16.msra.mxu1 %v3102_v19  ;;  %v3145_v0 = vld [vmem:[%s4095_s1 + $0x1f0] sm:$0xff]   ;;  %v3147_v2 = vld [vmem:[%s4095_s1 + $0x178] sm:$0xff]   ;;  %v3153_v9 = vld [vmem:[%s4095_s1 + $0x240] sm:$0xff]  }
  0x16   :  { %2762 = vmatprep.subr.bf16.mxu1 %v3105_v22  ;;  %v3146_v1 = vld [vmem:[%s4095_s1 + $0x1b0] sm:$0xff]   ;;  %v3148_v3 = vld [vmem:[%s4095_s1 + $0x138] sm:$0xff]   ;;  %v3156_v13 = vld [vmem:[%s4095_s1 + $0x200] sm:$0xff]  }
  0x17   :  { %2741 = vmatpush3.bf16.msra.mxu0 %v3104_v21  ;;  %v3149_v4 = vld [vmem:[%s4095_s1 + $0x1f8] sm:$0xff]   ;;  %v29_v5 = vld [vmem:[%s4096_s0 + $0x10] sm:$0xff]  ;;  %v3157_v14 = vld [vmem:[%s4095_s1 + $0x2c0] sm:$0xff]  }
  0x18   :  { %2742 = vmatprep.subr.bf16.mxu0 %v3107_v24  ;;  %v2491_v6 = vcombine.low %v29_v5, %v29_v5  ;;  %v2492_v7 = vcombine.high %v29_v5, %v29_v5  ;;  %v3152_v8 = vld [vmem:[%s4095_s1 + $0x1b8] sm:$0xff]   ;;  %v3158_v15 = vld [vmem:[%s4095_s1 + $0x280] sm:$0xff]   ;;  %v3159_v16 = vld [vmem:[%s4095_s1 + $0x248] sm:$0xff]  }
  0x19   :  { %2763 = vmatpush3.bf16.msra.mxu1 %v3106_v23  ;;  %v30_v10 = vld [vmem:[%s4096_s0 + $0x18] sm:$0xff]  ;;  %v3160_v17 = vld [vmem:[%s4095_s1 + $0x208] sm:$0xff]   ;;  %v3163_v20 = vld [vmem:[%s4095_s1 + $0x250] sm:$0xff]  }
  0x1a   :  { %2764 = vmatprep.subr.bf16.mxu1 %v3109_v26  ;;  %v2493_v11 = vcombine.low %v30_v10, %v30_v10  ;;  %v2494_v12 = vcombine.high %v30_v10, %v30_v10  ;;  %v3161_v18 = vld [vmem:[%s4095_s1 + $0x2c8] sm:$0xff]   ;;  %v3164_v21 = vld [vmem:[%s4095_s1 + $0x210] sm:$0xff]   ;;  %v3167_v24 = vld [vmem:[%s4095_s1 + $0x258] sm:$0xff]  }
  0x1b   :  { %2743 = vmatpush3.bf16.msra.mxu0 %v3108_v25  ;;  %v3162_v19 = vld [vmem:[%s4095_s1 + $0x288] sm:$0xff]   ;;  %v3165_v22 = vld [vmem:[%s4095_s1 + $0x2d0] sm:$0xff]   ;;  %v3168_v25 = vld [vmem:[%s4095_s1 + $0x218] sm:$0xff]  }
  0x1c   :  { %2744 = vmatprep.subr.bf16.mxu0 %v3111_v28  ;;  %v3166_v23 = vld [vmem:[%s4095_s1 + $0x290] sm:$0xff]   ;;  %v3169_v26 = vld [vmem:[%s4095_s1 + $0x2d8] sm:$0xff]   ;;  %v3171_v28 = vld [vmem:[%s4095_s1 + $0x260] sm:$0xff]  }
  0x1d   :  { %2765 = vmatpush3.bf16.msra.mxu1 %v3110_v27  ;;  %v3170_v27 = vld [vmem:[%s4095_s1 + $0x298] sm:$0xff]   ;;  %v3174_v31 = vld [vmem:[%s4095_s1 + $0x2a0] sm:$0xff]   ;;  %v3176_v33 = vld [vmem:[%s4095_s1 + $0x228] sm:$0xff]  }
  0x1e   :  { %2766 = vmatprep.subr.bf16.mxu1 %v3113_v30  ;;  %v3173_v30 = vld [vmem:[%s4095_s1 + $0x2e0] sm:$0xff]   ;;  %v3179_v36 = vld [vmem:[%s4095_s1 + $0x270] sm:$0xff]  }
  0x1f   :  { %2745 = vmatpush3.bf16.msra.mxu0 %v3112_v29  ;;  %v3172_v29 = vld [vmem:[%s4095_s1 + $0x220] sm:$0xff]   ;;  %v3181_v38 = vld [vmem:[%s4095_s1 + $0x2f0] sm:$0xff]  }
  0x20   :  { %2774 = vmatprep.subr.bf16.mxu0 %v3117_v35  ;;  %v3178_v35 = vld [vmem:[%s4095_s1 + $0x2a8] sm:$0xff]   ;;  %v3210_v5 = vld [vmem:[%s4095_s1 + $0x3a0] sm:$0xff]   ;;  %v3215_v10 = vld [vmem:[%s4095_s1 + $0x370] sm:$0xff]  }
  0x21   :  { %2767 = vmatpush3.bf16.msra.mxu1 %v3116_v34  ;;  %v3177_v34 = vld [vmem:[%s4095_s1 + $0x2e8] sm:$0xff]  }
  0x22   :  { %1768 = vmatmul.mubr.bf16.vlgmr.msra.gmra.mrb[0].mxu0 %v2487_v32  ;;  %2796 = vmatprep.subr.bf16.mxu1 %v3121_v40  ;;  %v3175_v32 = vld [vmem:[%s4095_s1 + $0x268] sm:$0xff]   ;;  %v3183_v40 = vld [vmem:[%s4095_s1 + $0x278] sm:$0xff]  }
  0x23   :  { %2775 = vmatpush3.bf16.msra.mxu0 %v3120_v39  ;;  %1847 = vmatprep.mubr.bf16.mxu0 %v2492_v7  ;;  %v3182_v39 = vld [vmem:[%s4095_s1 + $0x2b0] sm:$0xff]   ;;  %v3212_v7 = vld [vmem:[%s4095_s1 + $0x328] sm:$0xff]  }
  0x24   :  { %1808 = vmatmul.mubr.bf16.vlgmr.msra.gmra.mrb[0].mxu1 %v2489_v37  ;;  %2776 = vmatprep.subr.bf16.mxu0 %v3123_v42  ;;  %v3180_v37 = vld [vmem:[%s4095_s1 + $0x230] sm:$0xff]   ;;  %v3185_v42 = vld [vmem:[%s4095_s1 + $0x2f8] sm:$0xff]  }
  0x25   :  { %2797 = vmatpush3.bf16.msra.mxu1 %v3122_v41  ;;  %1887 = vmatprep.mubr.bf16.mxu1 %v2494_v12  ;;  %v3184_v41 = vld [vmem:[%s4095_s1 + $0x238] sm:$0xff]   ;;  %v3217_v12 = vld [vmem:[%s4095_s1 + $0x3f0] sm:$0xff]  }
  0x26   :  { %2798 = vmatprep.subr.bf16.mxu1 %v3125_v44 }
  0x27   :  { %2777 = vmatpush3.bf16.msra.mxu0 %v3124_v43  ;;  %v31_v43 = vld [vmem:[%s4096_s0 + $0x20] sm:$0xff] }
  0x28   :  { %2778 = vmatprep.subr.bf16.mxu0 %v3127_v46  ;;  %v2495_v44 = vcombine.low %v31_v43, %v31_v43  ;;  %v3188_v46 = vld [vmem:[%s4095_s1 + $0x2b8] sm:$0xff]  }
  0x29   :  { %2799 = vmatpush3.bf16.msra.mxu1 %v3126_v45  ;;  %v2496_v45 = vcombine.high %v31_v43, %v31_v43  ;;  %v3246_v43 = vld [vmem:[%s4095_s1 + $0x4a0] sm:$0xff]  }
  0x2a   :  { %2800 = vmatprep.subr.bf16.mxu1 %v3129_v48  ;;  %v32_v48 = vld [vmem:[%s4096_s0 + $0x28] sm:$0xff] }
  0x2b   :  { %2779 = vmatpush3.bf16.msra.mxu0 %v3128_v47  ;;  %v3189_v47 = vld [vmem:[%s4095_s1 + $0x340] sm:$0xff]  }
  0x2c   :  { %2780 = vmatprep.subr.bf16.mxu0 %v3131_v50  ;;  %v2498_v50 = vcombine.high %v32_v48, %v32_v48 }
  0x2d   :  { %2801 = vmatpush3.bf16.msra.mxu1 %v3130_v49  ;;  %v2497_v49 = vcombine.low %v32_v48, %v32_v48  ;;  %v3251_v48 = vld [vmem:[%s4095_s1 + $0x470] sm:$0xff]  }
  0x2e   :  { %2802 = vmatprep.subr.bf16.mxu1 %v3133_v52  ;;  %v3193_v52 = vld [vmem:[%s4095_s1 + $0x3c0] sm:$0xff]  }
  0x2f   :  { %2781 = vmatpush3.bf16.msra.mxu0 %v3132_v51  ;;  %v3192_v51 = vld [vmem:[%s4095_s1 + $0x300] sm:$0xff]  }
  0x30   :  { %2782 = vmatprep.subr.bf16.mxu0 %v3135_v54  ;;  %v3195_v54 = vld [vmem:[%s4095_s1 + $0x348] sm:$0xff]  }
  0x31   :  { %2803 = vmatpush3.bf16.msra.mxu1 %v3134_v53  ;;  %v3194_v53 = vld [vmem:[%s4095_s1 + $0x380] sm:$0xff]  }
  0x32   :  { %2804 = vmatprep.subr.bf16.mxu1 %v3137_v56  ;;  %v3197_v56 = vld [vmem:[%s4095_s1 + $0x3c8] sm:$0xff]  }
  0x33   :  { %2783 = vmatpush3.bf16.msra.mxu0 %v3136_v55  ;;  %v3196_v55 = vld [vmem:[%s4095_s1 + $0x308] sm:$0xff]  }
  0x34   :  { %2784 = vmatprep.subr.bf16.mxu0 %v3139_v58  ;;  %v3199_v58 = vld [vmem:[%s4095_s1 + $0x350] sm:$0xff]  }
  0x35   :  { %2805 = vmatpush3.bf16.msra.mxu1 %v3138_v57  ;;  %v3198_v57 = vld [vmem:[%s4095_s1 + $0x388] sm:$0xff]  }
  0x36   :  { %2806 = vmatprep.subr.bf16.mxu1 %v3141_v60  ;;  %v3201_v60 = vld [vmem:[%s4095_s1 + $0x3d0] sm:$0xff]  }
  0x37   :  { %2785 = vmatpush3.bf16.msra.mxu0 %v3140_v59  ;;  %v3200_v59 = vld [vmem:[%s4095_s1 + $0x310] sm:$0xff]  }
  0x38   :  { %2786 = vmatprep.subr.bf16.mxu0 %v3143_v62  ;;  %v3203_v62 = vld [vmem:[%s4095_s1 + $0x358] sm:$0xff]  }
  0x39   :  { %2807 = vmatpush3.bf16.msra.mxu1 %v3142_v61  ;;  %v3202_v61 = vld [vmem:[%s4095_s1 + $0x390] sm:$0xff]  }
  0x3a   :  { %2808 = vmatprep.subr.bf16.mxu1 %v3145_v0  ;;  %v3205_v0 = vld [vmem:[%s4095_s1 + $0x3d8] sm:$0xff]  }
  0x3b   :  { %2787 = vmatpush3.bf16.msra.mxu0 %v3144_v63  ;;  %v3204_v63 = vld [vmem:[%s4095_s1 + $0x318] sm:$0xff]  }
  0x3c   :  { %2788 = vmatprep.subr.bf16.mxu0 %v3147_v2  ;;  %v3207_v2 = vld [vmem:[%s4095_s1 + $0x360] sm:$0xff]  }
  0x3d   :  { %2809 = vmatpush3.bf16.msra.mxu1 %v3146_v1  ;;  %v3206_v1 = vld [vmem:[%s4095_s1 + $0x398] sm:$0xff]  }
  0x3e   :  { %2810 = vmatprep.subr.bf16.mxu1 %v3149_v4  ;;  %v3209_v4 = vld [vmem:[%s4095_s1 + $0x3e0] sm:$0xff]  }
  0x3f   :  { %2789 = vmatpush3.bf16.msra.mxu0 %v3148_v3  ;;  %v3208_v3 = vld [vmem:[%s4095_s1 + $0x320] sm:$0xff]  }
  0x40   :  { %2818 = vmatprep.subr.bf16.mxu0 %v3153_v9  ;;  %v3214_v9 = vld [vmem:[%s4095_s1 + $0x3a8] sm:$0xff]  }
  0x41   :  { %2811 = vmatpush3.bf16.msra.mxu1 %v3152_v8  ;;  %v3213_v8 = vld [vmem:[%s4095_s1 + $0x3e8] sm:$0xff]  }
  0x42   :  { %1848 = vmatmul.mubr.bf16.vlgmr.msra.gmra.mrb[4].mxu0 %v2491_v6  ;;  %2840 = vmatprep.subr.bf16.mxu1 %v3157_v14  ;;  %v3211_v6 = vld [vmem:[%s4095_s1 + $0x368] sm:$0xff]   ;;  %v3219_v14 = vld [vmem:[%s4095_s1 + $0x378] sm:$0xff]  }
  0x43   :  { %2819 = vmatpush3.bf16.msra.mxu0 %v3156_v13  ;;  %1927 = vmatprep.mubr.bf16.mxu0 %v2496_v45  ;;  %v3218_v13 = vld [vmem:[%s4095_s1 + $0x3b0] sm:$0xff]   ;;  %v3248_v45 = vld [vmem:[%s4095_s1 + $0x428] sm:$0xff]  }
  0x44   :  { %1888 = vmatmul.mubr.bf16.vlgmr.msra.gmra.mrb[4].mxu1 %v2493_v11  ;;  %2820 = vmatprep.subr.bf16.mxu0 %v3159_v16  ;;  %v3216_v11 = vld [vmem:[%s4095_s1 + $0x330] sm:$0xff]   ;;  %v3221_v16 = vld [vmem:[%s4095_s1 + $0x3f8] sm:$0xff]  }
  0x45   :  { %2841 = vmatpush3.bf16.msra.mxu1 %v3158_v15  ;;  %1967 = vmatprep.mubr.bf16.mxu1 %v2498_v50  ;;  %v3220_v15 = vld [vmem:[%s4095_s1 + $0x338] sm:$0xff]   ;;  %v3253_v50 = vld [vmem:[%s4095_s1 + $0x4f0] sm:$0xff]  }
  0x46   :  { %2842 = vmatprep.subr.bf16.mxu1 %v3161_v18 }
  0x47   :  { %2821 = vmatpush3.bf16.msra.mxu0 %v3160_v17  ;;  %v33_v17 = vld [vmem:[%s4096_s0 + $0x30] sm:$0xff] }
  0x48   :  { %2822 = vmatprep.subr.bf16.mxu0 %v3163_v20  ;;  %v2499_v18 = vcombine.low %v33_v17, %v33_v17  ;;  %v3224_v20 = vld [vmem:[%s4095_s1 + $0x3b8] sm:$0xff]  }
  0x49   :  { %2843 = vmatpush3.bf16.msra.mxu1 %v3162_v19  ;;  %v2500_v19 = vcombine.high %v33_v17, %v33_v17  ;;  %v3282_v17 = vld [vmem:[%s4095_s1 + $0x5a0] sm:$0xff]  }
  0x4a   :  { %2844 = vmatprep.subr.bf16.mxu1 %v3165_v22  ;;  %v34_v22 = vld [vmem:[%s4096_s0 + $0x38] sm:$0xff] }
  0x4b   :  { %2823 = vmatpush3.bf16.msra.mxu0 %v3164_v21  ;;  %v3225_v21 = vld [vmem:[%s4095_s1 + $0x440] sm:$0xff]  }
  0x4c   :  { %2824 = vmatprep.subr.bf16.mxu0 %v3167_v24  ;;  %v2502_v24 = vcombine.high %v34_v22, %v34_v22 }
  0x4d   :  { %2845 = vmatpush3.bf16.msra.mxu1 %v3166_v23  ;;  %v2501_v23 = vcombine.low %v34_v22, %v34_v22  ;;  %v3287_v22 = vld [vmem:[%s4095_s1 + $0x570] sm:$0xff]  }
  0x4e   :  { %2846 = vmatprep.subr.bf16.mxu1 %v3169_v26  ;;  %v3229_v26 = vld [vmem:[%s4095_s1 + $0x4c0] sm:$0xff]  }
  0x4f   :  { %2825 = vmatpush3.bf16.msra.mxu0 %v3168_v25  ;;  %v3228_v25 = vld [vmem:[%s4095_s1 + $0x400] sm:$0xff]  }
  0x50   :  { %2826 = vmatprep.subr.bf16.mxu0 %v3171_v28  ;;  %v3231_v28 = vld [vmem:[%s4095_s1 + $0x448] sm:$0xff]  }
  0x51   :  { %2847 = vmatpush3.bf16.msra.mxu1 %v3170_v27  ;;  %v3230_v27 = vld [vmem:[%s4095_s1 + $0x480] sm:$0xff]  }
  0x52   :  { %2848 = vmatprep.subr.bf16.mxu1 %v3173_v30  ;;  %v3233_v30 = vld [vmem:[%s4095_s1 + $0x4c8] sm:$0xff]  }
  0x53   :  { %2827 = vmatpush3.bf16.msra.mxu0 %v3172_v29  ;;  %v3232_v29 = vld [vmem:[%s4095_s1 + $0x408] sm:$0xff]  }
  0x54   :  { %2828 = vmatprep.subr.bf16.mxu0 %v3175_v32  ;;  %v3235_v32 = vld [vmem:[%s4095_s1 + $0x450] sm:$0xff]  }
  0x55   :  { %2849 = vmatpush3.bf16.msra.mxu1 %v3174_v31  ;;  %v3234_v31 = vld [vmem:[%s4095_s1 + $0x488] sm:$0xff]  }
  0x56   :  { %2850 = vmatprep.subr.bf16.mxu1 %v3177_v34  ;;  %v3237_v34 = vld [vmem:[%s4095_s1 + $0x4d0] sm:$0xff]  }
  0x57   :  { %2829 = vmatpush3.bf16.msra.mxu0 %v3176_v33  ;;  %v3236_v33 = vld [vmem:[%s4095_s1 + $0x410] sm:$0xff]  }
  0x58   :  { %2830 = vmatprep.subr.bf16.mxu0 %v3179_v36  ;;  %v3239_v36 = vld [vmem:[%s4095_s1 + $0x458] sm:$0xff]  }
  0x59   :  { %2851 = vmatpush3.bf16.msra.mxu1 %v3178_v35  ;;  %v3238_v35 = vld [vmem:[%s4095_s1 + $0x490] sm:$0xff]  }
  0x5a   :  { %2852 = vmatprep.subr.bf16.mxu1 %v3181_v38  ;;  %v3241_v38 = vld [vmem:[%s4095_s1 + $0x4d8] sm:$0xff]  }
  0x5b   :  { %2831 = vmatpush3.bf16.msra.mxu0 %v3180_v37  ;;  %v3240_v37 = vld [vmem:[%s4095_s1 + $0x418] sm:$0xff]  }
  0x5c   :  { %2832 = vmatprep.subr.bf16.mxu0 %v3183_v40  ;;  %v3243_v40 = vld [vmem:[%s4095_s1 + $0x460] sm:$0xff]  }
  0x5d   :  { %2853 = vmatpush3.bf16.msra.mxu1 %v3182_v39  ;;  %v3242_v39 = vld [vmem:[%s4095_s1 + $0x498] sm:$0xff]  }
  0x5e   :  { %2854 = vmatprep.subr.bf16.mxu1 %v3185_v42  ;;  %v3245_v42 = vld [vmem:[%s4095_s1 + $0x4e0] sm:$0xff]  }
  0x5f   :  { %2833 = vmatpush3.bf16.msra.mxu0 %v3184_v41  ;;  %v3244_v41 = vld [vmem:[%s4095_s1 + $0x420] sm:$0xff]  }
  0x60   :  { %2862 = vmatprep.subr.bf16.mxu0 %v3189_v47  ;;  %v3250_v47 = vld [vmem:[%s4095_s1 + $0x4a8] sm:$0xff]  }
  0x61   :  { %2855 = vmatpush3.bf16.msra.mxu1 %v3188_v46  ;;  %v3249_v46 = vld [vmem:[%s4095_s1 + $0x4e8] sm:$0xff]  }
  0x62   :  { %1928 = vmatmul.mubr.bf16.vlgmr.msra.gmra.mrb[8].mxu0 %v2495_v44  ;;  %2884 = vmatprep.subr.bf16.mxu1 %v3193_v52  ;;  %v3247_v44 = vld [vmem:[%s4095_s1 + $0x468] sm:$0xff]   ;;  %v3255_v52 = vld [vmem:[%s4095_s1 + $0x478] sm:$0xff]  }
  0x63   :  { %2863 = vmatpush3.bf16.msra.mxu0 %v3192_v51  ;;  %2007 = vmatprep.mubr.bf16.mxu0 %v2500_v19  ;;  %v3254_v51 = vld [vmem:[%s4095_s1 + $0x4b0] sm:$0xff]   ;;  %v3284_v19 = vld [vmem:[%s4095_s1 + $0x528] sm:$0xff]  }
  0x64   :  { %1968 = vmatmul.mubr.bf16.vlgmr.msra.gmra.mrb[8].mxu1 %v2497_v49  ;;  %2864 = vmatprep.subr.bf16.mxu0 %v3195_v54  ;;  %v3252_v49 = vld [vmem:[%s4095_s1 + $0x430] sm:$0xff]   ;;  %v3257_v54 = vld [vmem:[%s4095_s1 + $0x4f8] sm:$0xff]  }
  0x65   :  { %2885 = vmatpush3.bf16.msra.mxu1 %v3194_v53  ;;  %2047 = vmatprep.mubr.bf16.mxu1 %v2502_v24  ;;  %v3256_v53 = vld [vmem:[%s4095_s1 + $0x438] sm:$0xff]   ;;  %v3289_v24 = vld [vmem:[%s4095_s1 + $0x5f0] sm:$0xff]  }
  0x66   :  { %2886 = vmatprep.subr.bf16.mxu1 %v3197_v56 }
  0x67   :  { %2865 = vmatpush3.bf16.msra.mxu0 %v3196_v55  ;;  %v35_v55 = vld [vmem:[%s4096_s0 + $0x40] sm:$0xff] }
  0x68   :  { %2866 = vmatprep.subr.bf16.mxu0 %v3199_v58  ;;  %v2503_v56 = vcombine.low %v35_v55, %v35_v55  ;;  %v3260_v58 = vld [vmem:[%s4095_s1 + $0x4b8] sm:$0xff]  }
  0x69   :  { %2887 = vmatpush3.bf16.msra.mxu1 %v3198_v57  ;;  %v2504_v57 = vcombine.high %v35_v55, %v35_v55 }
  0x6a   :  { %2888 = vmatprep.subr.bf16.mxu1 %v3201_v60  ;;  %v36_v60 = vld [vmem:[%s4096_s0 + $0x48] sm:$0xff] }
  0x6b   :  { %2867 = vmatpush3.bf16.msra.mxu0 %v3200_v59  ;;  %v3261_v59 = vld [vmem:[%s4095_s1 + $0x540] sm:$0xff]  }
  0x6c   :  { %2868 = vmatprep.subr.bf16.mxu0 %v3203_v62  ;;  %v2506_v62 = vcombine.high %v36_v60, %v36_v60 }
  0x6d   :  { %2889 = vmatpush3.bf16.msra.mxu1 %v3202_v61  ;;  %v2505_v61 = vcombine.low %v36_v60, %v36_v60 }
  0x6e   :  { %2890 = vmatprep.subr.bf16.mxu1 %v3205_v0  ;;  %v3265_v0 = vld [vmem:[%s4095_s1 + $0x5c0] sm:$0xff]  }
  0x6f   :  { %2869 = vmatpush3.bf16.msra.mxu0 %v3204_v63  ;;  %v3264_v63 = vld [vmem:[%s4095_s1 + $0x500] sm:$0xff]  }
  0x70   :  { %2870 = vmatprep.subr.bf16.mxu0 %v3207_v2  ;;  %v3267_v2 = vld [vmem:[%s4095_s1 + $0x548] sm:$0xff]  }
  0x71   :  { %2891 = vmatpush3.bf16.msra.mxu1 %v3206_v1  ;;  %v3266_v1 = vld [vmem:[%s4095_s1 + $0x580] sm:$0xff]  }
  0x72   :  { %2892 = vmatprep.subr.bf16.mxu1 %v3209_v4  ;;  %v3269_v4 = vld [vmem:[%s4095_s1 + $0x5c8] sm:$0xff]  }
  0x73   :  { %2871 = vmatpush3.bf16.msra.mxu0 %v3208_v3  ;;  %v3268_v3 = vld [vmem:[%s4095_s1 + $0x508] sm:$0xff]  }
  0x74   :  { %2872 = vmatprep.subr.bf16.mxu0 %v3211_v6  ;;  %v3271_v6 = vld [vmem:[%s4095_s1 + $0x550] sm:$0xff]  }
  0x75   :  { %2893 = vmatpush3.bf16.msra.mxu1 %v3210_v5  ;;  %v3270_v5 = vld [vmem:[%s4095_s1 + $0x588] sm:$0xff]  }
  0x76   :  { %2894 = vmatprep.subr.bf16.mxu1 %v3213_v8  ;;  %v3273_v8 = vld [vmem:[%s4095_s1 + $0x5d0] sm:$0xff]  }
  0x77   :  { %2873 = vmatpush3.bf16.msra.mxu0 %v3212_v7  ;;  %v3272_v7 = vld [vmem:[%s4095_s1 + $0x510] sm:$0xff]  }
  0x78   :  { %2874 = vmatprep.subr.bf16.mxu0 %v3215_v10  ;;  %v3275_v10 = vld [vmem:[%s4095_s1 + $0x558] sm:$0xff]  }
  0x79   :  { %2895 = vmatpush3.bf16.msra.mxu1 %v3214_v9  ;;  %v3274_v9 = vld [vmem:[%s4095_s1 + $0x590] sm:$0xff]  }
  0x7a   :  { %2896 = vmatprep.subr.bf16.mxu1 %v3217_v12  ;;  %v3277_v12 = vld [vmem:[%s4095_s1 + $0x5d8] sm:$0xff]  }
  0x7b   :  { %2875 = vmatpush3.bf16.msra.mxu0 %v3216_v11  ;;  %v3276_v11 = vld [vmem:[%s4095_s1 + $0x518] sm:$0xff]  }
  0x7c   :  { %2876 = vmatprep.subr.bf16.mxu0 %v3219_v14  ;;  %v3279_v14 = vld [vmem:[%s4095_s1 + $0x560] sm:$0xff]  }
  0x7d   :  { %2897 = vmatpush3.bf16.msra.mxu1 %v3218_v13  ;;  %v3278_v13 = vld [vmem:[%s4095_s1 + $0x598] sm:$0xff]  }
  0x7e   :  { %2898 = vmatprep.subr.bf16.mxu1 %v3221_v16  ;;  %v3281_v16 = vld [vmem:[%s4095_s1 + $0x5e0] sm:$0xff]  }
  0x7f   :  { %2877 = vmatpush3.bf16.msra.mxu0 %v3220_v15  ;;  %v3280_v15 = vld [vmem:[%s4095_s1 + $0x520] sm:$0xff]  }
  0x80   :  { %2906 = vmatprep.subr.bf16.mxu0 %v3225_v21  ;;  %v3286_v21 = vld [vmem:[%s4095_s1 + $0x5a8] sm:$0xff]  }
  0x81   :  { %2899 = vmatpush3.bf16.msra.mxu1 %v3224_v20  ;;  %v3285_v20 = vld [vmem:[%s4095_s1 + $0x5e8] sm:$0xff]  }
  0x82   :  { %2008 = vmatmul.mubr.bf16.vlgmr.msra.gmra.mrb[12].mxu0 %v2499_v18  ;;  %2928 = vmatprep.subr.bf16.mxu1 %v3229_v26  ;;  %v3283_v18 = vld [vmem:[%s4095_s1 + $0x568] sm:$0xff]   ;;  %v3291_v26 = vld [vmem:[%s4095_s1 + $0x578] sm:$0xff]  }
  0x83   :  { %2907 = vmatpush3.bf16.msra.mxu0 %v3228_v25  ;;  %2087 = vmatprep.mubr.bf16.mxu0 %v2504_v57  ;;  %v3290_v25 = vld [vmem:[%s4095_s1 + $0x5b0] sm:$0xff]  }
  0x84   :  { %2048 = vmatmul.mubr.bf16.vlgmr.msra.gmra.mrb[12].mxu1 %v2501_v23  ;;  %2908 = vmatprep.subr.bf16.mxu0 %v3231_v28  ;;  %v3288_v23 = vld [vmem:[%s4095_s1 + $0x530] sm:$0xff]   ;;  %v3293_v28 = vld [vmem:[%s4095_s1 + $0x5f8] sm:$0xff]  }
  0x85   :  { %2929 = vmatpush3.bf16.msra.mxu1 %v3230_v27  ;;  %2127 = vmatprep.mubr.bf16.mxu1 %v2506_v62  ;;  %v3292_v27 = vld [vmem:[%s4095_s1 + $0x538] sm:$0xff]  }
  0x86   :  { %2930 = vmatprep.subr.bf16.mxu1 %v3233_v30 }
  0x87   :  { %2909 = vmatpush3.bf16.msra.mxu0 %v3232_v29  ;;  %v37_v29 = vld [vmem:[%s4096_s0 + $0x50] sm:$0xff] }
  0x88   :  { %2910 = vmatprep.subr.bf16.mxu0 %v3235_v32  ;;  %v2507_v30 = vcombine.low %v37_v29, %v37_v29  ;;  %v3296_v32 = vld [vmem:[%s4095_s1 + $0x5b8] sm:$0xff]  }
  0x89   :  { %2931 = vmatpush3.bf16.msra.mxu1 %v3234_v31  ;;  %v2508_v31 = vcombine.high %v37_v29, %v37_v29  ;;  %v3318_v29 = vld [vmem:[%s4099_s5 + $0x10] sm:$0xff]  }
  0x8a   :  { %2932 = vmatprep.subr.bf16.mxu1 %v3237_v34  ;;  %v3324_v34 = vmov 0.0  }
  0x8b   :  { %2911 = vmatpush3.bf16.msra.mxu0 %v3236_v33  ;;  %v38_v33 = vld [vmem:[%s4096_s0 + $0x58] sm:$0xff] }
  0x8c   :  { %2912 = vmatprep.subr.bf16.mxu0 %v3239_v36  ;;  %v2510_v36 = vcombine.high %v38_v33, %v38_v33 }
  0x8d   :  { %2933 = vmatpush3.bf16.msra.mxu1 %v3238_v35  ;;  %v2509_v35 = vcombine.low %v38_v33, %v38_v33 }
  0x8e   :  { %2934 = vmatprep.subr.bf16.mxu1 %v3241_v38  ;;  %v3300_v38 = vld [vmem:[%s4095_s1 + $0x608] sm:$0xff]  }
  0x8f   :  { %2913 = vmatpush3.bf16.msra.mxu0 %v3240_v37  ;;  %v3299_v37 = vld [vmem:[%s4095_s1 + $0x600] sm:$0xff]  }
  0x90   :  { %2914 = vmatprep.subr.bf16.mxu0 %v3243_v40  ;;  %v3302_v40 = vld [vmem:[%s4095_s1 + $0x618] sm:$0xff]  }
  0x91   :  { %2935 = vmatpush3.bf16.msra.mxu1 %v3242_v39  ;;  %v3301_v39 = vld [vmem:[%s4095_s1 + $0x610] sm:$0xff]  }
  0x92   :  { %2936 = vmatprep.subr.bf16.mxu1 %v3245_v42  ;;  %v3304_v42 = vld [vmem:[%s4095_s1 + $0x628] sm:$0xff]  }
  0x93   :  { %2915 = vmatpush3.bf16.msra.mxu0 %v3244_v41  ;;  %v3303_v41 = vld [vmem:[%s4095_s1 + $0x620] sm:$0xff]  }
  0x94   :  { %2916 = vmatprep.subr.bf16.mxu0 %v3247_v44  ;;  %v3306_v44 = vld [vmem:[%s4095_s1 + $0x638] sm:$0xff]  }
  0x95   :  { %2937 = vmatpush3.bf16.msra.mxu1 %v3246_v43  ;;  %v3305_v43 = vld [vmem:[%s4095_s1 + $0x630] sm:$0xff]  }
  0x96   :  { %2938 = vmatprep.subr.bf16.mxu1 %v3249_v46 }
  0x97   :  { %2917 = vmatpush3.bf16.msra.mxu0 %v3248_v45  ;;  %v3307_v45 = vld [vmem:[%s4096_s0 + $0x60] ss:$0 sps:$4 sm:$0xff]  }
  0x98   :  { %2918 = vmatprep.subr.bf16.mxu0 %v3251_v48 }
  0x99   :  { %2939 = vmatpush3.bf16.msra.mxu1 %v3250_v47  ;;  %v2486_v47 = vld [vmem:[%s4097_s2] ss:$0 sm:$0xff] }
  0x9a   :  { %2940 = vmatprep.subr.bf16.mxu1 %v3253_v50 }
  0x9b   :  { %2919 = vmatpush3.bf16.msra.mxu0 %v3252_v49 }
  0x9c   :  { %2920 = vmatprep.subr.bf16.mxu0 %v3255_v52 }
  0x9d   :  { %2941 = vmatpush3.bf16.msra.mxu1 %v3254_v51 }
  0x9e   :  { %2942 = vmatprep.subr.bf16.mxu1 %v3257_v54 }
  0x9f   :  { %2921 = vmatpush3.bf16.msra.mxu0 %v3256_v53 }
  0xa0   :  { %2950 = vmatprep.subr.bf16.mxu0 %v3261_v59 }
  0xa1   :  { %2943 = vmatpush3.bf16.msra.mxu1 %v3260_v58 }
  0xa2   :  { %2088 = vmatmul.mubr.bf16.vlgmr.msra.gmra.mrb[16].mxu0 %v2503_v56  ;;  %2972 = vmatprep.subr.bf16.mxu1 %v3265_v0 }
  0xa3   :  { %2951 = vmatpush3.bf16.msra.mxu0 %v3264_v63  ;;  %2167 = vmatprep.mubr.bf16.mxu0 %v2508_v31  ;;  %v3320_v31 = vld [vmem:[%s4099_s5 + $0x20] sm:$0xff]  }
  0xa4   :  { %2128 = vmatmul.mubr.bf16.vlgmr.msra.gmra.mrb[16].mxu1 %v2505_v61  ;;  %2952 = vmatprep.subr.bf16.mxu0 %v3267_v2 }
  0xa5   :  { %2973 = vmatpush3.bf16.msra.mxu1 %v3266_v1  ;;  %2207 = vmatprep.mubr.bf16.mxu1 %v2510_v36 }
  0xa6   :  { %2974 = vmatprep.subr.bf16.mxu1 %v3269_v4 }
  0xa7   :  { %2953 = vmatpush3.bf16.msra.mxu0 %v3268_v3 }
  0xa8   :  { %2954 = vmatprep.subr.bf16.mxu0 %v3271_v6 }
  0xa9   :  { %2975 = vmatpush3.bf16.msra.mxu1 %v3270_v5 }
  0xaa   :  { %2976 = vmatprep.subr.bf16.mxu1 %v3273_v8  ;;  %v3309_v8 = vld [vmem:[%s4098_s3 + $0x8] sm:$0xff]  }
  0xab   :  { %2955 = vmatpush3.bf16.msra.mxu0 %v3272_v7  ;;  %v3308_v7 = vld [vmem:[%s4098_s3] sm:$0xff]  }
  0xac   :  { %2956 = vmatprep.subr.bf16.mxu0 %v3275_v10  ;;  %v3311_v10 = vld [vmem:[%s4098_s3 + $0x18] sm:$0xff]  }
  0xad   :  { %2977 = vmatpush3.bf16.msra.mxu1 %v3274_v9  ;;  %v3310_v9 = vld [vmem:[%s4098_s3 + $0x10] sm:$0xff]  }
  0xae   :  { %2978 = vmatprep.subr.bf16.mxu1 %v3277_v12  ;;  %v3313_v12 = vld [vmem:[%s4098_s3 + $0x28] sm:$0xff]  }
  0xaf   :  { %2957 = vmatpush3.bf16.msra.mxu0 %v3276_v11  ;;  %v3312_v11 = vld [vmem:[%s4098_s3 + $0x20] sm:$0xff]  }
  0xb0   :  { %2958 = vmatprep.subr.bf16.mxu0 %v3279_v14  ;;  %v3314_v14 = vld [vmem:[%s4098_s3 + $0x30] sm:$0xff]  }
  0xb1   :  { %2979 = vmatpush3.bf16.msra.mxu1 %v3278_v13 }
  0xb2   :  { %2980 = vmatprep.subr.bf16.mxu1 %v3281_v16 }
  0xb3   :  { %2959 = vmatpush3.bf16.msra.mxu0 %v3280_v15 }
  0xb4   :  { %2960 = vmatprep.subr.bf16.mxu0 %v3283_v18 }
  0xb5   :  { %2981 = vmatpush3.bf16.msra.mxu1 %v3282_v17 }
  0xb6   :  { %2982 = vmatprep.subr.bf16.mxu1 %v3285_v20 }
  0xb7   :  { %2961 = vmatpush3.bf16.msra.mxu0 %v3284_v19 }
  0xb8   :  { %2962 = vmatprep.subr.bf16.mxu0 %v3287_v22 }
  0xb9   :  { %2983 = vmatpush3.bf16.msra.mxu1 %v3286_v21 }
  0xba   :  { %2984 = vmatprep.subr.bf16.mxu1 %v3289_v24  ;;  %v3315_v24 = vld [vmem:[%s4098_s3 + $0x38] sm:$0xff]  }
  0xbb   :  { %2963 = vmatpush3.bf16.msra.mxu0 %v3288_v23 }
  0xbc   :  { %2964 = vmatprep.subr.bf16.mxu0 %v3291_v26 }
  0xbd   :  { %2985 = vmatpush3.bf16.msra.mxu1 %v3290_v25 }
  0xbe   :  { %2986 = vmatprep.subr.bf16.mxu1 %v3293_v28  ;;  %v3317_v28 = vld [vmem:[%s4099_s5 + $0x8] sm:$0xff]  }
  0xbf   :  { %2965 = vmatpush3.bf16.msra.mxu0 %v3292_v27  ;;  %v3316_v27 = vld [vmem:[%s4099_s5] sm:$0xff]  }
  0xc0   :  { %3021 = vmatprep.subr.bf16.mxu0 %v3324_v34 }
  0xc1   :  { %2987 = vmatpush3.bf16.msra.mxu1 %v3296_v32  ;;  %v3321_v32 = vld [vmem:[%s4099_s5 + $0x28] sm:$0xff]  }
  0xc2   :  { %2168 = vmatmul.mubr.bf16.vlgmr.msra.gmra.mrb[20].mxu0 %v2507_v30  ;;  %3041 = vmatprep.subr.bf16.mxu1 %v3324_v34  ;;  %v3319_v30 = vld [vmem:[%s4099_s5 + $0x18] sm:$0xff]  }
  0xc3   :  { %3022 = vmatpush3.bf16.msra.mxu0 %v3299_v37  ;;  %3037 = vmatprep.mubr.msk.bf16.mxu0 %vm3325_vm0, %v3324_v34 }
  0xc4   :  { %2208 = vmatmul.mubr.bf16.vlgmr.msra.gmra.mrb[20].mxu1 %v2509_v35  ;;  %3023 = vmatprep.subr.bf16.mxu0 %v3324_v34 }
  0xc5   :  { %3057 = vmatprep.mubr.msk.bf16.mxu1 %vm3325_vm0, %v3324_v34  ;;  %3042 = vmatpush3.bf16.msra.mxu1 %v3308_v7 }
  0xc6   :  { %3043 = vmatprep.subr.bf16.mxu1 %v3324_v34 }
  0xc7   :  { %3024 = vmatpush3.bf16.msra.mxu0 %v3300_v38 }
  0xc8   :  { %3025 = vmatprep.subr.bf16.mxu0 %v3324_v34 }
  0xc9   :  { %3044 = vmatpush3.bf16.msra.mxu1 %v3309_v8 }
  0xca   :  { %3045 = vmatprep.subr.bf16.mxu1 %v3324_v34 }
  0xcb   :  { %3026 = vmatpush3.bf16.msra.mxu0 %v3301_v39 }
  0xcc   :  { %3027 = vmatprep.subr.bf16.mxu0 %v3324_v34 }
  0xcd   :  { %3046 = vmatpush3.bf16.msra.mxu1 %v3310_v9 }
  0xce   :  { %3047 = vmatprep.subr.bf16.mxu1 %v3324_v34 }
  0xcf   :  { %3028 = vmatpush3.bf16.msra.mxu0 %v3302_v40 }
  0xd0   :  { %3029 = vmatprep.subr.bf16.mxu0 %v3324_v34 }
  0xd1   :  { %3048 = vmatpush3.bf16.msra.mxu1 %v3311_v10 }
  0xd2   :  { %3049 = vmatprep.subr.bf16.mxu1 %v3324_v34 }
  0xd3   :  { %3030 = vmatpush3.bf16.msra.mxu0 %v3303_v41 }
  0xd4   :  { %3031 = vmatprep.subr.bf16.mxu0 %v3324_v34 }
  0xd5   :  { %3050 = vmatpush3.bf16.msra.mxu1 %v3312_v11 }
  0xd6   :  { %3051 = vmatprep.subr.bf16.mxu1 %v3324_v34 }
  0xd7   :  { %3032 = vmatpush3.bf16.msra.mxu0 %v3304_v42 }
  0xd8   :  { %3033 = vmatprep.subr.bf16.mxu0 %v3324_v34 }
  0xd9   :  { %3052 = vmatpush3.bf16.msra.mxu1 %v3313_v12 }
  0xda   :  { %3053 = vmatprep.subr.bf16.mxu1 %v3324_v34 }
  0xdb   :  { %3034 = vmatpush3.bf16.msra.mxu0 %v3305_v43 }
  0xdc   :  { %3035 = vmatprep.subr.bf16.mxu0 %v3324_v34 }
  0xdd   :  { %3054 = vmatpush3.bf16.msra.mxu1 %v3314_v14  ;;  %v3323_v14 = vld [vmem:[%s4099_s5 + $0x38] sm:$0xff]  }
  0xde   :  { %3055 = vmatprep.subr.bf16.mxu1 %v3324_v34 }
  0xdf   :  { %3036 = vmatpush3.bf16.msra.mxu0 %v3306_v44 }
  0xe0   :  { %3061 = vmatprep.subr.bf16.mxu0 %v3324_v34 }
  0xe1   :  { %3056 = vmatpush3.bf16.msra.mxu1 %v3315_v24 }
  0xe2   :  { %3038 = vmatmul.mubr.bf16.vlgmr.msra.gmra.mrb[24].mxu0 %v3307_v45 }
  0xe3   :  { %3077 = vmatprep.mubr.msk.bf16.mxu0 %vm3325_vm0, %v3324_v34  ;;  %3062 = vmatpush3.bf16.msra.mxu0 %v3316_v27 }
  0xe4   :  { %3063 = vmatprep.subr.bf16.mxu0 %v3324_v34 }
  0xe7   :  { %3064 = vmatpush3.bf16.msra.mxu0 %v3317_v28 }
  0xe8   :  { %3065 = vmatprep.subr.bf16.mxu0 %v3324_v34 }
  0xeb   :  { %3066 = vmatpush3.bf16.msra.mxu0 %v3318_v29 }
  0xec   :  { %3067 = vmatprep.subr.bf16.mxu0 %v3324_v34 }
  0xef   :  { %3068 = vmatpush3.bf16.msra.mxu0 %v3319_v30 }
  0xf0   :  { %3069 = vmatprep.subr.bf16.mxu0 %v3324_v34 }
  0xf3   :  { %3070 = vmatpush3.bf16.msra.mxu0 %v3320_v31 }
  0xf4   :  { %3071 = vmatprep.subr.bf16.mxu0 %v3324_v34 }
  0xf5   :  { %v2746_v46 = vpop.f32.mrb[0].mxu0 }
  0xf6   :  { %v2747_v48 = vpop.f32.mrb[1].mxu0 }
  0xf7   :  { %v2748_v49 = vadd.f32 %v2747_v48, %v2746_v46  ;;  %v2749_v50 = vpop.f32.mrb[2].mxu0  ;;  %v2768_v51 = vpop.f32.mrb[0].mxu1  ;;  %3072 = vmatpush3.bf16.msra.mxu0 %v3321_v32 }
  0xf8   :  { %v2750_v52 = vpop.f32.mrb[3].mxu0  ;;  %v2769_v53 = vpop.f32.mrb[1].mxu1  ;;  %3073 = vmatprep.subr.bf16.mxu0 %v3324_v34 }
  0xf9   :  { %v1770_v54 = vadd.f32 %v2748_v49, %v2486_v47  ;;  %v2770_v55 = vadd.f32 %v2769_v53, %v2768_v51  ;;  %v2771_v56 = vpop.f32.mrb[2].mxu1 }
  0xfa   :  { %v2772_v57 = vpop.f32.mrb[3].mxu1 }
  0xfb   :  { %v1810_v58 = vadd.f32 %v2770_v55, %v1770_v54 }
 0x115   :  { %v2790_v59 = vpop.f32.mrb[4].mxu0 }
 0x116   :  { %v2791_v60 = vpop.f32.mrb[5].mxu0 }
 0x117   :  { %v2792_v61 = vadd.f32 %v2791_v60, %v2790_v59  ;;  %v2793_v62 = vpop.f32.mrb[6].mxu0  ;;  %v2812_v63 = vpop.f32.mrb[4].mxu1 }
 0x118   :  { %v2794_v0 = vpop.f32.mrb[7].mxu0  ;;  %v2813_v2 = vpop.f32.mrb[5].mxu1 }
 0x119   :  { %v1850_v1 = vadd.f32 %v2792_v61, %v1810_v58  ;;  %v2814_v3 = vadd.f32 %v2813_v2, %v2812_v63  ;;  %v2815_v4 = vpop.f32.mrb[6].mxu1 }
 0x11a   :  { %v2816_v5 = vpop.f32.mrb[7].mxu1 }
 0x11b   :  { %v1890_v6 = vadd.f32 %v2814_v3, %v1850_v1 }
 0x135   :  { %v2834_v13 = vpop.f32.mrb[8].mxu0 }
 0x136   :  { %v2835_v15 = vpop.f32.mrb[9].mxu0 }
 0x137   :  { %v2836_v16 = vadd.f32 %v2835_v15, %v2834_v13  ;;  %v2837_v17 = vpop.f32.mrb[10].mxu0  ;;  %v2856_v18 = vpop.f32.mrb[8].mxu1  ;;  %v3322_v13 = vld [vmem:[%s4099_s5 + $0x30] sm:$0xff]   ;;  %v2712_v15 = vld [vmem:[%s4100_s4] ss:$0 sm:$0xff] }
 0x138   :  { %v2838_v19 = vpop.f32.mrb[11].mxu0  ;;  %v2857_v20 = vpop.f32.mrb[9].mxu1  ;;  %3074 = vmatpush3.bf16.msra.mxu0 %v3322_v13 }
 0x139   :  { %v1930_v21 = vadd.f32 %v2836_v16, %v1890_v6  ;;  %v2858_v22 = vadd.f32 %v2857_v20, %v2856_v18  ;;  %v2859_v23 = vpop.f32.mrb[10].mxu1  ;;  %3075 = vmatprep.subr.bf16.mxu0 %v3324_v34  ;;  %v2721_v34 = vld [vmem:[%s4101_s6] ss:$0 sm:$0xff] }
 0x13a   :  { %v2860_v25 = vpop.f32.mrb[11].mxu1 }
 0x13b   :  { %v1970_v26 = vadd.f32 %v2858_v22, %v1930_v21 }
 0x13c   :  { %3076 = vmatpush3.bf16.msra.mxu0 %v3323_v14 }
 0x155   :  { %v2878_v33 = vpop.f32.mrb[12].mxu0 }
 0x156   :  { %v2879_v35 = vpop.f32.mrb[13].mxu0 }
 0x157   :  { %v2880_v36 = vadd.f32 %v2879_v35, %v2878_v33  ;;  %v2881_v37 = vpop.f32.mrb[14].mxu0  ;;  %v2900_v38 = vpop.f32.mrb[12].mxu1 }
 0x158   :  { %v2882_v39 = vpop.f32.mrb[15].mxu0  ;;  %v2901_v40 = vpop.f32.mrb[13].mxu1 }
 0x159   :  { %v2010_v41 = vadd.f32 %v2880_v36, %v1970_v26  ;;  %v2902_v42 = vadd.f32 %v2901_v40, %v2900_v38  ;;  %v2903_v43 = vpop.f32.mrb[14].mxu1 }
 0x15a   :  { %v2904_v44 = vpop.f32.mrb[15].mxu1 }
 0x15b   :  { %v2050_v45 = vadd.f32 %v2902_v42, %v2010_v41 }
 0x175   :  { %v2922_v46 = vpop.f32.mrb[16].mxu0 }
 0x176   :  { %v2923_v47 = vpop.f32.mrb[17].mxu0 }
 0x177   :  { %v2924_v48 = vadd.f32 %v2923_v47, %v2922_v46  ;;  %v2925_v49 = vpop.f32.mrb[18].mxu0  ;;  %v2944_v50 = vpop.f32.mrb[16].mxu1 }
 0x178   :  { %v2926_v51 = vpop.f32.mrb[19].mxu0  ;;  %v2945_v53 = vpop.f32.mrb[17].mxu1 }
 0x179   :  { %v2090_v52 = vadd.f32 %v2924_v48, %v2050_v45  ;;  %v2946_v54 = vadd.f32 %v2945_v53, %v2944_v50  ;;  %v2947_v55 = vpop.f32.mrb[18].mxu1 }
 0x17a   :  { %v2948_v56 = vpop.f32.mrb[19].mxu1 }
 0x17b   :  { %v2130_v57 = vadd.f32 %v2946_v54, %v2090_v52 }
 0x195   :  { %v2966_v58 = vpop.f32.mrb[20].mxu0 }
 0x196   :  { %v2967_v59 = vpop.f32.mrb[21].mxu0 }
 0x197   :  { %v2968_v60 = vadd.f32 %v2967_v59, %v2966_v58  ;;  %v2969_v61 = vpop.f32.mrb[22].mxu0  ;;  %v2988_v62 = vpop.f32.mrb[20].mxu1 }
 0x198   :  { %v2970_v63 = vpop.f32.mrb[23].mxu0  ;;  %v2989_v0 = vpop.f32.mrb[21].mxu1 }
 0x199   :  { %v2170_v1 = vadd.f32 %v2968_v60, %v2130_v57  ;;  %v2990_v2 = vadd.f32 %v2989_v0, %v2988_v62  ;;  %v2991_v3 = vpop.f32.mrb[22].mxu1 }
 0x19a   :  { %v2992_v4 = vpop.f32.mrb[23].mxu1 }
 0x19b   :  { %v2210_v5 = vadd.f32 %v2990_v2, %v2170_v1 }
 0x1b5   :  { %v2249_v6 = vpop.f32.mrb[24].mxu0 }
 0x1b6   :  { %v2250_v7 = vadd.f32 %v2249_v6, %v2210_v5  ;;  %v3039_v8 = vpop.f32.mrb[25].mxu0 }
 0x1b7   :  { %v2252_v9 = vpop.f32.mrb[26].mxu0 }
 0x1b8   :  { %v2255_v10 = vmax.f32 %v2250_v7, 0.0  ;;  %v3040_v11 = vpop.f32.mrb[27].mxu0 }
 0x1ba   :  { %v2256_v12 = vpack.c.bf16 %v2255_v10, %v2255_v10 }
 0x1bc   :  { %3058 = vmatmul.mubr.bf16.vlgmr.msra.gmra.mrb[24].mxu1 %v2256_v12 }
 0x28f   :  { %v2362_v16 = vpop.f32.mrb[24].mxu1 }
 0x290   :  { %v2363_v17 = vadd.f32 %v2712_v15, %v2362_v16  ;;  %v3059_v18 = vpop.f32.mrb[25].mxu1 }
 0x291   :  { %v2365_v19 = vpop.f32.mrb[26].mxu1 }
 0x292   :  { %v2368_v20 = vmax.f32 %v2363_v17, 0.0  ;;  %v3060_v21 = vpop.f32.mrb[27].mxu1 }
 0x294   :  { %v2369_v22 = vpack.c.bf16 %v2368_v20, %v2368_v20 }
 0x296   :  { %3078 = vmatmul.mubr.bf16.vlgmr.msra.gmra.mrb[28].mxu0 %v2369_v22 }
 0x369   :  { %v2475_v23 = vpop.f32.mrb[28].mxu0 }
 0x36a   :  { %v2476_v24 = vadd.f32 %v2721_v34, %v2475_v23  ;;  %v3079_v25 = vpop.f32.mrb[29].mxu0 }
 0x36b   :  { %v2478_v26 = vpop.f32.mrb[30].mxu0 }
 0x36c   :  { %2481 = vst [vmem:[%s4102_s7] sm:$0xff] %v2476_v24  ;;  %v3080_v27 = vpop.f32.mrb[31].mxu0 }

</bundles_post_ra>
